<compile_context>
chip_gen: v7x
topology: tpu7x:2x2x1
jax: 0.10.0
libtpu: 0.0.40
codegen_flags: <defaults>
</compile_context>

<pallas_src>
import jax
import jax.numpy as jnp
from jax.experimental import pallas as pl
from jax.experimental.pallas import tpu as pltpu

BN_EPS = 1e-5
TILE = 512                       # node-row tile AND k (neighbor) reduction tile
CIN_PAD = 8                      # pad tiny in_channels up to one sublane
VMEM_LIMIT = 32 * 1024 * 1024    # explicit scoped-VMEM limit (v5e default is 16 MiB)


# --------------------------------------------------------------------------
# kernels
# --------------------------------------------------------------------------
def layer1_kernel(kidx_ref, kcnt_ref, a_ref, x_ref, w1_ref, b1_ref, w2_ref,
                  t_ref, acc_ref):
    """Row-tile i of  t = relu((A @ x) @ W1f + b1f) @ W2f   (BN folded into W/b).

    Block-sparse k loop: only the first kcnt[i] grid steps carry a distinct
    nonzero A block (index_map looks it up from kidx); later steps are no-ops.
    """
    i = pl.program_id(0)
    k = pl.program_id(1)
    n_valid = kcnt_ref[i]                      # nonzero A blocks for this row tile (>= 1)

    @pl.when(k == 0)
    def _():
        acc_ref[...] = jnp.zeros_like(acc_ref)

    @pl.when(k < n_valid)
    def _():
        # Aggregate first (cin << hidden): acc += A[i, kb] @ x[kb]   (bf16 MXU, f32 acc)
        acc_ref[...] += jnp.dot(a_ref[...], x_ref[...],
                                preferred_element_type=jnp.float32)

    @pl.when(k == n_valid - 1)
    def _():
        h = jnp.dot(acc_ref[...].astype(jnp.bfloat16), w1_ref[...],
                    preferred_element_type=jnp.float32) + b1_ref[...]
        h = jnp.maximum(h, 0.0)                # ReLU in f32 (v5e has no bf16 VPU)
        # TODO(synk): training-mode dropout would need PyTorch-matching RNG; eval -> identity.
        # Layer-2's feature transform is fused here so kernel 2 is pure aggregation.
        t_ref[...] = jnp.dot(h.astype(jnp.bfloat16), w2_ref[...],
                             preferred_element_type=jnp.float32).astype(t_ref.dtype)


def layer2_kernel(kidx_ref, kcnt_ref, a_ref, t_ref, b2_ref, z_ref, acc_ref):
    """Row-tile i of  z = A @ t + b2f  (BN folded into W2f/b2f, dropout = identity)."""
    i = pl.program_id(0)
    k = pl.program_id(1)
    n_valid = kcnt_ref[i]

    @pl.when(k == 0)
    def _():
        # Initialize the accumulator with the folded bias -> no separate epilogue add.
        acc_ref[...] = jnp.broadcast_to(b2_ref[...], acc_ref.shape)

    @pl.when(k < n_valid)
    def _():
        acc_ref[...] += jnp.dot(a_ref[...], t_ref[...],
                                preferred_element_type=jnp.float32)

    @pl.when(k == n_valid - 1)
    def _():
        z_ref[...] = acc_ref[...]


# --------------------------------------------------------------------------
# plain-JAX glue
# --------------------------------------------------------------------------
def _round_up(n, m):
    return ((n + m - 1) // m) * m


def build_padded_adjacency_and_blocks(edge_index, num_nodes, n_pad, tile):
    """A_hat = D^{-1/2}(A+I)D^{-1/2}, built directly at padded size and cast to bf16
    in one fused pass, plus the per-row-tile block-sparsity schedule (compacted
    nonzero k-block indices + counts) consumed via scalar prefetch."""
    src, dst = edge_index[0], edge_index[1]
    a = jnp.zeros((n_pad, n_pad), jnp.float32)
    a = a.at[dst, src].add(1.0)                                # row = destination node
    idx = jnp.arange(n_pad)
    # add the *missing* self-loops, real nodes only (padded rows stay all-zero)
    need_loop = (jnp.diagonal(a) == 0.0) & (idx < num_nodes)
    a = a.at[idx, idx].add(need_loop.astype(jnp.float32))
    deg = jnp.sum(a, axis=1)
    dinv = jnp.where(deg > 0, jax.lax.rsqrt(deg), 0.0)

    nb = n_pad // tile
    # block-nonzero mask from the unnormalized counts (values >= 0; padded rows/cols are 0)
    blk_nnz = a.reshape(nb, tile, nb, tile).sum(axis=(1, 3)) > 0.0

    # normalize + cast in ONE fused pass: no second f32 A_hat copy in HBM
    a_bf = (a * dinv[:, None] * dinv[None, :]).astype(jnp.bfloat16)

    # Compacted nonzero k-block indices per row tile; trailing slots repeat the
    # last valid block so skipped grid steps never trigger a fresh DMA.
    cols = jnp.arange(nb, dtype=jnp.int32)
    counts = blk_nnz.sum(axis=1).astype(jnp.int32)
    keys = jnp.where(blk_nnz, cols[None, :], cols[None, :] + nb)
    order = jnp.argsort(keys, axis=1).astype(jnp.int32)       # nonzero block cols first, ascending
    last = jnp.take_along_axis(order, jnp.maximum(counts - 1, 0)[:, None], axis=1)
    kidx = jnp.where(cols[None, :] < counts[:, None], order, last)
    kcnt = jnp.maximum(counts, 1)                              # all-zero row tile: one (zero) block
    return a_bf, kidx, kcnt


def fold_batchnorm(w, b, gamma, beta, mean, var):
    """Fold eval-mode BatchNorm into the preceding linear map."""
    s = gamma * jax.lax.rsqrt(var + BN_EPS)
    return w * s[None, :], (b - mean) * s + beta


def glorot(key, fan_in, fan_out):
    lim = (6.0 / (fan_in + fan_out)) ** 0.5
    return jax.random.uniform(key, (fan_in, fan_out), jnp.float32, -lim, lim)


def init_params(key, in_channels, out_channels):
    hidden = 2 * out_channels
    k1, k2 = jax.random.split(key)
    return dict(
        w1=glorot(k1, in_channels, hidden),
        b1=jnp.zeros((hidden,), jnp.float32),
        g1=jnp.ones((hidden,), jnp.float32),       # BN weight
        beta1=jnp.zeros((hidden,), jnp.float32),   # BN bias
        m1=jnp.zeros((hidden,), jnp.float32),      # BN running_mean
        v1=jnp.ones((hidden,), jnp.float32),       # BN running_var
        w2=glorot(k2, hidden, out_channels),
        b2=jnp.zeros((out_channels,), jnp.float32),
        g2=jnp.ones((out_channels,), jnp.float32),
        beta2=jnp.zeros((out_channels,), jnp.float32),
        m2=jnp.zeros((out_channels,), jnp.float32),
        v2=jnp.ones((out_channels,), jnp.float32),
    )


def net_forward(x, edge_index, params, out_channels):
    n, cin = x.shape
    hidden = 2 * out_channels

    # ---- fold eval-mode BatchNorm into the conv weights / biases ----
    w1f, b1f = fold_batchnorm(params["w1"], params["b1"], params["g1"],
                              params["beta1"], params["m1"], params["v1"])
    w2f, b2f = fold_batchnorm(params["w2"], params["b2"], params["g2"],
                              params["beta2"], params["m2"], params["v2"])

    # ---- padded A_hat (bf16) + block-sparsity schedule ----
    # TODO(synk): dense A_hat is O(n^2); a true CSR/COO build is out of scope here.
    n_pad = _round_up(max(n, TILE), TILE)
    a_bf, kidx, kcnt = build_padded_adjacency_and_blocks(edge_index, n, n_pad, TILE)

    # pad tiny cin to a full sublane; extra zero rows of W1 are inert
    cin_pad = _round_up(max(cin, CIN_PAD), CIN_PAD)
    x_pad = jnp.zeros((n_pad, cin_pad), jnp.bfloat16).at[:n, :cin].set(x.astype(jnp.bfloat16))
    w1_bf = jnp.zeros((cin_pad, hidden), jnp.bfloat16).at[:cin, :].set(w1f.astype(jnp.bfloat16))
    w2_bf = w2f.astype(jnp.bfloat16)
    b1_row = b1f.reshape(1, hidden)
    b2_row = b2f.reshape(1, out_channels)

    nb = n_pad // TILE
    grid = (nb, nb)
    mosaic = pltpu.CompilerParams(
        dimension_semantics=("parallel", "arbitrary"),   # row axis shards across v7x's 2 TCs
        vmem_limit_bytes=VMEM_LIMIT)

    # ---- kernel 1: t = relu((A @ x) @ W1f + b1f) @ W2f ----
    t = pl.pallas_call(
        layer1_kernel,
        out_shape=jax.ShapeDtypeStruct((n_pad, out_channels), jnp.bfloat16),
        grid_spec=pltpu.PrefetchScalarGridSpec(
            num_scalar_prefetch=2,
            grid=grid,
            in_specs=[
                pl.BlockSpec((TILE, TILE), lambda i, k, ki, kc: (i, ki[i, k])),        # A_hat block
                pl.BlockSpec((TILE, cin_pad), lambda i, k, ki, kc: (ki[i, k], 0)),     # x rows
                pl.BlockSpec((cin_pad, hidden), lambda i, k, ki, kc: (0, 0)),          # W1 fused
                pl.BlockSpec((1, hidden), lambda i, k, ki, kc: (0, 0)),                # b1 fused
                pl.BlockSpec((hidden, out_channels), lambda i, k, ki, kc: (0, 0)),     # W2 fused
            ],
            out_specs=pl.BlockSpec((TILE, out_channels), lambda i, k, ki, kc: (i, 0)),
            scratch_shapes=[pltpu.VMEM((TILE, cin_pad), jnp.float32)],
        ),
        compiler_params=mosaic,
    )(kidx, kcnt, a_bf, x_pad, w1_bf, b1_row, w2_bf)

    # ---- kernel 2: z = A @ t + b2f ----
    z = pl.pallas_call(
        layer2_kernel,
        out_shape=jax.ShapeDtypeStruct((n_pad, out_channels), jnp.float32),
        grid_spec=pltpu.PrefetchScalarGridSpec(
            num_scalar_prefetch=2,
            grid=grid,
            in_specs=[
                pl.BlockSpec((TILE, TILE), lambda i, k, ki, kc: (i, ki[i, k])),            # A_hat block
                pl.BlockSpec((TILE, out_channels), lambda i, k, ki, kc: (ki[i, k], 0)),    # t rows
                pl.BlockSpec((1, out_channels), lambda i, k, ki, kc: (0, 0)),              # b2 fused
            ],
            out_specs=pl.BlockSpec((TILE, out_channels), lambda i, k, ki, kc: (i, 0)),
            scratch_shapes=[pltpu.VMEM((TILE, out_channels), jnp.float32)],
        ),
        compiler_params=mosaic,
    )(kidx, kcnt, a_bf, t, b2_row)

    return z[:n]


def reference_forward(x, edge_index, params, out_channels):
    """Pure-JAX f32 reference (eval mode) for a tolerance check."""
    n = x.shape[0]
    src, dst = edge_index[0], edge_index[1]
    a = jnp.zeros((n, n), jnp.float32).at[dst, src].add(1.0)
    idx = jnp.arange(n)
    a = a.at[idx, idx].add(jnp.where(jnp.diagonal(a) == 0.0, 1.0, 0.0))
    deg = a.sum(axis=1)
    dinv = jnp.where(deg > 0, jax.lax.rsqrt(deg), 0.0)
    a_hat = a * dinv[:, None] * dinv[None, :]
    w1f, b1f = fold_batchnorm(params["w1"], params["b1"], params["g1"],
                              params["beta1"], params["m1"], params["v1"])
    w2f, b2f = fold_batchnorm(params["w2"], params["b2"], params["g2"],
                              params["beta2"], params["m2"], params["v2"])
    h = jnp.maximum(a_hat @ (x @ w1f) + b1f, 0.0)
    return a_hat @ (h @ w2f) + b2f


# --------------------------------------------------------------------------
# demo
# --------------------------------------------------------------------------
if __name__ == "__main__":
    key = jax.random.PRNGKey(0)
    k_x, k_p = jax.random.split(key)

    num_nodes = 8
    in_channels = 4
    out_channels = 128            # matches the PyTorch spec (lane-dense output)

    x = jax.random.normal(k_x, (num_nodes, in_channels), jnp.float32)
    # small deterministic directed graph (missing self-loops added inside A_hat)
    edge_index = jnp.array(
        [[0, 1, 2, 3, 4, 5, 6, 7, 0, 2],
         [1, 2, 3, 4, 5, 6, 7, 0, 4, 6]], dtype=jnp.int32)

    params = init_params(k_p, in_channels, out_channels)

    z = net_forward(x, edge_index, params, out_channels)
    jax.block_until_ready(z)

    assert z.shape == (num_nodes, out_channels) and z.dtype == jnp.float32
    assert bool(jnp.all(jnp.isfinite(z)))

    z_ref = reference_forward(x, edge_index, params, out_channels)
    assert bool(jnp.allclose(z, z_ref, atol=1e-1, rtol=1e-1)), \
        f"max abs err {float(jnp.max(jnp.abs(z - z_ref)))}"

    print("KERNEL_OK")
</pallas_src>

<mosaic_0001>
module attributes {stable_mosaic.version = 11 : i64} {
  func.func @layer1_kernel(%arg0: i32, %arg1: i32, %arg2: memref<1x1xi32, #tpu.memory_space<smem>>, %arg3: memref<1xi32, #tpu.memory_space<smem>>, %arg4: memref<512x512xbf16, #tpu.memory_space<vmem>>, %arg5: memref<512x8xbf16, #tpu.memory_space<vmem>>, %arg6: memref<8x256xbf16, #tpu.memory_space<vmem>>, %arg7: memref<1x256xf32, #tpu.memory_space<vmem>>, %arg8: memref<256x128xbf16, #tpu.memory_space<vmem>>, %arg9: memref<512x128xbf16, #tpu.memory_space<vmem>>, %arg10: memref<512x8xf32, #tpu.memory_space<vmem>>) attributes {dimension_semantics = [#tpu.dimension_semantics<parallel>, #tpu.dimension_semantics<arbitrary>], iteration_bounds = array<i64: 1, 1>, scalar_prefetch = 2 : i64, scratch_operands = 1 : i64, tpu.core_type = #tpu.core_type<tc>, window_params = [{transform_indices = @transform_0, window_bounds = array<i64: 512, 512>}, {transform_indices = @transform_1, window_bounds = array<i64: 512, 8>}, {pipeline_mode = #tpu.pipeline_mode<synchronous>, transform_indices = @transform_2, window_bounds = array<i64: 8, 256>}, {pipeline_mode = #tpu.pipeline_mode<synchronous>, transform_indices = @transform_3, window_bounds = array<i64: 1, 256>}, {pipeline_mode = #tpu.pipeline_mode<synchronous>, transform_indices = @transform_4, window_bounds = array<i64: 256, 128>}, {transform_indices = @transform_5, window_bounds = array<i64: 512, 128>}]} {
    %0 = arith.index_cast %arg0 : i32 to index
    %1 = memref.load %arg3[%0] : memref<1xi32, #tpu.memory_space<smem>>
    %c0_i32 = arith.constant 0 : i32
    %2 = arith.cmpi eq, %arg1, %c0_i32 : i32
    %3 = arith.extui %2 : i1 to i32
    %c0_i32_0 = arith.constant 0 : i32
    %4 = arith.cmpi ne, %3, %c0_i32_0 : i32
    scf.if %4 {
      %cst = arith.constant 0.000000e+00 : f32
      %12 = vector.broadcast %cst : f32 to vector<512x8xf32>
      %c0 = arith.constant 0 : index
      %c0_3 = arith.constant 0 : index
      %13 = vector.load %arg10[%c0, %c0_3] : memref<512x8xf32, #tpu.memory_space<vmem>>, vector<512x8xf32>
      tpu.vector_store %arg10[%c0, %c0_3], %12 {strides = array<i32>} : memref<512x8xf32, #tpu.memory_space<vmem>>, vector<512x8xf32>,
    } else {
    }
    %5 = arith.cmpi slt, %arg1, %1 : i32
    %6 = arith.extui %5 : i1 to i32
    %c0_i32_1 = arith.constant 0 : i32
    %7 = arith.cmpi ne, %6, %c0_i32_1 : i32
    scf.if %7 {
      %c0 = arith.constant 0 : index
      %c0_3 = arith.constant 0 : index
      %12 = vector.load %arg10[%c0, %c0_3] : memref<512x8xf32, #tpu.memory_space<vmem>>, vector<512x8xf32>
      %c0_4 = arith.constant 0 : index
      %c0_5 = arith.constant 0 : index
      %13 = vector.load %arg4[%c0_4, %c0_5] : memref<512x512xbf16, #tpu.memory_space<vmem>>, vector<512x512xbf16>
      %c0_6 = arith.constant 0 : index
      %c0_7 = arith.constant 0 : index
      %14 = vector.load %arg5[%c0_6, %c0_7] : memref<512x8xbf16, #tpu.memory_space<vmem>>, vector<512x8xbf16>
      %cst = arith.constant dense<0.000000e+00> : vector<512x8xf32>
      %15 = tpu.matmul %13, %14, %cst {dimension_numbers = #tpu.dot_dimension_numbers<[1], [0], [0], [1], [0, 0, 1, 1], [], []>} : vector<512x512xbf16>, vector<512x8xbf16>, vector<512x8xf32> -> vector<512x8xf32>
      %16 = arith.addf %12, %15 : vector<512x8xf32>
      %c0_8 = arith.constant 0 : index
      %c0_9 = arith.constant 0 : index
      %17 = vector.load %arg10[%c0_8, %c0_9] : memref<512x8xf32, #tpu.memory_space<vmem>>, vector<512x8xf32>
      tpu.vector_store %arg10[%c0_8, %c0_9], %16 {strides = array<i32>} : memref<512x8xf32, #tpu.memory_space<vmem>>, vector<512x8xf32>,
    } else {
    }
    %c1_i32 = arith.constant 1 : i32
    %8 = arith.subi %1, %c1_i32 : i32
    %9 = arith.cmpi eq, %arg1, %8 : i32
    %10 = arith.extui %9 : i1 to i32
    %c0_i32_2 = arith.constant 0 : i32
    %11 = arith.cmpi ne, %10, %c0_i32_2 : i32
    scf.if %11 {
      %c0 = arith.constant 0 : index
      %c0_3 = arith.constant 0 : index
      %12 = vector.load %arg10[%c0, %c0_3] : memref<512x8xf32, #tpu.memory_space<vmem>>, vector<512x8xf32>
      %13 = arith.truncf %12 : vector<512x8xf32> to vector<512x8xbf16>
      %c0_4 = arith.constant 0 : index
      %c0_5 = arith.constant 0 : index
      %14 = vector.load %arg6[%c0_4, %c0_5] : memref<8x256xbf16, #tpu.memory_space<vmem>>, vector<8x256xbf16>
      %cst = arith.constant dense<0.000000e+00> : vector<512x256xf32>
      %15 = tpu.matmul %13, %14, %cst {dimension_numbers = #tpu.dot_dimension_numbers<[1], [0], [0], [1], [0, 0, 1, 1], [], []>} : vector<512x8xbf16>, vector<8x256xbf16>, vector<512x256xf32> -> vector<512x256xf32>
      %c0_6 = arith.constant 0 : index
      %c0_7 = arith.constant 0 : index
      %16 = vector.load %arg7[%c0_6, %c0_7] : memref<1x256xf32, #tpu.memory_space<vmem>>, vector<1x256xf32>
      %17 = vector.broadcast %16 : vector<1x256xf32> to vector<512x256xf32>
      %18 = arith.addf %15, %17 : vector<512x256xf32>
      %cst_8 = arith.constant 0.000000e+00 : f32
      %19 = vector.broadcast %cst_8 : f32 to vector<512x256xf32>
      %20 = arith.maximumf %18, %19 : vector<512x256xf32>
      %21 = arith.truncf %20 : vector<512x256xf32> to vector<512x256xbf16>
      %c0_9 = arith.constant 0 : index
      %c0_10 = arith.constant 0 : index
      %22 = vector.load %arg8[%c0_9, %c0_10] : memref<256x128xbf16, #tpu.memory_space<vmem>>, vector<256x128xbf16>
      %cst_11 = arith.constant dense<0.000000e+00> : vector<512x128xf32>
      %23 = tpu.matmul %21, %22, %cst_11 {dimension_numbers = #tpu.dot_dimension_numbers<[1], [0], [0], [1], [0, 0, 1, 1], [], []>} : vector<512x256xbf16>, vector<256x128xbf16>, vector<512x128xf32> -> vector<512x128xf32>
      %24 = arith.truncf %23 : vector<512x128xf32> to vector<512x128xbf16>
      %c0_12 = arith.constant 0 : index
      %c0_13 = arith.constant 0 : index
      %25 = vector.load %arg9[%c0_12, %c0_13] : memref<512x128xbf16, #tpu.memory_space<vmem>>, vector<512x128xbf16>
      tpu.vector_store %arg9[%c0_12, %c0_13], %24 {strides = array<i32>} : memref<512x128xbf16, #tpu.memory_space<vmem>>, vector<512x128xbf16>,
    } else {
    }
    return
  }
  func.func @transform_0(%arg0: i32, %arg1: i32, %arg2: memref<1x1xi32, #tpu.memory_space<smem>>, %arg3: memref<1xi32, #tpu.memory_space<smem>>) -> (i32, i32) {
    %0 = arith.index_cast %arg0 : i32 to index
    %1 = arith.index_cast %arg1 : i32 to index
    %2 = memref.load %arg2[%0, %1] : memref<1x1xi32, #tpu.memory_space<smem>>
    %c0_i32 = arith.constant 0 : i32
    return %arg0, %2 : i32, i32
  }
  func.func @transform_1(%arg0: i32, %arg1: i32, %arg2: memref<1x1xi32, #tpu.memory_space<smem>>, %arg3: memref<1xi32, #tpu.memory_space<smem>>) -> (i32, i32) {
    %0 = arith.index_cast %arg0 : i32 to index
    %1 = arith.index_cast %arg1 : i32 to index
    %2 = memref.load %arg2[%0, %1] : memref<1x1xi32, #tpu.memory_space<smem>>
    %c0_i32 = arith.constant 0 : i32
    %c0_i32_0 = arith.constant 0 : i32
    return %2, %c0_i32 : i32, i32
  }
  func.func @transform_2(%arg0: i32, %arg1: i32, %arg2: memref<1x1xi32, #tpu.memory_space<smem>>, %arg3: memref<1xi32, #tpu.memory_space<smem>>) -> (i32, i32) {
    %c0_i32 = arith.constant 0 : i32
    %c0_i32_0 = arith.constant 0 : i32
    %c0_i32_1 = arith.constant 0 : i32
    return %c0_i32, %c0_i32_0 : i32, i32
  }
  func.func @transform_3(%arg0: i32, %arg1: i32, %arg2: memref<1x1xi32, #tpu.memory_space<smem>>, %arg3: memref<1xi32, #tpu.memory_space<smem>>) -> (i32, i32) {
    %c0_i32 = arith.constant 0 : i32
    %c0_i32_0 = arith.constant 0 : i32
    %c0_i32_1 = arith.constant 0 : i32
    return %c0_i32, %c0_i32_0 : i32, i32
  }
  func.func @transform_4(%arg0: i32, %arg1: i32, %arg2: memref<1x1xi32, #tpu.memory_space<smem>>, %arg3: memref<1xi32, #tpu.memory_space<smem>>) -> (i32, i32) {
    %c0_i32 = arith.constant 0 : i32
    %c0_i32_0 = arith.constant 0 : i32
    %c0_i32_1 = arith.constant 0 : i32
    return %c0_i32, %c0_i32_0 : i32, i32
  }
  func.func @transform_5(%arg0: i32, %arg1: i32, %arg2: memref<1x1xi32, #tpu.memory_space<smem>>, %arg3: memref<1xi32, #tpu.memory_space<smem>>) -> (i32, i32) {
    %c0_i32 = arith.constant 0 : i32
    %c0_i32_0 = arith.constant 0 : i32
    return %arg0, %c0_i32 : i32, i32
  }
}

</mosaic_0001>

<bundles_post_ra>
// kernel: tpu_custom_call.1
= control target key start
LH: loop header
LB: loop body
LE: loop exit
PB: predicated region body
PF: predicated region fallthrough
CT: control target
= control target key end

     0   :  { %14 = vsyncpa [#allocation7], 0  ;;  %s5018_s0 = inlined_call_operand.<no memory space> [shape: s32[1,1], index: 0, kind: input, shape index: {}]   ;;  %s5019_s1 = inlined_call_operand.<no memory space> [shape: s32[1], index: 1, kind: input, shape index: {}]   ;;  %s5020_s2 = inlined_call_operand.hbm [shape: bf16[512,512], index: 2, kind: input, shape index: {}]   ;;  %s5021_s3 = inlined_call_operand.vmem [shape: bf16[512,8], index: 3, kind: input, shape index: {}]   ;;  %s5022_s4 = inlined_call_operand.vmem [shape: bf16[8,256], index: 4, kind: input, shape index: {}]   ;;  %s5023_s5 = inlined_call_operand.vmem [shape: f32[1,256], index: 5, kind: input, shape index: {}]   ;;  %s5024_s6 = inlined_call_operand.vmem [shape: bf16[256,128], index: 6, kind: input, shape index: {}]   ;;  %s5025_s7 = inlined_call_operand.hbm [shape: bf16[512,128], index: 7, kind: output, shape index: {}]  }
   0x1   :  { %15 = vsyncpa [#allocation8], 0  ;;  %s3772_s26 = sshll.u32 %s5018_s0, 8  ;;  %s4361_s30 = smov [#allocation6]  }
   0x2   :  { %s27_s29 = scalar_lea.hbm %s5020_s2, %s3772_s26  ;;  %s28_s8 = sshll.u32 %s4361_s30, 4  ;;  %s29_s8 = int_to_ptr.vmem [resolvable:$true] %s28_s8 }
   0x3   :  { %s4311_s9 = scalar_lea.hbm %s27_s29, 16384  ;;  %s4313_s12 = scalar_lea.hbm %s5020_s2, 16384 }
   0x4   :  { %p4312_p0 = scmp.ne.s32.totalorder %s27_s29, %s4311_s9  ;;  %p4314_p1 = scmp.lt.u32.totalorder %s27_s29, %s5020_s2 }
   0x5   :  { %p4315_p2 = scmp.lt.u32.totalorder %s4313_s12, %s4311_s9  ;;  %p4317_p4 = scmp.lt.u32.totalorder %s4311_s9, %s27_s29 }
   0x7   :  { %p4316_p3 = por %p4315_p2, %p4314_p1 }
   0x9   :  { %p4318_p5 = por %p4317_p4, %p4316_p3 }
   0xb   :  { %p4319_p6 = pnand %p4318_p5, %p4312_p0 }
   0xd   :  { %4322 = shalt.err (!%p4319_p6)
}
   0xe   :  { %s4323_s15 = scalar_lea.vmem %s29_s8, 16384  ;;  %p4328_p8 = scmp.lt.s32.totalorder %s29_s8, %s29_s8 }
   0xf   :  { %p4324_p7 = scmp.ne.s32.totalorder %s29_s8, %s4323_s15  ;;  %p4329_p9 = scmp.lt.s32.totalorder %s4323_s15, %s4323_s15 }
  0x11   :  { %p4330_p10 = por %p4329_p9, %p4328_p8 }
  0x13   :  { %p4331_p11 = pnand %p4330_p10, %p4324_p7 }
  0x15   :  { %4334 = shalt.err (!%p4331_p11)
}
  0x16   :  { %s4362_s16 = smov 256   ;;  %s4363_s17 = smov 16  }
  0x17   :  { %34 = dma.hbm_to_vmem [thread:$0]  %s27_s29, 16384, %s29_s8, [#allocation7], %s4362_s16, %s4362_s16, %s4363_s17  }
  0x18   :  { %4357 = dma.done.wait [#allocation7], 16384  }
  0x19   :  { %4358 = vsyncadd [#allocation7], 4294950912  ;;  %s3490_s19 = sshll.u32 %s5018_s0, 6  ;;  %vm94_vm0 = vcmask 64512   ;;  %v4364_v0 = vmov 0.0   ;;  %p3493_p13 = scmp.le.s32.totalorder %s5019_s1, 0 }
  0x1a   :  { %p4429_p12 = scmp.lt.s32.totalorder %s3490_s19, 63  ;;  %95 = vst.msk [vmem:[#allocation2] sm:$0xff] %vm94_vm0, %v4364_v0  ;;  %96 = vst.msk [vmem:[#allocation2 + $0x8] sm:$0xff] %vm94_vm0, %v4364_v0  ;;  %v4365_v2 = vmov (!%p3493_p13), 0   ;;  %v4103_v20 = vld [vmem:[#allocation6 + $0x4] ss:$16 sps:$4 sm:$0xff] (!%p3493_p13)  }
  0x1b   :  { %97 = vst.msk [vmem:[#allocation2 + $0x10] sm:$0xff] %vm94_vm0, %v4364_v0  ;;  %98 = vst.msk [vmem:[#allocation2 + $0x18] sm:$0xff] %vm94_vm0, %v4364_v0  ;;  %1251 = vmatprep.subr.bf16.mxu0 (!%p3493_p13), %v4365_v2  ;;  %1540 = vmatprep.subr.bf16.mxu1 (!%p3493_p13), %v4365_v2  ;;  %v4106_v22 = vld [vmem:[#allocation6 + $0xc] ss:$16 sps:$4 sm:$0xff] (!%p3493_p13)   ;;  %v4101_v36 = vld [vmem:[#allocation6] ss:$16 sps:$4 sm:$0xff] (!%p3493_p13)  }
  0x1c   :  { %99 = vst.msk [vmem:[#allocation2 + $0x20] sm:$0xff] %vm94_vm0, %v4364_v0  ;;  %100 = vst.msk [vmem:[#allocation2 + $0x28] sm:$0xff] %vm94_vm0, %v4364_v0  ;;  %s5028_s19 = smov (!%p4429_p12, %s3490_s19), 63  ;;  %1283 = vmatprep.mubr.bf16.mxu0 (!%p3493_p13), %v4103_v20  ;;  %1572 = vmatprep.mubr.bf16.mxu1 (!%p3493_p13), %v4106_v22  ;;  %v4104_v37 = vld [vmem:[#allocation6 + $0x8] ss:$16 sps:$4 sm:$0xff] (!%p3493_p13)  }
  0x1d   :  { %101 = vst.msk [vmem:[#allocation2 + $0x30] sm:$0xff] %vm94_vm0, %v4364_v0  ;;  %102 = vst.msk [vmem:[#allocation2 + $0x38] sm:$0xff] %vm94_vm0, %v4364_v0  ;;  %s3491_s25 = sshll.u32 %s5028_s19, 2  ;;  %v4107_v38 = vld [vmem:[#allocation6 + $0x24] ss:$16 sps:$4 sm:$0xff] (!%p3493_p13)  }
  0x1e   :  { %103 = vst.msk [vmem:[#allocation2 + $0x40] sm:$0xff] %vm94_vm0, %v4364_v0  ;;  %104 = vst.msk [vmem:[#allocation2 + $0x48] sm:$0xff] %vm94_vm0, %v4364_v0  ;;  %s4570_s28 = scalar_lea.vmem %s5021_s3, %s3491_s25  ;;  %v4109_v39 = vld [vmem:[#allocation6 + $0x2c] ss:$16 sps:$4 sm:$0xff] (!%p3493_p13)   ;;  %v4111_v40 = vld [vmem:[#allocation6 + $0x20] ss:$16 sps:$4 sm:$0xff] (!%p3493_p13)  }
  0x1f   :  { %105 = vst.msk [vmem:[#allocation2 + $0x50] sm:$0xff] %vm94_vm0, %v4364_v0  ;;  %106 = vst.msk [vmem:[#allocation2 + $0x58] sm:$0xff] %vm94_vm0, %v4364_v0  ;;  %v4069_v1 = vld [vmem:[%s4570_s28] sm:$0xff] (!%p3493_p13)   ;;  %v4071_v4 = vld [vmem:[%s4570_s28 + $0x8] sm:$0xff] (!%p3493_p13)  }
  0x20   :  { %107 = vst.msk [vmem:[#allocation2 + $0x60] sm:$0xff] %vm94_vm0, %v4364_v0  ;;  %108 = vst.msk [vmem:[#allocation2 + $0x68] sm:$0xff] %vm94_vm0, %v4364_v0  ;;  %v4070_v3 = vld [vmem:[%s4570_s28 + $0x80] sm:$0xff] (!%p3493_p13)   ;;  %1252 = vmatpush1.bf16.msra.mxu0 (!%p3493_p13), %v4069_v1  ;;  %v4072_v5 = vld [vmem:[%s4570_s28 + $0x88] sm:$0xff] (!%p3493_p13)  }
  0x21   :  { %109 = vst.msk [vmem:[#allocation2 + $0x70] sm:$0xff] %vm94_vm0, %v4364_v0  ;;  %110 = vst.msk [vmem:[#allocation2 + $0x78] sm:$0xff] %vm94_vm0, %v4364_v0  ;;  %1541 = vmatpush1.bf16.msra.mxu1 (!%p3493_p13), %v4070_v3  ;;  %1253 = vmatprep.subr.bf16.mxu0 (!%p3493_p13), %v4365_v2  ;;  %v4073_v6 = vld [vmem:[%s4570_s28 + $0x10] sm:$0xff] (!%p3493_p13)   ;;  %v4075_v8 = vld [vmem:[%s4570_s28 + $0x18] sm:$0xff] (!%p3493_p13)  }
  0x22   :  { %111 = vst.msk [vmem:[#allocation2 + $0x80] sm:$0xff] %vm94_vm0, %v4364_v0  ;;  %112 = vst.msk [vmem:[#allocation2 + $0x88] sm:$0xff] %vm94_vm0, %v4364_v0  ;;  %1542 = vmatprep.subr.bf16.mxu1 (!%p3493_p13), %v4365_v2  ;;  %v4074_v7 = vld [vmem:[%s4570_s28 + $0x90] sm:$0xff] (!%p3493_p13)   ;;  %v4076_v9 = vld [vmem:[%s4570_s28 + $0x98] sm:$0xff] (!%p3493_p13)  }
  0x23   :  { %113 = vst.msk [vmem:[#allocation2 + $0x90] sm:$0xff] %vm94_vm0, %v4364_v0  ;;  %114 = vst.msk [vmem:[#allocation2 + $0x98] sm:$0xff] %vm94_vm0, %v4364_v0  ;;  %v4077_v10 = vld [vmem:[%s4570_s28 + $0x20] sm:$0xff] (!%p3493_p13)   ;;  %v4079_v12 = vld [vmem:[%s4570_s28 + $0x28] sm:$0xff] (!%p3493_p13)  }
  0x24   :  { %115 = vst.msk [vmem:[#allocation2 + $0xa0] sm:$0xff] %vm94_vm0, %v4364_v0  ;;  %116 = vst.msk [vmem:[#allocation2 + $0xa8] sm:$0xff] %vm94_vm0, %v4364_v0  ;;  %1254 = vmatpush1.bf16.msra.mxu0 (!%p3493_p13), %v4071_v4  ;;  %v4078_v11 = vld [vmem:[%s4570_s28 + $0xa0] sm:$0xff] (!%p3493_p13)   ;;  %v4080_v13 = vld [vmem:[%s4570_s28 + $0xa8] sm:$0xff] (!%p3493_p13)  }
  0x25   :  { %117 = vst.msk [vmem:[#allocation2 + $0xb0] sm:$0xff] %vm94_vm0, %v4364_v0  ;;  %118 = vst.msk [vmem:[#allocation2 + $0xb8] sm:$0xff] %vm94_vm0, %v4364_v0  ;;  %1543 = vmatpush1.bf16.msra.mxu1 (!%p3493_p13), %v4072_v5  ;;  %1255 = vmatprep.subr.bf16.mxu0 (!%p3493_p13), %v4365_v2  ;;  %v4081_v14 = vld [vmem:[%s4570_s28 + $0x30] sm:$0xff] (!%p3493_p13)   ;;  %v4083_v16 = vld [vmem:[%s4570_s28 + $0x38] sm:$0xff] (!%p3493_p13)  }
  0x26   :  { %119 = vst.msk [vmem:[#allocation2 + $0xc0] sm:$0xff] %vm94_vm0, %v4364_v0  ;;  %120 = vst.msk [vmem:[#allocation2 + $0xc8] sm:$0xff] %vm94_vm0, %v4364_v0  ;;  %1544 = vmatprep.subr.bf16.mxu1 (!%p3493_p13), %v4365_v2  ;;  %v4082_v15 = vld [vmem:[%s4570_s28 + $0xb0] sm:$0xff] (!%p3493_p13)   ;;  %v4084_v17 = vld [vmem:[%s4570_s28 + $0xb8] sm:$0xff] (!%p3493_p13)  }
  0x27   :  { %121 = vst.msk [vmem:[#allocation2 + $0xd0] sm:$0xff] %vm94_vm0, %v4364_v0  ;;  %122 = vst.msk [vmem:[#allocation2 + $0xd8] sm:$0xff] %vm94_vm0, %v4364_v0  ;;  %v4085_v18 = vld [vmem:[%s4570_s28 + $0x40] sm:$0xff] (!%p3493_p13)   ;;  %v4087_v21 = vld [vmem:[%s4570_s28 + $0x48] sm:$0xff] (!%p3493_p13)  }
  0x28   :  { %123 = vst.msk [vmem:[#allocation2 + $0xe0] sm:$0xff] %vm94_vm0, %v4364_v0  ;;  %124 = vst.msk [vmem:[#allocation2 + $0xe8] sm:$0xff] %vm94_vm0, %v4364_v0  ;;  %1256 = vmatpush1.bf16.msra.mxu0 (!%p3493_p13), %v4073_v6  ;;  %v4086_v19 = vld [vmem:[%s4570_s28 + $0xc0] sm:$0xff] (!%p3493_p13)   ;;  %v4088_v23 = vld [vmem:[%s4570_s28 + $0xc8] sm:$0xff] (!%p3493_p13)  }
  0x29   :  { %125 = vst.msk [vmem:[#allocation2 + $0xf0] sm:$0xff] %vm94_vm0, %v4364_v0  ;;  %126 = vst.msk [vmem:[#allocation2 + $0xf8] sm:$0xff] %vm94_vm0, %v4364_v0  ;;  %1545 = vmatpush1.bf16.msra.mxu1 (!%p3493_p13), %v4074_v7  ;;  %1257 = vmatprep.subr.bf16.mxu0 (!%p3493_p13), %v4365_v2  ;;  %v4089_v24 = vld [vmem:[%s4570_s28 + $0x50] sm:$0xff] (!%p3493_p13)   ;;  %v4091_v26 = vld [vmem:[%s4570_s28 + $0x58] sm:$0xff] (!%p3493_p13)  }
  0x2a   :  { %127 = vst.msk [vmem:[#allocation2 + $0x100] sm:$0xff] %vm94_vm0, %v4364_v0  ;;  %128 = vst.msk [vmem:[#allocation2 + $0x108] sm:$0xff] %vm94_vm0, %v4364_v0  ;;  %1546 = vmatprep.subr.bf16.mxu1 (!%p3493_p13), %v4365_v2  ;;  %v4090_v25 = vld [vmem:[%s4570_s28 + $0xd0] sm:$0xff] (!%p3493_p13)   ;;  %v4092_v27 = vld [vmem:[%s4570_s28 + $0xd8] sm:$0xff] (!%p3493_p13)  }
  0x2b   :  { %129 = vst.msk [vmem:[#allocation2 + $0x110] sm:$0xff] %vm94_vm0, %v4364_v0  ;;  %130 = vst.msk [vmem:[#allocation2 + $0x118] sm:$0xff] %vm94_vm0, %v4364_v0  ;;  %v4093_v28 = vld [vmem:[%s4570_s28 + $0x60] sm:$0xff] (!%p3493_p13)   ;;  %v4095_v30 = vld [vmem:[%s4570_s28 + $0x68] sm:$0xff] (!%p3493_p13)  }
  0x2c   :  { %131 = vst.msk [vmem:[#allocation2 + $0x120] sm:$0xff] %vm94_vm0, %v4364_v0  ;;  %132 = vst.msk [vmem:[#allocation2 + $0x128] sm:$0xff] %vm94_vm0, %v4364_v0  ;;  %1258 = vmatpush1.bf16.msra.mxu0 (!%p3493_p13), %v4075_v8  ;;  %v4094_v29 = vld [vmem:[%s4570_s28 + $0xe0] sm:$0xff] (!%p3493_p13)   ;;  %v4096_v31 = vld [vmem:[%s4570_s28 + $0xe8] sm:$0xff] (!%p3493_p13)  }
  0x2d   :  { %133 = vst.msk [vmem:[#allocation2 + $0x130] sm:$0xff] %vm94_vm0, %v4364_v0  ;;  %134 = vst.msk [vmem:[#allocation2 + $0x138] sm:$0xff] %vm94_vm0, %v4364_v0  ;;  %1547 = vmatpush1.bf16.msra.mxu1 (!%p3493_p13), %v4076_v9  ;;  %1259 = vmatprep.subr.bf16.mxu0 (!%p3493_p13), %v4365_v2  ;;  %v4097_v32 = vld [vmem:[%s4570_s28 + $0x70] sm:$0xff] (!%p3493_p13)   ;;  %v4099_v34 = vld [vmem:[%s4570_s28 + $0x78] sm:$0xff] (!%p3493_p13)  }
  0x2e   :  { %135 = vst.msk [vmem:[#allocation2 + $0x140] sm:$0xff] %vm94_vm0, %v4364_v0  ;;  %136 = vst.msk [vmem:[#allocation2 + $0x148] sm:$0xff] %vm94_vm0, %v4364_v0  ;;  %1548 = vmatprep.subr.bf16.mxu1 (!%p3493_p13), %v4365_v2  ;;  %v4098_v33 = vld [vmem:[%s4570_s28 + $0xf0] sm:$0xff] (!%p3493_p13)   ;;  %v4100_v35 = vld [vmem:[%s4570_s28 + $0xf8] sm:$0xff] (!%p3493_p13)  }
  0x2f   :  { %137 = vst.msk [vmem:[#allocation2 + $0x150] sm:$0xff] %vm94_vm0, %v4364_v0  ;;  %138 = vst.msk [vmem:[#allocation2 + $0x158] sm:$0xff] %vm94_vm0, %v4364_v0  ;;  %v4112_v41 = vld [vmem:[#allocation6 + $0x28] ss:$16 sps:$4 sm:$0xff] (!%p3493_p13)   ;;  %v4113_v42 = vld [vmem:[#allocation6 + $0x44] ss:$16 sps:$4 sm:$0xff] (!%p3493_p13)  }
  0x30   :  { %139 = vst.msk [vmem:[#allocation2 + $0x160] sm:$0xff] %vm94_vm0, %v4364_v0  ;;  %140 = vst.msk [vmem:[#allocation2 + $0x168] sm:$0xff] %vm94_vm0, %v4364_v0  ;;  %1260 = vmatpush1.bf16.msra.mxu0 (!%p3493_p13), %v4077_v10  ;;  %v4115_v43 = vld [vmem:[#allocation6 + $0x4c] ss:$16 sps:$4 sm:$0xff] (!%p3493_p13)   ;;  %v4117_v44 = vld [vmem:[#allocation6 + $0x40] ss:$16 sps:$4 sm:$0xff] (!%p3493_p13)  }
  0x31   :  { %141 = vst.msk [vmem:[#allocation2 + $0x170] sm:$0xff] %vm94_vm0, %v4364_v0  ;;  %142 = vst.msk [vmem:[#allocation2 + $0x178] sm:$0xff] %vm94_vm0, %v4364_v0  ;;  %1549 = vmatpush1.bf16.msra.mxu1 (!%p3493_p13), %v4078_v11  ;;  %1261 = vmatprep.subr.bf16.mxu0 (!%p3493_p13), %v4365_v2  ;;  %v4118_v45 = vld [vmem:[#allocation6 + $0x48] ss:$16 sps:$4 sm:$0xff] (!%p3493_p13)   ;;  %v4119_v46 = vld [vmem:[#allocation6 + $0x64] ss:$16 sps:$4 sm:$0xff] (!%p3493_p13)  }
  0x32   :  { %143 = vst.msk [vmem:[#allocation2 + $0x180] sm:$0xff] %vm94_vm0, %v4364_v0  ;;  %144 = vst.msk [vmem:[#allocation2 + $0x188] sm:$0xff] %vm94_vm0, %v4364_v0  ;;  %1550 = vmatprep.subr.bf16.mxu1 (!%p3493_p13), %v4365_v2  ;;  %v4121_v47 = vld [vmem:[#allocation6 + $0x6c] ss:$16 sps:$4 sm:$0xff] (!%p3493_p13)   ;;  %v4123_v48 = vld [vmem:[#allocation6 + $0x60] ss:$16 sps:$4 sm:$0xff] (!%p3493_p13)  }
  0x33   :  { %145 = vst.msk [vmem:[#allocation2 + $0x190] sm:$0xff] %vm94_vm0, %v4364_v0  ;;  %146 = vst.msk [vmem:[#allocation2 + $0x198] sm:$0xff] %vm94_vm0, %v4364_v0  ;;  %162 = sbr.rel (%p3493_p13) target bundleno = 563 (0x233), region = 33  ;;  %v4124_v49 = vld [vmem:[#allocation6 + $0x68] ss:$16 sps:$4 sm:$0xff] (!%p3493_p13)  }
  0x34   :  { %147 = vst.msk [vmem:[#allocation2 + $0x1a0] sm:$0xff] %vm94_vm0, %v4364_v0  ;;  %148 = vst.msk [vmem:[#allocation2 + $0x1a8] sm:$0xff] %vm94_vm0, %v4364_v0  ;;  %1262 = vmatpush1.bf16.msra.mxu0 (!%p3493_p13), %v4079_v12  ;;  %v4125_v50 = vld [vmem:[#allocation6 + $0x84] ss:$16 sps:$4 sm:$0xff] (!%p3493_p13)   ;;  %v4127_v51 = vld [vmem:[#allocation6 + $0x8c] ss:$16 sps:$4 sm:$0xff] (!%p3493_p13)  }
  0x35   :  { %149 = vst.msk [vmem:[#allocation2 + $0x1b0] sm:$0xff] %vm94_vm0, %v4364_v0  ;;  %150 = vst.msk [vmem:[#allocation2 + $0x1b8] sm:$0xff] %vm94_vm0, %v4364_v0  ;;  %1551 = vmatpush1.bf16.msra.mxu1 (!%p3493_p13), %v4080_v13  ;;  %1263 = vmatprep.subr.bf16.mxu0 (!%p3493_p13), %v4365_v2  ;;  %v4129_v52 = vld [vmem:[#allocation6 + $0x80] ss:$16 sps:$4 sm:$0xff] (!%p3493_p13)   ;;  %v4130_v53 = vld [vmem:[#allocation6 + $0x88] ss:$16 sps:$4 sm:$0xff] (!%p3493_p13)  }
  0x36   :  { %151 = vst.msk [vmem:[#allocation2 + $0x1c0] sm:$0xff] %vm94_vm0, %v4364_v0  ;;  %152 = vst.msk [vmem:[#allocation2 + $0x1c8] sm:$0xff] %vm94_vm0, %v4364_v0  ;;  %1552 = vmatprep.subr.bf16.mxu1 (!%p3493_p13), %v4365_v2  ;;  %v4131_v54 = vld [vmem:[#allocation6 + $0xa4] ss:$16 sps:$4 sm:$0xff] (!%p3493_p13)   ;;  %v4133_v55 = vld [vmem:[#allocation6 + $0xac] ss:$16 sps:$4 sm:$0xff] (!%p3493_p13)  }
  0x37   :  { %153 = vst.msk [vmem:[#allocation2 + $0x1d0] sm:$0xff] %vm94_vm0, %v4364_v0  ;;  %154 = vst.msk [vmem:[#allocation2 + $0x1d8] sm:$0xff] %vm94_vm0, %v4364_v0  ;;  %v4135_v56 = vld [vmem:[#allocation6 + $0xa0] ss:$16 sps:$4 sm:$0xff] (!%p3493_p13)   ;;  %v4136_v57 = vld [vmem:[#allocation6 + $0xa8] ss:$16 sps:$4 sm:$0xff] (!%p3493_p13)  }
  0x38   :  { %155 = vst.msk [vmem:[#allocation2 + $0x1e0] sm:$0xff] %vm94_vm0, %v4364_v0  ;;  %156 = vst.msk [vmem:[#allocation2 + $0x1e8] sm:$0xff] %vm94_vm0, %v4364_v0  ;;  %1264 = vmatpush1.bf16.msra.mxu0 (!%p3493_p13), %v4081_v14  ;;  %v4137_v58 = vld [vmem:[#allocation6 + $0xc4] ss:$16 sps:$4 sm:$0xff] (!%p3493_p13)   ;;  %v4139_v59 = vld [vmem:[#allocation6 + $0xcc] ss:$16 sps:$4 sm:$0xff] (!%p3493_p13)  }
  0x39   :  { %157 = vst.msk [vmem:[#allocation2 + $0x1f0] sm:$0xff] %vm94_vm0, %v4364_v0  ;;  %158 = vst.msk [vmem:[#allocation2 + $0x1f8] sm:$0xff] %vm94_vm0, %v4364_v0  ;;  %1553 = vmatpush1.bf16.msra.mxu1 (!%p3493_p13), %v4082_v15  ;;  %1265 = vmatprep.subr.bf16.mxu0 (!%p3493_p13), %v4365_v2  ;;  %v4141_v60 = vld [vmem:[#allocation6 + $0xc0] ss:$16 sps:$4 sm:$0xff] (!%p3493_p13)   ;;  %v4142_v61 = vld [vmem:[#allocation6 + $0xc8] ss:$16 sps:$4 sm:$0xff] (!%p3493_p13)  }
  0x3a   :  { %1554 = vmatprep.subr.bf16.mxu1 %v4365_v2  ;;  %v4143_v62 = vld [vmem:[#allocation6 + $0xe4] ss:$16 sps:$4 sm:$0xff]   ;;  %v4145_v63 = vld [vmem:[#allocation6 + $0xec] ss:$16 sps:$4 sm:$0xff]   ;;  %v4147_v0 = vld [vmem:[#allocation6 + $0xe0] ss:$16 sps:$4 sm:$0xff]  }
  0x3b   :  { %v4148_v1 = vld [vmem:[#allocation6 + $0xe8] ss:$16 sps:$4 sm:$0xff]   ;;  %v4151_v3 = vld [vmem:[#allocation6 + $0x10c] ss:$16 sps:$4 sm:$0xff]   ;;  %v4153_v4 = vld [vmem:[#allocation6 + $0x100] ss:$16 sps:$4 sm:$0xff]  }
  0x3c   :  { %1266 = vmatpush1.bf16.msra.mxu0 %v4083_v16  ;;  %v4154_v5 = vld [vmem:[#allocation6 + $0x108] ss:$16 sps:$4 sm:$0xff]   ;;  %v4155_v6 = vld [vmem:[#allocation6 + $0x124] ss:$16 sps:$4 sm:$0xff]   ;;  %v4157_v7 = vld [vmem:[#allocation6 + $0x12c] ss:$16 sps:$4 sm:$0xff]  }
  0x3d   :  { %1555 = vmatpush1.bf16.msra.mxu1 %v4084_v17  ;;  %1267 = vmatprep.subr.bf16.mxu0 %v4365_v2  ;;  %v4159_v8 = vld [vmem:[#allocation6 + $0x120] ss:$16 sps:$4 sm:$0xff]   ;;  %v4160_v9 = vld [vmem:[#allocation6 + $0x128] ss:$16 sps:$4 sm:$0xff]   ;;  %v4161_v10 = vld [vmem:[#allocation6 + $0x144] ss:$16 sps:$4 sm:$0xff]  }
  0x3e   :  { %1556 = vmatprep.subr.bf16.mxu1 %v4365_v2  ;;  %v4163_v11 = vld [vmem:[#allocation6 + $0x14c] ss:$16 sps:$4 sm:$0xff]   ;;  %v4165_v12 = vld [vmem:[#allocation6 + $0x140] ss:$16 sps:$4 sm:$0xff]   ;;  %v4166_v13 = vld [vmem:[#allocation6 + $0x148] ss:$16 sps:$4 sm:$0xff]  }
  0x3f   :  { %v4167_v14 = vld [vmem:[#allocation6 + $0x164] ss:$16 sps:$4 sm:$0xff]   ;;  %v4169_v15 = vld [vmem:[#allocation6 + $0x16c] ss:$16 sps:$4 sm:$0xff]   ;;  %v4171_v16 = vld [vmem:[#allocation6 + $0x160] ss:$16 sps:$4 sm:$0xff]  }
  0x40   :  { %1268 = vmatpush1.bf16.msra.mxu0 %v4085_v18  ;;  %v4172_v17 = vld [vmem:[#allocation6 + $0x168] ss:$16 sps:$4 sm:$0xff]   ;;  %v4173_v18 = vld [vmem:[#allocation6 + $0x184] ss:$16 sps:$4 sm:$0xff]   ;;  %v4177_v20 = vld [vmem:[#allocation6 + $0x180] ss:$16 sps:$4 sm:$0xff]  }
  0x41   :  { %1557 = vmatpush1.bf16.msra.mxu1 %v4086_v19  ;;  %1269 = vmatprep.subr.bf16.mxu0 %v4365_v2  ;;  %v4175_v19 = vld [vmem:[#allocation6 + $0x18c] ss:$16 sps:$4 sm:$0xff]   ;;  %v4179_v22 = vld [vmem:[#allocation6 + $0x1a4] ss:$16 sps:$4 sm:$0xff]  }
  0x42   :  { %1558 = vmatprep.subr.bf16.mxu1 %v4365_v2 }
  0x44   :  { %1270 = vmatpush1.bf16.msra.mxu0 %v4087_v21  ;;  %v4178_v21 = vld [vmem:[#allocation6 + $0x188] ss:$16 sps:$4 sm:$0xff]  }
  0x45   :  { %1559 = vmatpush1.bf16.msra.mxu1 %v4088_v23  ;;  %1271 = vmatprep.subr.bf16.mxu0 %v4365_v2  ;;  %v4181_v23 = vld [vmem:[#allocation6 + $0x1ac] ss:$16 sps:$4 sm:$0xff]  }
  0x46   :  { %1560 = vmatprep.subr.bf16.mxu1 %v4365_v2 }
  0x48   :  { %1272 = vmatpush1.bf16.msra.mxu0 %v4089_v24  ;;  %v4183_v24 = vld [vmem:[#allocation6 + $0x1a0] ss:$16 sps:$4 sm:$0xff]  }
  0x49   :  { %1561 = vmatpush1.bf16.msra.mxu1 %v4090_v25  ;;  %1273 = vmatprep.subr.bf16.mxu0 %v4365_v2  ;;  %v4184_v25 = vld [vmem:[#allocation6 + $0x1a8] ss:$16 sps:$4 sm:$0xff]  }
  0x4a   :  { %1562 = vmatprep.subr.bf16.mxu1 %v4365_v2 }
  0x4c   :  { %1274 = vmatpush1.bf16.msra.mxu0 %v4091_v26  ;;  %v4185_v26 = vld [vmem:[#allocation6 + $0x1c4] ss:$16 sps:$4 sm:$0xff]  }
  0x4d   :  { %1563 = vmatpush1.bf16.msra.mxu1 %v4092_v27  ;;  %1275 = vmatprep.subr.bf16.mxu0 %v4365_v2  ;;  %v4187_v27 = vld [vmem:[#allocation6 + $0x1cc] ss:$16 sps:$4 sm:$0xff]  }
  0x4e   :  { %1564 = vmatprep.subr.bf16.mxu1 %v4365_v2 }
  0x50   :  { %1276 = vmatpush1.bf16.msra.mxu0 %v4093_v28  ;;  %v4189_v28 = vld [vmem:[#allocation6 + $0x1c0] ss:$16 sps:$4 sm:$0xff]  }
  0x51   :  { %1565 = vmatpush1.bf16.msra.mxu1 %v4094_v29  ;;  %1277 = vmatprep.subr.bf16.mxu0 %v4365_v2  ;;  %v4190_v29 = vld [vmem:[#allocation6 + $0x1c8] ss:$16 sps:$4 sm:$0xff]  }
  0x52   :  { %1566 = vmatprep.subr.bf16.mxu1 %v4365_v2 }
  0x54   :  { %1278 = vmatpush1.bf16.msra.mxu0 %v4095_v30  ;;  %v4191_v30 = vld [vmem:[#allocation6 + $0x1e4] ss:$16 sps:$4 sm:$0xff]  }
  0x55   :  { %1567 = vmatpush1.bf16.msra.mxu1 %v4096_v31  ;;  %1279 = vmatprep.subr.bf16.mxu0 %v4365_v2  ;;  %v4193_v31 = vld [vmem:[#allocation6 + $0x1ec] ss:$16 sps:$4 sm:$0xff]  }
  0x56   :  { %1568 = vmatprep.subr.bf16.mxu1 %v4365_v2 }
  0x58   :  { %1280 = vmatpush1.bf16.msra.mxu0 %v4097_v32  ;;  %v4195_v32 = vld [vmem:[#allocation6 + $0x1e0] ss:$16 sps:$4 sm:$0xff]  }
  0x59   :  { %1569 = vmatpush1.bf16.msra.mxu1 %v4098_v33  ;;  %1281 = vmatprep.subr.bf16.mxu0 %v4365_v2  ;;  %v4196_v33 = vld [vmem:[#allocation6 + $0x1e8] ss:$16 sps:$4 sm:$0xff]  }
  0x5a   :  { %1570 = vmatprep.subr.bf16.mxu1 %v4365_v2  ;;  %v4149_v2 = vld [vmem:[#allocation6 + $0x104] ss:$16 sps:$4 sm:$0xff]  }
  0x5c   :  { %1282 = vmatpush1.bf16.msra.mxu0 %v4099_v34  ;;  %v4197_v34 = vld [vmem:[#allocation6 + $0x204] ss:$16 sps:$4 sm:$0xff]  }
  0x5d   :  { %1571 = vmatpush1.bf16.msra.mxu1 %v4100_v35  ;;  %v4199_v35 = vld [vmem:[#allocation6 + $0x20c] ss:$16 sps:$4 sm:$0xff]  }
  0x5f   :  { %1284 = vmatmul.mubr.bf16.vlgmr.msra.gmra.mrb[0].mxu0 %v4101_v36  ;;  %v4201_v36 = vld [vmem:[#allocation6 + $0x200] ss:$16 sps:$4 sm:$0xff]  }
  0x60   :  { %1573 = vmatmul.mubr.bf16.vlgmr.msra.gmra.mrb[0].mxu1 %v4104_v37  ;;  %1291 = vmatprep.mubr.bf16.mxu0 %v4107_v38  ;;  %v4202_v37 = vld [vmem:[#allocation6 + $0x208] ss:$16 sps:$4 sm:$0xff]   ;;  %v4203_v38 = vld [vmem:[#allocation6 + $0x224] ss:$16 sps:$4 sm:$0xff]  }
  0x61   :  { %1580 = vmatprep.mubr.bf16.mxu1 %v4109_v39  ;;  %v4205_v39 = vld [vmem:[#allocation6 + $0x22c] ss:$16 sps:$4 sm:$0xff]  }
  0x67   :  { %1292 = vmatmul.mubr.bf16.gmra.mrb[4].mxu0 %v4111_v40  ;;  %v4207_v40 = vld [vmem:[#allocation6 + $0x220] ss:$16 sps:$4 sm:$0xff]  }
  0x68   :  { %1581 = vmatmul.mubr.bf16.gmra.mrb[4].mxu1 %v4112_v41  ;;  %1299 = vmatprep.mubr.bf16.mxu0 %v4113_v42  ;;  %v4208_v41 = vld [vmem:[#allocation6 + $0x228] ss:$16 sps:$4 sm:$0xff]   ;;  %v4209_v42 = vld [vmem:[#allocation6 + $0x244] ss:$16 sps:$4 sm:$0xff]  }
  0x69   :  { %1588 = vmatprep.mubr.bf16.mxu1 %v4115_v43  ;;  %v4211_v43 = vld [vmem:[#allocation6 + $0x24c] ss:$16 sps:$4 sm:$0xff]  }
  0x6f   :  { %1300 = vmatmul.mubr.bf16.gmra.mrb[8].mxu0 %v4117_v44  ;;  %v4213_v44 = vld [vmem:[#allocation6 + $0x240] ss:$16 sps:$4 sm:$0xff]  }
  0x70   :  { %1589 = vmatmul.mubr.bf16.gmra.mrb[8].mxu1 %v4118_v45  ;;  %1307 = vmatprep.mubr.bf16.mxu0 %v4119_v46  ;;  %v4214_v45 = vld [vmem:[#allocation6 + $0x248] ss:$16 sps:$4 sm:$0xff]   ;;  %v4215_v46 = vld [vmem:[#allocation6 + $0x264] ss:$16 sps:$4 sm:$0xff]  }
  0x71   :  { %1596 = vmatprep.mubr.bf16.mxu1 %v4121_v47  ;;  %v4217_v47 = vld [vmem:[#allocation6 + $0x26c] ss:$16 sps:$4 sm:$0xff]  }
  0x77   :  { %1308 = vmatmul.mubr.bf16.gmra.mrb[12].mxu0 %v4123_v48  ;;  %v4219_v48 = vld [vmem:[#allocation6 + $0x260] ss:$16 sps:$4 sm:$0xff]  }
  0x78   :  { %1597 = vmatmul.mubr.bf16.gmra.mrb[12].mxu1 %v4124_v49  ;;  %1315 = vmatprep.mubr.bf16.mxu0 %v4125_v50  ;;  %v4220_v49 = vld [vmem:[#allocation6 + $0x268] ss:$16 sps:$4 sm:$0xff]   ;;  %v4221_v50 = vld [vmem:[#allocation6 + $0x284] ss:$16 sps:$4 sm:$0xff]  }
  0x79   :  { %1604 = vmatprep.mubr.bf16.mxu1 %v4127_v51  ;;  %v4223_v51 = vld [vmem:[#allocation6 + $0x28c] ss:$16 sps:$4 sm:$0xff]  }
  0x7f   :  { %1316 = vmatmul.mubr.bf16.gmra.mrb[16].mxu0 %v4129_v52  ;;  %v4225_v52 = vld [vmem:[#allocation6 + $0x280] ss:$16 sps:$4 sm:$0xff]  }
  0x80   :  { %1605 = vmatmul.mubr.bf16.gmra.mrb[16].mxu1 %v4130_v53  ;;  %1323 = vmatprep.mubr.bf16.mxu0 %v4131_v54  ;;  %v4226_v53 = vld [vmem:[#allocation6 + $0x288] ss:$16 sps:$4 sm:$0xff]   ;;  %v4227_v54 = vld [vmem:[#allocation6 + $0x2a4] ss:$16 sps:$4 sm:$0xff]  }
  0x81   :  { %1612 = vmatprep.mubr.bf16.mxu1 %v4133_v55  ;;  %v4229_v55 = vld [vmem:[#allocation6 + $0x2ac] ss:$16 sps:$4 sm:$0xff]  }
  0x87   :  { %1324 = vmatmul.mubr.bf16.gmra.mrb[20].mxu0 %v4135_v56  ;;  %v4231_v56 = vld [vmem:[#allocation6 + $0x2a0] ss:$16 sps:$4 sm:$0xff]  }
  0x88   :  { %1613 = vmatmul.mubr.bf16.gmra.mrb[20].mxu1 %v4136_v57  ;;  %1331 = vmatprep.mubr.bf16.mxu0 %v4137_v58  ;;  %v4232_v57 = vld [vmem:[#allocation6 + $0x2a8] ss:$16 sps:$4 sm:$0xff]   ;;  %v4233_v58 = vld [vmem:[#allocation6 + $0x2c4] ss:$16 sps:$4 sm:$0xff]  }
  0x89   :  { %1620 = vmatprep.mubr.bf16.mxu1 %v4139_v59  ;;  %v4235_v59 = vld [vmem:[#allocation6 + $0x2cc] ss:$16 sps:$4 sm:$0xff]  }
  0x8f   :  { %1332 = vmatmul.mubr.bf16.gmra.mrb[24].mxu0 %v4141_v60  ;;  %v4237_v60 = vld [vmem:[#allocation6 + $0x2c0] ss:$16 sps:$4 sm:$0xff]  }
  0x90   :  { %1621 = vmatmul.mubr.bf16.gmra.mrb[24].mxu1 %v4142_v61  ;;  %1339 = vmatprep.mubr.bf16.mxu0 %v4143_v62  ;;  %v4238_v61 = vld [vmem:[#allocation6 + $0x2c8] ss:$16 sps:$4 sm:$0xff]   ;;  %v4239_v62 = vld [vmem:[#allocation6 + $0x2e4] ss:$16 sps:$4 sm:$0xff]  }
  0x91   :  { %1628 = vmatprep.mubr.bf16.mxu1 %v4145_v63  ;;  %v4241_v63 = vld [vmem:[#allocation6 + $0x2ec] ss:$16 sps:$4 sm:$0xff]  }
  0x97   :  { %1340 = vmatmul.mubr.bf16.gmra.mrb[28].mxu0 %v4147_v0  ;;  %v4243_v0 = vld [vmem:[#allocation6 + $0x2e0] ss:$16 sps:$4 sm:$0xff]  }
  0x98   :  { %1629 = vmatmul.mubr.bf16.gmra.mrb[28].mxu1 %v4148_v1  ;;  %1347 = vmatprep.mubr.bf16.mxu0 %v4149_v2  ;;  %v4244_v1 = vld [vmem:[#allocation6 + $0x2e8] ss:$16 sps:$4 sm:$0xff]   ;;  %v4245_v2 = vld [vmem:[#allocation6 + $0x304] ss:$16 sps:$4 sm:$0xff]  }
  0x99   :  { %1636 = vmatprep.mubr.bf16.mxu1 %v4151_v3  ;;  %v4247_v3 = vld [vmem:[#allocation6 + $0x30c] ss:$16 sps:$4 sm:$0xff]  }
  0x9f   :  { %1348 = vmatmul.mubr.bf16.gmra.mrb[32].mxu0 %v4153_v4  ;;  %v4249_v4 = vld [vmem:[#allocation6 + $0x300] ss:$16 sps:$4 sm:$0xff]  }
  0xa0   :  { %1637 = vmatmul.mubr.bf16.gmra.mrb[32].mxu1 %v4154_v5  ;;  %1355 = vmatprep.mubr.bf16.mxu0 %v4155_v6  ;;  %v4250_v5 = vld [vmem:[#allocation6 + $0x308] ss:$16 sps:$4 sm:$0xff]   ;;  %v4251_v6 = vld [vmem:[#allocation6 + $0x324] ss:$16 sps:$4 sm:$0xff]  }
  0xa1   :  { %1644 = vmatprep.mubr.bf16.mxu1 %v4157_v7  ;;  %v4253_v7 = vld [vmem:[#allocation6 + $0x32c] ss:$16 sps:$4 sm:$0xff]  }
  0xa7   :  { %1356 = vmatmul.mubr.bf16.gmra.mrb[36].mxu0 %v4159_v8  ;;  %v4255_v8 = vld [vmem:[#allocation6 + $0x320] ss:$16 sps:$4 sm:$0xff]  }
  0xa8   :  { %1645 = vmatmul.mubr.bf16.gmra.mrb[36].mxu1 %v4160_v9  ;;  %1363 = vmatprep.mubr.bf16.mxu0 %v4161_v10  ;;  %v4256_v9 = vld [vmem:[#allocation6 + $0x328] ss:$16 sps:$4 sm:$0xff]   ;;  %v4257_v10 = vld [vmem:[#allocation6 + $0x344] ss:$16 sps:$4 sm:$0xff]  }
  0xa9   :  { %1652 = vmatprep.mubr.bf16.mxu1 %v4163_v11  ;;  %v4259_v11 = vld [vmem:[#allocation6 + $0x34c] ss:$16 sps:$4 sm:$0xff]  }
  0xaf   :  { %1364 = vmatmul.mubr.bf16.gmra.mrb[40].mxu0 %v4165_v12  ;;  %v4261_v12 = vld [vmem:[#allocation6 + $0x340] ss:$16 sps:$4 sm:$0xff]  }
  0xb0   :  { %1653 = vmatmul.mubr.bf16.gmra.mrb[40].mxu1 %v4166_v13  ;;  %1371 = vmatprep.mubr.bf16.mxu0 %v4167_v14  ;;  %v4262_v13 = vld [vmem:[#allocation6 + $0x348] ss:$16 sps:$4 sm:$0xff]   ;;  %v4263_v14 = vld [vmem:[#allocation6 + $0x364] ss:$16 sps:$4 sm:$0xff]  }
  0xb1   :  { %1660 = vmatprep.mubr.bf16.mxu1 %v4169_v15  ;;  %v4265_v15 = vld [vmem:[#allocation6 + $0x36c] ss:$16 sps:$4 sm:$0xff]  }
  0xb7   :  { %1372 = vmatmul.mubr.bf16.gmra.mrb[44].mxu0 %v4171_v16 }
  0xb8   :  { %1661 = vmatmul.mubr.bf16.gmra.mrb[44].mxu1 %v4172_v17  ;;  %1379 = vmatprep.mubr.bf16.mxu0 %v4173_v18  ;;  %v163_v17 = vld [vmem:[#allocation2] sm:$0xff] }
  0xb9   :  { %1668 = vmatprep.mubr.bf16.mxu1 %v4175_v19 }
  0xbf   :  { %1380 = vmatmul.mubr.bf16.gmra.mrb[48].mxu0 %v4177_v20  ;;  %v4267_v20 = vld [vmem:[#allocation6 + $0x360] ss:$16 sps:$4 sm:$0xff]  }
  0xc0   :  { %1669 = vmatmul.mubr.bf16.gmra.mrb[48].mxu1 %v4178_v21  ;;  %1387 = vmatprep.mubr.bf16.mxu0 %v4179_v22 }
  0xc1   :  { %1676 = vmatprep.mubr.bf16.mxu1 %v4181_v23 }
  0xc7   :  { %1388 = vmatmul.mubr.bf16.gmra.mrb[52].mxu0 %v4183_v24  ;;  %v4268_v24 = vld [vmem:[#allocation6 + $0x368] ss:$16 sps:$4 sm:$0xff]  }
  0xc8   :  { %1677 = vmatmul.mubr.bf16.gmra.mrb[52].mxu1 %v4184_v25  ;;  %1395 = vmatprep.mubr.bf16.mxu0 %v4185_v26  ;;  %v4269_v25 = vld [vmem:[#allocation6 + $0x384] ss:$16 sps:$4 sm:$0xff]   ;;  %v164_v26 = vld [vmem:[#allocation2 + $0x8] sm:$0xff] }
  0xc9   :  { %1684 = vmatprep.mubr.bf16.mxu1 %v4187_v27 }
  0xcf   :  { %1396 = vmatmul.mubr.bf16.gmra.mrb[56].mxu0 %v4189_v28 }
  0xd0   :  { %1685 = vmatmul.mubr.bf16.gmra.mrb[56].mxu1 %v4190_v29  ;;  %1403 = vmatprep.mubr.bf16.mxu0 %v4191_v30  ;;  %v4271_v29 = vld [vmem:[#allocation6 + $0x38c] ss:$16 sps:$4 sm:$0xff]  }
  0xd1   :  { %1692 = vmatprep.mubr.bf16.mxu1 %v4193_v31 }
  0xd7   :  { %1404 = vmatmul.mubr.bf16.gmra.mrb[60].mxu0 %v4195_v32 }
  0xd8   :  { %1693 = vmatmul.mubr.bf16.gmra.mrb[60].mxu1 %v4196_v33  ;;  %1411 = vmatprep.mubr.bf16.mxu0 %v4197_v34 }
  0xd9   :  { %1700 = vmatprep.mubr.bf16.mxu1 %v4199_v35  ;;  %v165_v35 = vld [vmem:[#allocation2 + $0x10] sm:$0xff] }
  0xdf   :  { %1412 = vmatmul.mubr.bf16.gmra.mrb[64].mxu0 %v4201_v36 }
  0xe0   :  { %1701 = vmatmul.mubr.bf16.gmra.mrb[64].mxu1 %v4202_v37  ;;  %1419 = vmatprep.mubr.bf16.mxu0 %v4203_v38  ;;  %v4273_v38 = vld [vmem:[#allocation6 + $0x380] ss:$16 sps:$4 sm:$0xff]  }
  0xe1   :  { %1708 = vmatprep.mubr.bf16.mxu1 %v4205_v39 }
  0xe7   :  { %1420 = vmatmul.mubr.bf16.gmra.mrb[68].mxu0 %v4207_v40 }
  0xe8   :  { %1709 = vmatmul.mubr.bf16.gmra.mrb[68].mxu1 %v4208_v41  ;;  %1427 = vmatprep.mubr.bf16.mxu0 %v4209_v42  ;;  %v4274_v42 = vld [vmem:[#allocation6 + $0x388] ss:$16 sps:$4 sm:$0xff]  }
  0xe9   :  { %1716 = vmatprep.mubr.bf16.mxu1 %v4211_v43  ;;  %v4275_v43 = vld [vmem:[#allocation6 + $0x3a4] ss:$16 sps:$4 sm:$0xff]  }
  0xef   :  { %1428 = vmatmul.mubr.bf16.gmra.mrb[72].mxu0 %v4213_v44  ;;  %v166_v44 = vld [vmem:[#allocation2 + $0x18] sm:$0xff] }
  0xf0   :  { %1717 = vmatmul.mubr.bf16.gmra.mrb[72].mxu1 %v4214_v45  ;;  %1435 = vmatprep.mubr.bf16.mxu0 %v4215_v46 }
  0xf1   :  { %1724 = vmatprep.mubr.bf16.mxu1 %v4217_v47  ;;  %v4277_v47 = vld [vmem:[#allocation6 + $0x3ac] ss:$16 sps:$4 sm:$0xff]  }
  0xf7   :  { %1436 = vmatmul.mubr.bf16.gmra.mrb[76].mxu0 %v4219_v48 }
  0xf8   :  { %1725 = vmatmul.mubr.bf16.gmra.mrb[76].mxu1 %v4220_v49  ;;  %1443 = vmatprep.mubr.bf16.mxu0 %v4221_v50 }
  0xf9   :  { %1732 = vmatprep.mubr.bf16.mxu1 %v4223_v51 }
  0xff   :  { %1444 = vmatmul.mubr.bf16.gmra.mrb[80].mxu0 %v4225_v52 }
 0x100   :  { %1733 = vmatmul.mubr.bf16.gmra.mrb[80].mxu1 %v4226_v53  ;;  %1451 = vmatprep.mubr.bf16.mxu0 %v4227_v54  ;;  %v167_v53 = vld [vmem:[#allocation2 + $0x20] sm:$0xff] }
 0x101   :  { %1740 = vmatprep.mubr.bf16.mxu1 %v4229_v55 }
 0x107   :  { %1452 = vmatmul.mubr.bf16.gmra.mrb[84].mxu0 %v4231_v56  ;;  %v4279_v56 = vld [vmem:[#allocation6 + $0x3a0] ss:$16 sps:$4 sm:$0xff]  }
 0x108   :  { %1741 = vmatmul.mubr.bf16.gmra.mrb[84].mxu1 %v4232_v57  ;;  %1459 = vmatprep.mubr.bf16.mxu0 %v4233_v58 }
 0x109   :  { %1748 = vmatprep.mubr.bf16.mxu1 %v4235_v59 }
 0x10f   :  { %1460 = vmatmul.mubr.bf16.gmra.mrb[88].mxu0 %v4237_v60  ;;  %v4280_v60 = vld [vmem:[#allocation6 + $0x3a8] ss:$16 sps:$4 sm:$0xff]  }
 0x110   :  { %1749 = vmatmul.mubr.bf16.gmra.mrb[88].mxu1 %v4238_v61  ;;  %1467 = vmatprep.mubr.bf16.mxu0 %v4239_v62  ;;  %v4281_v61 = vld [vmem:[#allocation6 + $0x3c4] ss:$16 sps:$4 sm:$0xff]   ;;  %v168_v62 = vld [vmem:[#allocation2 + $0x28] sm:$0xff] }
 0x111   :  { %1756 = vmatprep.mubr.bf16.mxu1 %v4241_v63 }
 0x117   :  { %1468 = vmatmul.mubr.bf16.gmra.mrb[92].mxu0 %v4243_v0 }
 0x118   :  { %1757 = vmatmul.mubr.bf16.gmra.mrb[92].mxu1 %v4244_v1  ;;  %1475 = vmatprep.mubr.bf16.mxu0 %v4245_v2  ;;  %v4283_v1 = vld [vmem:[#allocation6 + $0x3cc] ss:$16 sps:$4 sm:$0xff]  }
 0x119   :  { %1764 = vmatprep.mubr.bf16.mxu1 %v4247_v3 }
 0x11f   :  { %1476 = vmatmul.mubr.bf16.gmra.mrb[96].mxu0 %v4249_v4 }
 0x120   :  { %1765 = vmatmul.mubr.bf16.gmra.mrb[96].mxu1 %v4250_v5  ;;  %1483 = vmatprep.mubr.bf16.mxu0 %v4251_v6 }
 0x121   :  { %1772 = vmatprep.mubr.bf16.mxu1 %v4253_v7  ;;  %v169_v7 = vld [vmem:[#allocation2 + $0x30] sm:$0xff] }
 0x127   :  { %1484 = vmatmul.mubr.bf16.gmra.mrb[100].mxu0 %v4255_v8 }
 0x128   :  { %1773 = vmatmul.mubr.bf16.gmra.mrb[100].mxu1 %v4256_v9  ;;  %1491 = vmatprep.mubr.bf16.mxu0 %v4257_v10  ;;  %v4285_v10 = vld [vmem:[#allocation6 + $0x3c0] ss:$16 sps:$4 sm:$0xff]  }
 0x129   :  { %1780 = vmatprep.mubr.bf16.mxu1 %v4259_v11 }
 0x12f   :  { %1492 = vmatmul.mubr.bf16.gmra.mrb[104].mxu0 %v4261_v12 }
 0x130   :  { %1781 = vmatmul.mubr.bf16.gmra.mrb[104].mxu1 %v4262_v13  ;;  %1499 = vmatprep.mubr.bf16.mxu0 %v4263_v14  ;;  %v4286_v14 = vld [vmem:[#allocation6 + $0x3c8] ss:$16 sps:$4 sm:$0xff]  }
 0x131   :  { %1788 = vmatprep.mubr.bf16.mxu1 %v4265_v15  ;;  %v4287_v15 = vld [vmem:[#allocation6 + $0x3e4] ss:$16 sps:$4 sm:$0xff]  }
 0x132   :  { %v1285_v16 = vpop.f32.mrb[0].mxu0 }
 0x133   :  { %v1574_v18 = vpop.f32.mrb[0].mxu1  ;;  %v1287_v19 = vpop.f32.mrb[1].mxu0 }
 0x134   :  { %v1575_v21 = vadd.f32 %v1574_v18, %v1285_v16  ;;  %v1576_v22 = vpop.f32.mrb[1].mxu1  ;;  %v1288_v23 = vpop.f32.mrb[2].mxu0  ;;  %v170_v16 = vld [vmem:[#allocation2 + $0x38] sm:$0xff] }
 0x135   :  { %v1577_v27 = vpop.f32.mrb[2].mxu1  ;;  %v1290_v28 = vpop.f32.mrb[3].mxu0  ;;  %v4289_v19 = vld [vmem:[#allocation6 + $0x3ec] ss:$16 sps:$4 sm:$0xff]  }
 0x136   :  { %v1829_v30 = vadd.f32 %v1575_v21, %v163_v17  ;;  %v1578_v31 = vadd.f32 %v1577_v27, %v1288_v23  ;;  %v1579_v32 = vpop.f32.mrb[3].mxu1  ;;  %v4291_v28 = vld [vmem:[#allocation6 + $0x3e0] ss:$16 sps:$4 sm:$0xff]  }
 0x137   :  { %1500 = vmatmul.mubr.bf16.gmra.mrb[108].mxu0 %v4267_v20  ;;  %v4292_v32 = vld [vmem:[#allocation6 + $0x3e8] ss:$16 sps:$4 sm:$0xff]  }
 0x138   :  { %1894 = vst.msk [vmem:[#allocation2] sm:$0xff] %vm94_vm0, %v1829_v30  ;;  %v1830_v33 = vadd.f32 %v1578_v31, %v164_v26  ;;  %1789 = vmatmul.mubr.bf16.gmra.mrb[108].mxu1 %v4268_v24  ;;  %1507 = vmatprep.mubr.bf16.mxu0 %v4269_v25  ;;  %v171_v25 = vld [vmem:[#allocation2 + $0x40] sm:$0xff] }
 0x139   :  { %1796 = vmatprep.mubr.bf16.mxu1 %v4271_v29 }
 0x13a   :  { %1895 = vst.msk [vmem:[#allocation2 + $0x8] sm:$0xff] %vm94_vm0, %v1830_v33  ;;  %v1293_v34 = vpop.f32.mrb[4].mxu0  ;;  %v172_v33 = vld [vmem:[#allocation2 + $0x48] sm:$0xff] }
 0x13b   :  { %v1582_v36 = vpop.f32.mrb[4].mxu1  ;;  %v1295_v37 = vpop.f32.mrb[5].mxu0 }
 0x13c   :  { %v1583_v39 = vadd.f32 %v1582_v36, %v1293_v34  ;;  %v1584_v40 = vpop.f32.mrb[5].mxu1  ;;  %v1296_v41 = vpop.f32.mrb[6].mxu0 }
 0x13d   :  { %v1585_v45 = vpop.f32.mrb[6].mxu1  ;;  %v1298_v46 = vpop.f32.mrb[7].mxu0 }
 0x13e   :  { %v1831_v48 = vadd.f32 %v1583_v39, %v165_v35  ;;  %v1586_v49 = vadd.f32 %v1585_v45, %v1296_v41  ;;  %v1587_v50 = vpop.f32.mrb[7].mxu1  ;;  %v173_v41 = vld [vmem:[#allocation2 + $0x50] sm:$0xff] }
 0x13f   :  { %1508 = vmatmul.mubr.bf16.gmra.mrb[112].mxu0 %v4273_v38 }
 0x140   :  { %1896 = vst.msk [vmem:[#allocation2 + $0x10] sm:$0xff] %vm94_vm0, %v1831_v48  ;;  %v1832_v51 = vadd.f32 %v1586_v49, %v166_v44  ;;  %1797 = vmatmul.mubr.bf16.gmra.mrb[112].mxu1 %v4274_v42  ;;  %1515 = vmatprep.mubr.bf16.mxu0 %v4275_v43 }
 0x141   :  { %1804 = vmatprep.mubr.bf16.mxu1 %v4277_v47  ;;  %v174_v47 = vld [vmem:[#allocation2 + $0x58] sm:$0xff] }
 0x142   :  { %1897 = vst.msk [vmem:[#allocation2 + $0x18] sm:$0xff] %vm94_vm0, %v1832_v51  ;;  %v1301_v52 = vpop.f32.mrb[8].mxu0 }
 0x143   :  { %v1590_v54 = vpop.f32.mrb[8].mxu1  ;;  %v1303_v55 = vpop.f32.mrb[9].mxu0 }
 0x144   :  { %v1591_v57 = vadd.f32 %v1590_v54, %v1301_v52  ;;  %v1592_v58 = vpop.f32.mrb[9].mxu1  ;;  %v1304_v59 = vpop.f32.mrb[10].mxu0  ;;  %v175_v55 = vld [vmem:[#allocation2 + $0x60] sm:$0xff] }
 0x145   :  { %v1593_v63 = vpop.f32.mrb[10].mxu1  ;;  %v1306_v0 = vpop.f32.mrb[11].mxu0 }
 0x146   :  { %v1833_v2 = vadd.f32 %v1591_v57, %v167_v53  ;;  %v1594_v3 = vadd.f32 %v1593_v63, %v1304_v59  ;;  %v1595_v4 = vpop.f32.mrb[11].mxu1 }
 0x147   :  { %1516 = vmatmul.mubr.bf16.gmra.mrb[116].mxu0 %v4279_v56 }
 0x148   :  { %1898 = vst.msk [vmem:[#allocation2 + $0x20] sm:$0xff] %vm94_vm0, %v1833_v2  ;;  %v1834_v5 = vadd.f32 %v1594_v3, %v168_v62  ;;  %1805 = vmatmul.mubr.bf16.gmra.mrb[116].mxu1 %v4280_v60  ;;  %1523 = vmatprep.mubr.bf16.mxu0 %v4281_v61  ;;  %v176_v61 = vld [vmem:[#allocation2 + $0x68] sm:$0xff] }
 0x149   :  { %1812 = vmatprep.mubr.bf16.mxu1 %v4283_v1 }
 0x14a   :  { %1899 = vst.msk [vmem:[#allocation2 + $0x28] sm:$0xff] %vm94_vm0, %v1834_v5  ;;  %v1309_v6 = vpop.f32.mrb[12].mxu0  ;;  %v177_v5 = vld [vmem:[#allocation2 + $0x70] sm:$0xff] }
 0x14b   :  { %v1598_v8 = vpop.f32.mrb[12].mxu1  ;;  %v1311_v9 = vpop.f32.mrb[13].mxu0 }
 0x14c   :  { %v1599_v11 = vadd.f32 %v1598_v8, %v1309_v6  ;;  %v1600_v12 = vpop.f32.mrb[13].mxu1  ;;  %v1312_v13 = vpop.f32.mrb[14].mxu0 }
 0x14d   :  { %v1601_v17 = vpop.f32.mrb[14].mxu1  ;;  %v1314_v18 = vpop.f32.mrb[15].mxu0 }
 0x14e   :  { %v1835_v20 = vadd.f32 %v1599_v11, %v169_v7  ;;  %v1602_v21 = vadd.f32 %v1601_v17, %v1312_v13  ;;  %v1603_v22 = vpop.f32.mrb[15].mxu1  ;;  %v178_v11 = vld [vmem:[#allocation2 + $0x78] sm:$0xff] }
 0x14f   :  { %1524 = vmatmul.mubr.bf16.gmra.mrb[120].mxu0 %v4285_v10 }
 0x150   :  { %1900 = vst.msk [vmem:[#allocation2 + $0x30] sm:$0xff] %vm94_vm0, %v1835_v20  ;;  %v1836_v23 = vadd.f32 %v1602_v21, %v170_v16  ;;  %1813 = vmatmul.mubr.bf16.gmra.mrb[120].mxu1 %v4286_v14  ;;  %1531 = vmatprep.mubr.bf16.mxu0 %v4287_v15 }
 0x151   :  { %1820 = vmatprep.mubr.bf16.mxu1 %v4289_v19  ;;  %v179_v19 = vld [vmem:[#allocation2 + $0x80] sm:$0xff] }
 0x152   :  { %1901 = vst.msk [vmem:[#allocation2 + $0x38] sm:$0xff] %vm94_vm0, %v1836_v23  ;;  %v1317_v24 = vpop.f32.mrb[16].mxu0 }
 0x153   :  { %v1606_v26 = vpop.f32.mrb[16].mxu1  ;;  %v1319_v27 = vpop.f32.mrb[17].mxu0 }
 0x154   :  { %v1607_v29 = vadd.f32 %v1606_v26, %v1317_v24  ;;  %v1608_v30 = vpop.f32.mrb[17].mxu1  ;;  %v1320_v31 = vpop.f32.mrb[18].mxu0 }
 0x155   :  { %v1609_v34 = vpop.f32.mrb[18].mxu1  ;;  %v1322_v35 = vpop.f32.mrb[19].mxu0 }
 0x156   :  { %v1837_v36 = vadd.f32 %v1607_v29, %v171_v25  ;;  %v1610_v37 = vadd.f32 %v1609_v34, %v1320_v31  ;;  %v1611_v38 = vpop.f32.mrb[19].mxu1  ;;  %v180_v25 = vld [vmem:[#allocation2 + $0x88] sm:$0xff] }
 0x157   :  { %1532 = vmatmul.mubr.bf16.gmra.mrb[124].mxu0 %v4291_v28 }
 0x158   :  { %1902 = vst.msk [vmem:[#allocation2 + $0x40] sm:$0xff] %vm94_vm0, %v1837_v36  ;;  %v1838_v39 = vadd.f32 %v1610_v37, %v172_v33  ;;  %1821 = vmatmul.mubr.bf16.gmra.mrb[124].mxu1 %v4292_v32  ;;  %v181_v33 = vld [vmem:[#allocation2 + $0x90] sm:$0xff] }
 0x15a   :  { %1903 = vst.msk [vmem:[#allocation2 + $0x48] sm:$0xff] %vm94_vm0, %v1838_v39  ;;  %v1325_v40 = vpop.f32.mrb[20].mxu0  ;;  %v182_v39 = vld [vmem:[#allocation2 + $0x98] sm:$0xff] }
 0x15b   :  { %v1614_v42 = vpop.f32.mrb[20].mxu1  ;;  %v1327_v43 = vpop.f32.mrb[21].mxu0 }
 0x15c   :  { %v1615_v44 = vadd.f32 %v1614_v42, %v1325_v40  ;;  %v1616_v45 = vpop.f32.mrb[21].mxu1  ;;  %v1328_v46 = vpop.f32.mrb[22].mxu0 }
 0x15d   :  { %v1617_v48 = vpop.f32.mrb[22].mxu1  ;;  %v1330_v49 = vpop.f32.mrb[23].mxu0 }
 0x15e   :  { %v1839_v50 = vadd.f32 %v1615_v44, %v173_v41  ;;  %v1618_v51 = vadd.f32 %v1617_v48, %v1328_v46  ;;  %v1619_v52 = vpop.f32.mrb[23].mxu1 }
 0x160   :  { %1904 = vst.msk [vmem:[#allocation2 + $0x50] sm:$0xff] %vm94_vm0, %v1839_v50  ;;  %v1840_v53 = vadd.f32 %v1618_v51, %v174_v47  ;;  %v183_v47 = vld [vmem:[#allocation2 + $0xa0] sm:$0xff] }
 0x162   :  { %1905 = vst.msk [vmem:[#allocation2 + $0x58] sm:$0xff] %vm94_vm0, %v1840_v53  ;;  %v1333_v54 = vpop.f32.mrb[24].mxu0  ;;  %v184_v53 = vld [vmem:[#allocation2 + $0xa8] sm:$0xff] }
 0x163   :  { %v1622_v56 = vpop.f32.mrb[24].mxu1  ;;  %v1335_v57 = vpop.f32.mrb[25].mxu0 }
 0x164   :  { %v1623_v58 = vadd.f32 %v1622_v56, %v1333_v54  ;;  %v1624_v59 = vpop.f32.mrb[25].mxu1  ;;  %v1336_v60 = vpop.f32.mrb[26].mxu0 }
 0x165   :  { %v1625_v62 = vpop.f32.mrb[26].mxu1  ;;  %v1338_v63 = vpop.f32.mrb[27].mxu0 }
 0x166   :  { %v1841_v0 = vadd.f32 %v1623_v58, %v175_v55  ;;  %v1626_v1 = vadd.f32 %v1625_v62, %v1336_v60  ;;  %v1627_v2 = vpop.f32.mrb[27].mxu1 }
 0x168   :  { %1906 = vst.msk [vmem:[#allocation2 + $0x60] sm:$0xff] %vm94_vm0, %v1841_v0  ;;  %v1842_v3 = vadd.f32 %v1626_v1, %v176_v61  ;;  %v185_v61 = vld [vmem:[#allocation2 + $0xb0] sm:$0xff] }
 0x16a   :  { %1907 = vst.msk [vmem:[#allocation2 + $0x68] sm:$0xff] %vm94_vm0, %v1842_v3  ;;  %v1341_v4 = vpop.f32.mrb[28].mxu0  ;;  %v186_v3 = vld [vmem:[#allocation2 + $0xb8] sm:$0xff] }
 0x16b   :  { %v1630_v6 = vpop.f32.mrb[28].mxu1  ;;  %v1343_v7 = vpop.f32.mrb[29].mxu0 }
 0x16c   :  { %v1631_v8 = vadd.f32 %v1630_v6, %v1341_v4  ;;  %v1632_v9 = vpop.f32.mrb[29].mxu1  ;;  %v1344_v10 = vpop.f32.mrb[30].mxu0 }
 0x16d   :  { %v1633_v12 = vpop.f32.mrb[30].mxu1  ;;  %v1346_v13 = vpop.f32.mrb[31].mxu0 }
 0x16e   :  { %v1843_v14 = vadd.f32 %v1631_v8, %v177_v5  ;;  %v1634_v15 = vadd.f32 %v1633_v12, %v1344_v10  ;;  %v1635_v16 = vpop.f32.mrb[31].mxu1 }
 0x170   :  { %1908 = vst.msk [vmem:[#allocation2 + $0x70] sm:$0xff] %vm94_vm0, %v1843_v14  ;;  %v1844_v17 = vadd.f32 %v1634_v15, %v178_v11  ;;  %v187_v11 = vld [vmem:[#allocation2 + $0xc0] sm:$0xff] }
 0x172   :  { %1909 = vst.msk [vmem:[#allocation2 + $0x78] sm:$0xff] %vm94_vm0, %v1844_v17  ;;  %v1349_v18 = vpop.f32.mrb[32].mxu0  ;;  %v188_v17 = vld [vmem:[#allocation2 + $0xc8] sm:$0xff] }
 0x173   :  { %v1638_v20 = vpop.f32.mrb[32].mxu1  ;;  %v1351_v21 = vpop.f32.mrb[33].mxu0 }
 0x174   :  { %v1639_v22 = vadd.f32 %v1638_v20, %v1349_v18  ;;  %v1640_v23 = vpop.f32.mrb[33].mxu1  ;;  %v1352_v24 = vpop.f32.mrb[34].mxu0 }
 0x175   :  { %v1641_v26 = vpop.f32.mrb[34].mxu1  ;;  %v1354_v27 = vpop.f32.mrb[35].mxu0 }
 0x176   :  { %v1845_v28 = vadd.f32 %v1639_v22, %v179_v19  ;;  %v1642_v29 = vadd.f32 %v1641_v26, %v1352_v24  ;;  %v1643_v30 = vpop.f32.mrb[35].mxu1 }
 0x178   :  { %1910 = vst.msk [vmem:[#allocation2 + $0x80] sm:$0xff] %vm94_vm0, %v1845_v28  ;;  %v1846_v31 = vadd.f32 %v1642_v29, %v180_v25  ;;  %v189_v25 = vld [vmem:[#allocation2 + $0xd0] sm:$0xff] }
 0x17a   :  { %1911 = vst.msk [vmem:[#allocation2 + $0x88] sm:$0xff] %vm94_vm0, %v1846_v31  ;;  %v1357_v32 = vpop.f32.mrb[36].mxu0  ;;  %v190_v31 = vld [vmem:[#allocation2 + $0xd8] sm:$0xff] }
 0x17b   :  { %v1646_v34 = vpop.f32.mrb[36].mxu1  ;;  %v1359_v35 = vpop.f32.mrb[37].mxu0 }
 0x17c   :  { %v1647_v36 = vadd.f32 %v1646_v34, %v1357_v32  ;;  %v1648_v37 = vpop.f32.mrb[37].mxu1  ;;  %v1360_v38 = vpop.f32.mrb[38].mxu0 }
 0x17d   :  { %v1649_v40 = vpop.f32.mrb[38].mxu1  ;;  %v1362_v41 = vpop.f32.mrb[39].mxu0 }
 0x17e   :  { %v1847_v42 = vadd.f32 %v1647_v36, %v181_v33  ;;  %v1650_v43 = vadd.f32 %v1649_v40, %v1360_v38  ;;  %v1651_v44 = vpop.f32.mrb[39].mxu1 }
 0x180   :  { %1912 = vst.msk [vmem:[#allocation2 + $0x90] sm:$0xff] %vm94_vm0, %v1847_v42  ;;  %v1848_v45 = vadd.f32 %v1650_v43, %v182_v39  ;;  %v191_v39 = vld [vmem:[#allocation2 + $0xe0] sm:$0xff] }
 0x182   :  { %1913 = vst.msk [vmem:[#allocation2 + $0x98] sm:$0xff] %vm94_vm0, %v1848_v45  ;;  %v1365_v46 = vpop.f32.mrb[40].mxu0  ;;  %v192_v45 = vld [vmem:[#allocation2 + $0xe8] sm:$0xff] }
 0x183   :  { %v1654_v48 = vpop.f32.mrb[40].mxu1  ;;  %v1367_v49 = vpop.f32.mrb[41].mxu0 }
 0x184   :  { %v1655_v50 = vadd.f32 %v1654_v48, %v1365_v46  ;;  %v1656_v51 = vpop.f32.mrb[41].mxu1  ;;  %v1368_v52 = vpop.f32.mrb[42].mxu0 }
 0x185   :  { %v1657_v54 = vpop.f32.mrb[42].mxu1  ;;  %v1370_v55 = vpop.f32.mrb[43].mxu0 }
 0x186   :  { %v1849_v56 = vadd.f32 %v1655_v50, %v183_v47  ;;  %v1658_v57 = vadd.f32 %v1657_v54, %v1368_v52  ;;  %v1659_v58 = vpop.f32.mrb[43].mxu1 }
 0x188   :  { %1914 = vst.msk [vmem:[#allocation2 + $0xa0] sm:$0xff] %vm94_vm0, %v1849_v56  ;;  %v1850_v59 = vadd.f32 %v1658_v57, %v184_v53  ;;  %v193_v53 = vld [vmem:[#allocation2 + $0xf0] sm:$0xff] }
 0x18a   :  { %1915 = vst.msk [vmem:[#allocation2 + $0xa8] sm:$0xff] %vm94_vm0, %v1850_v59  ;;  %v1373_v60 = vpop.f32.mrb[44].mxu0  ;;  %v194_v59 = vld [vmem:[#allocation2 + $0xf8] sm:$0xff] }
 0x18b   :  { %v1662_v62 = vpop.f32.mrb[44].mxu1  ;;  %v1375_v63 = vpop.f32.mrb[45].mxu0 }
 0x18c   :  { %v1663_v0 = vadd.f32 %v1662_v62, %v1373_v60  ;;  %v1664_v1 = vpop.f32.mrb[45].mxu1  ;;  %v1376_v2 = vpop.f32.mrb[46].mxu0 }
 0x18d   :  { %v1665_v4 = vpop.f32.mrb[46].mxu1  ;;  %v1378_v5 = vpop.f32.mrb[47].mxu0 }
 0x18e   :  { %v1851_v6 = vadd.f32 %v1663_v0, %v185_v61  ;;  %v1666_v7 = vadd.f32 %v1665_v4, %v1376_v2  ;;  %v1667_v8 = vpop.f32.mrb[47].mxu1 }
 0x190   :  { %1916 = vst.msk [vmem:[#allocation2 + $0xb0] sm:$0xff] %vm94_vm0, %v1851_v6  ;;  %v1852_v9 = vadd.f32 %v1666_v7, %v186_v3  ;;  %v195_v3 = vld [vmem:[#allocation2 + $0x100] sm:$0xff] }
 0x192   :  { %1917 = vst.msk [vmem:[#allocation2 + $0xb8] sm:$0xff] %vm94_vm0, %v1852_v9  ;;  %v1381_v10 = vpop.f32.mrb[48].mxu0  ;;  %v196_v9 = vld [vmem:[#allocation2 + $0x108] sm:$0xff] }
 0x193   :  { %v1670_v12 = vpop.f32.mrb[48].mxu1  ;;  %v1383_v13 = vpop.f32.mrb[49].mxu0 }
 0x194   :  { %v1671_v14 = vadd.f32 %v1670_v12, %v1381_v10  ;;  %v1672_v15 = vpop.f32.mrb[49].mxu1  ;;  %v1384_v16 = vpop.f32.mrb[50].mxu0 }
 0x195   :  { %v1673_v18 = vpop.f32.mrb[50].mxu1  ;;  %v1386_v19 = vpop.f32.mrb[51].mxu0 }
 0x196   :  { %v1853_v20 = vadd.f32 %v1671_v14, %v187_v11  ;;  %v1674_v21 = vadd.f32 %v1673_v18, %v1384_v16  ;;  %v1675_v22 = vpop.f32.mrb[51].mxu1 }
 0x198   :  { %1918 = vst.msk [vmem:[#allocation2 + $0xc0] sm:$0xff] %vm94_vm0, %v1853_v20  ;;  %v1854_v23 = vadd.f32 %v1674_v21, %v188_v17  ;;  %v197_v17 = vld [vmem:[#allocation2 + $0x110] sm:$0xff] }
 0x19a   :  { %1919 = vst.msk [vmem:[#allocation2 + $0xc8] sm:$0xff] %vm94_vm0, %v1854_v23  ;;  %v1389_v24 = vpop.f32.mrb[52].mxu0  ;;  %v198_v23 = vld [vmem:[#allocation2 + $0x118] sm:$0xff] }
 0x19b   :  { %v1678_v26 = vpop.f32.mrb[52].mxu1  ;;  %v1391_v27 = vpop.f32.mrb[53].mxu0 }
 0x19c   :  { %v1679_v28 = vadd.f32 %v1678_v26, %v1389_v24  ;;  %v1680_v29 = vpop.f32.mrb[53].mxu1  ;;  %v1392_v30 = vpop.f32.mrb[54].mxu0 }
 0x19d   :  { %v1681_v32 = vpop.f32.mrb[54].mxu1  ;;  %v1394_v33 = vpop.f32.mrb[55].mxu0 }
 0x19e   :  { %v1855_v34 = vadd.f32 %v1679_v28, %v189_v25  ;;  %v1682_v35 = vadd.f32 %v1681_v32, %v1392_v30  ;;  %v1683_v36 = vpop.f32.mrb[55].mxu1 }
 0x1a0   :  { %1920 = vst.msk [vmem:[#allocation2 + $0xd0] sm:$0xff] %vm94_vm0, %v1855_v34  ;;  %v1856_v37 = vadd.f32 %v1682_v35, %v190_v31  ;;  %v199_v31 = vld [vmem:[#allocation2 + $0x120] sm:$0xff] }
 0x1a2   :  { %1921 = vst.msk [vmem:[#allocation2 + $0xd8] sm:$0xff] %vm94_vm0, %v1856_v37  ;;  %v1397_v38 = vpop.f32.mrb[56].mxu0  ;;  %v200_v37 = vld [vmem:[#allocation2 + $0x128] sm:$0xff] }
 0x1a3   :  { %v1686_v40 = vpop.f32.mrb[56].mxu1  ;;  %v1399_v41 = vpop.f32.mrb[57].mxu0 }
 0x1a4   :  { %v1687_v42 = vadd.f32 %v1686_v40, %v1397_v38  ;;  %v1688_v43 = vpop.f32.mrb[57].mxu1  ;;  %v1400_v44 = vpop.f32.mrb[58].mxu0 }
 0x1a5   :  { %v1689_v46 = vpop.f32.mrb[58].mxu1  ;;  %v1402_v47 = vpop.f32.mrb[59].mxu0 }
 0x1a6   :  { %v1857_v48 = vadd.f32 %v1687_v42, %v191_v39  ;;  %v1690_v49 = vadd.f32 %v1689_v46, %v1400_v44  ;;  %v1691_v50 = vpop.f32.mrb[59].mxu1 }
 0x1a8   :  { %1922 = vst.msk [vmem:[#allocation2 + $0xe0] sm:$0xff] %vm94_vm0, %v1857_v48  ;;  %v1858_v51 = vadd.f32 %v1690_v49, %v192_v45  ;;  %v201_v45 = vld [vmem:[#allocation2 + $0x130] sm:$0xff] }
 0x1aa   :  { %1923 = vst.msk [vmem:[#allocation2 + $0xe8] sm:$0xff] %vm94_vm0, %v1858_v51  ;;  %v1405_v52 = vpop.f32.mrb[60].mxu0  ;;  %v202_v51 = vld [vmem:[#allocation2 + $0x138] sm:$0xff] }
 0x1ab   :  { %v1694_v54 = vpop.f32.mrb[60].mxu1  ;;  %v1407_v55 = vpop.f32.mrb[61].mxu0 }
 0x1ac   :  { %v1695_v56 = vadd.f32 %v1694_v54, %v1405_v52  ;;  %v1696_v57 = vpop.f32.mrb[61].mxu1  ;;  %v1408_v58 = vpop.f32.mrb[62].mxu0 }
 0x1ad   :  { %v1697_v60 = vpop.f32.mrb[62].mxu1  ;;  %v1410_v61 = vpop.f32.mrb[63].mxu0 }
 0x1ae   :  { %v1859_v62 = vadd.f32 %v1695_v56, %v193_v53  ;;  %v1698_v63 = vadd.f32 %v1697_v60, %v1408_v58  ;;  %v1699_v0 = vpop.f32.mrb[63].mxu1 }
 0x1b0   :  { %1924 = vst.msk [vmem:[#allocation2 + $0xf0] sm:$0xff] %vm94_vm0, %v1859_v62  ;;  %v1860_v1 = vadd.f32 %v1698_v63, %v194_v59  ;;  %v203_v59 = vld [vmem:[#allocation2 + $0x140] sm:$0xff] }
 0x1b2   :  { %1925 = vst.msk [vmem:[#allocation2 + $0xf8] sm:$0xff] %vm94_vm0, %v1860_v1  ;;  %v1413_v2 = vpop.f32.mrb[64].mxu0  ;;  %v204_v1 = vld [vmem:[#allocation2 + $0x148] sm:$0xff] }
 0x1b3   :  { %v1702_v4 = vpop.f32.mrb[64].mxu1  ;;  %v1415_v5 = vpop.f32.mrb[65].mxu0 }
 0x1b4   :  { %v1703_v6 = vadd.f32 %v1702_v4, %v1413_v2  ;;  %v1704_v7 = vpop.f32.mrb[65].mxu1  ;;  %v1416_v8 = vpop.f32.mrb[66].mxu0 }
 0x1b5   :  { %v1705_v10 = vpop.f32.mrb[66].mxu1  ;;  %v1418_v11 = vpop.f32.mrb[67].mxu0 }
 0x1b6   :  { %v1861_v12 = vadd.f32 %v1703_v6, %v195_v3  ;;  %v1706_v13 = vadd.f32 %v1705_v10, %v1416_v8  ;;  %v1707_v14 = vpop.f32.mrb[67].mxu1 }
 0x1b8   :  { %1926 = vst.msk [vmem:[#allocation2 + $0x100] sm:$0xff] %vm94_vm0, %v1861_v12  ;;  %v1862_v15 = vadd.f32 %v1706_v13, %v196_v9  ;;  %v205_v9 = vld [vmem:[#allocation2 + $0x150] sm:$0xff] }
 0x1ba   :  { %1927 = vst.msk [vmem:[#allocation2 + $0x108] sm:$0xff] %vm94_vm0, %v1862_v15  ;;  %v1421_v16 = vpop.f32.mrb[68].mxu0  ;;  %v206_v15 = vld [vmem:[#allocation2 + $0x158] sm:$0xff] }
 0x1bb   :  { %v1710_v18 = vpop.f32.mrb[68].mxu1  ;;  %v1423_v19 = vpop.f32.mrb[69].mxu0 }
 0x1bc   :  { %v1711_v20 = vadd.f32 %v1710_v18, %v1421_v16  ;;  %v1712_v21 = vpop.f32.mrb[69].mxu1  ;;  %v1424_v22 = vpop.f32.mrb[70].mxu0 }
 0x1bd   :  { %v1713_v24 = vpop.f32.mrb[70].mxu1  ;;  %v1426_v25 = vpop.f32.mrb[71].mxu0 }
 0x1be   :  { %v1863_v26 = vadd.f32 %v1711_v20, %v197_v17  ;;  %v1714_v27 = vadd.f32 %v1713_v24, %v1424_v22  ;;  %v1715_v28 = vpop.f32.mrb[71].mxu1 }
 0x1c0   :  { %1928 = vst.msk [vmem:[#allocation2 + $0x110] sm:$0xff] %vm94_vm0, %v1863_v26  ;;  %v1864_v29 = vadd.f32 %v1714_v27, %v198_v23  ;;  %v207_v23 = vld [vmem:[#allocation2 + $0x160] sm:$0xff] }
 0x1c2   :  { %1929 = vst.msk [vmem:[#allocation2 + $0x118] sm:$0xff] %vm94_vm0, %v1864_v29  ;;  %v1429_v30 = vpop.f32.mrb[72].mxu0  ;;  %v208_v29 = vld [vmem:[#allocation2 + $0x168] sm:$0xff] }
 0x1c3   :  { %v1718_v32 = vpop.f32.mrb[72].mxu1  ;;  %v1431_v33 = vpop.f32.mrb[73].mxu0 }
 0x1c4   :  { %v1719_v34 = vadd.f32 %v1718_v32, %v1429_v30  ;;  %v1720_v35 = vpop.f32.mrb[73].mxu1  ;;  %v1432_v36 = vpop.f32.mrb[74].mxu0 }
 0x1c5   :  { %v1721_v38 = vpop.f32.mrb[74].mxu1  ;;  %v1434_v39 = vpop.f32.mrb[75].mxu0 }
 0x1c6   :  { %v1865_v40 = vadd.f32 %v1719_v34, %v199_v31  ;;  %v1722_v41 = vadd.f32 %v1721_v38, %v1432_v36  ;;  %v1723_v42 = vpop.f32.mrb[75].mxu1 }
 0x1c8   :  { %1930 = vst.msk [vmem:[#allocation2 + $0x120] sm:$0xff] %vm94_vm0, %v1865_v40  ;;  %v1866_v43 = vadd.f32 %v1722_v41, %v200_v37  ;;  %v209_v37 = vld [vmem:[#allocation2 + $0x170] sm:$0xff] }
 0x1ca   :  { %1931 = vst.msk [vmem:[#allocation2 + $0x128] sm:$0xff] %vm94_vm0, %v1866_v43  ;;  %v1437_v44 = vpop.f32.mrb[76].mxu0  ;;  %v210_v43 = vld [vmem:[#allocation2 + $0x178] sm:$0xff] }
 0x1cb   :  { %v1726_v46 = vpop.f32.mrb[76].mxu1  ;;  %v1439_v47 = vpop.f32.mrb[77].mxu0 }
 0x1cc   :  { %v1727_v48 = vadd.f32 %v1726_v46, %v1437_v44  ;;  %v1728_v49 = vpop.f32.mrb[77].mxu1  ;;  %v1440_v50 = vpop.f32.mrb[78].mxu0 }
 0x1cd   :  { %v1729_v52 = vpop.f32.mrb[78].mxu1  ;;  %v1442_v53 = vpop.f32.mrb[79].mxu0 }
 0x1ce   :  { %v1867_v54 = vadd.f32 %v1727_v48, %v201_v45  ;;  %v1730_v55 = vadd.f32 %v1729_v52, %v1440_v50  ;;  %v1731_v56 = vpop.f32.mrb[79].mxu1 }
 0x1d0   :  { %1932 = vst.msk [vmem:[#allocation2 + $0x130] sm:$0xff] %vm94_vm0, %v1867_v54  ;;  %v1868_v57 = vadd.f32 %v1730_v55, %v202_v51  ;;  %v211_v51 = vld [vmem:[#allocation2 + $0x180] sm:$0xff] }
 0x1d2   :  { %1933 = vst.msk [vmem:[#allocation2 + $0x138] sm:$0xff] %vm94_vm0, %v1868_v57  ;;  %v1445_v58 = vpop.f32.mrb[80].mxu0  ;;  %v212_v57 = vld [vmem:[#allocation2 + $0x188] sm:$0xff] }
 0x1d3   :  { %v1734_v60 = vpop.f32.mrb[80].mxu1  ;;  %v1447_v61 = vpop.f32.mrb[81].mxu0 }
 0x1d4   :  { %v1735_v62 = vadd.f32 %v1734_v60, %v1445_v58  ;;  %v1736_v63 = vpop.f32.mrb[81].mxu1  ;;  %v1448_v0 = vpop.f32.mrb[82].mxu0 }
 0x1d5   :  { %v1737_v2 = vpop.f32.mrb[82].mxu1  ;;  %v1450_v3 = vpop.f32.mrb[83].mxu0 }
 0x1d6   :  { %v1869_v4 = vadd.f32 %v1735_v62, %v203_v59  ;;  %v1738_v5 = vadd.f32 %v1737_v2, %v1448_v0  ;;  %v1739_v6 = vpop.f32.mrb[83].mxu1 }
 0x1d8   :  { %1934 = vst.msk [vmem:[#allocation2 + $0x140] sm:$0xff] %vm94_vm0, %v1869_v4  ;;  %v1870_v7 = vadd.f32 %v1738_v5, %v204_v1  ;;  %v213_v1 = vld [vmem:[#allocation2 + $0x190] sm:$0xff] }
 0x1da   :  { %1935 = vst.msk [vmem:[#allocation2 + $0x148] sm:$0xff] %vm94_vm0, %v1870_v7  ;;  %v1453_v8 = vpop.f32.mrb[84].mxu0  ;;  %v214_v7 = vld [vmem:[#allocation2 + $0x198] sm:$0xff] }
 0x1db   :  { %v1742_v10 = vpop.f32.mrb[84].mxu1  ;;  %v1455_v11 = vpop.f32.mrb[85].mxu0 }
 0x1dc   :  { %v1743_v12 = vadd.f32 %v1742_v10, %v1453_v8  ;;  %v1744_v13 = vpop.f32.mrb[85].mxu1  ;;  %v1456_v14 = vpop.f32.mrb[86].mxu0 }
 0x1dd   :  { %v1745_v16 = vpop.f32.mrb[86].mxu1  ;;  %v1458_v17 = vpop.f32.mrb[87].mxu0 }
 0x1de   :  { %v1871_v18 = vadd.f32 %v1743_v12, %v205_v9  ;;  %v1746_v19 = vadd.f32 %v1745_v16, %v1456_v14  ;;  %v1747_v20 = vpop.f32.mrb[87].mxu1 }
 0x1e0   :  { %1936 = vst.msk [vmem:[#allocation2 + $0x150] sm:$0xff] %vm94_vm0, %v1871_v18  ;;  %v1872_v21 = vadd.f32 %v1746_v19, %v206_v15  ;;  %v215_v15 = vld [vmem:[#allocation2 + $0x1a0] sm:$0xff] }
 0x1e2   :  { %1937 = vst.msk [vmem:[#allocation2 + $0x158] sm:$0xff] %vm94_vm0, %v1872_v21  ;;  %v1461_v22 = vpop.f32.mrb[88].mxu0  ;;  %v216_v21 = vld [vmem:[#allocation2 + $0x1a8] sm:$0xff] }
 0x1e3   :  { %v1750_v24 = vpop.f32.mrb[88].mxu1  ;;  %v1463_v25 = vpop.f32.mrb[89].mxu0 }
 0x1e4   :  { %v1751_v26 = vadd.f32 %v1750_v24, %v1461_v22  ;;  %v1752_v27 = vpop.f32.mrb[89].mxu1  ;;  %v1464_v28 = vpop.f32.mrb[90].mxu0 }
 0x1e5   :  { %v1753_v30 = vpop.f32.mrb[90].mxu1  ;;  %v1466_v31 = vpop.f32.mrb[91].mxu0 }
 0x1e6   :  { %v1873_v32 = vadd.f32 %v1751_v26, %v207_v23  ;;  %v1754_v33 = vadd.f32 %v1753_v30, %v1464_v28  ;;  %v1755_v34 = vpop.f32.mrb[91].mxu1 }
 0x1e8   :  { %1938 = vst.msk [vmem:[#allocation2 + $0x160] sm:$0xff] %vm94_vm0, %v1873_v32  ;;  %v1874_v35 = vadd.f32 %v1754_v33, %v208_v29  ;;  %v217_v29 = vld [vmem:[#allocation2 + $0x1b0] sm:$0xff] }
 0x1ea   :  { %1939 = vst.msk [vmem:[#allocation2 + $0x168] sm:$0xff] %vm94_vm0, %v1874_v35  ;;  %v1469_v36 = vpop.f32.mrb[92].mxu0  ;;  %v218_v35 = vld [vmem:[#allocation2 + $0x1b8] sm:$0xff] }
 0x1eb   :  { %v1758_v38 = vpop.f32.mrb[92].mxu1  ;;  %v1471_v39 = vpop.f32.mrb[93].mxu0 }
 0x1ec   :  { %v1759_v40 = vadd.f32 %v1758_v38, %v1469_v36  ;;  %v1760_v41 = vpop.f32.mrb[93].mxu1  ;;  %v1472_v42 = vpop.f32.mrb[94].mxu0 }
 0x1ed   :  { %v1761_v44 = vpop.f32.mrb[94].mxu1  ;;  %v1474_v45 = vpop.f32.mrb[95].mxu0 }
 0x1ee   :  { %v1875_v46 = vadd.f32 %v1759_v40, %v209_v37  ;;  %v1762_v47 = vadd.f32 %v1761_v44, %v1472_v42  ;;  %v1763_v48 = vpop.f32.mrb[95].mxu1 }
 0x1f0   :  { %1940 = vst.msk [vmem:[#allocation2 + $0x170] sm:$0xff] %vm94_vm0, %v1875_v46  ;;  %v1876_v49 = vadd.f32 %v1762_v47, %v210_v43  ;;  %v219_v43 = vld [vmem:[#allocation2 + $0x1c0] sm:$0xff] }
 0x1f2   :  { %1941 = vst.msk [vmem:[#allocation2 + $0x178] sm:$0xff] %vm94_vm0, %v1876_v49  ;;  %v1477_v50 = vpop.f32.mrb[96].mxu0  ;;  %v220_v49 = vld [vmem:[#allocation2 + $0x1c8] sm:$0xff] }
 0x1f3   :  { %v1766_v52 = vpop.f32.mrb[96].mxu1  ;;  %v1479_v53 = vpop.f32.mrb[97].mxu0 }
 0x1f4   :  { %v1767_v54 = vadd.f32 %v1766_v52, %v1477_v50  ;;  %v1768_v55 = vpop.f32.mrb[97].mxu1  ;;  %v1480_v56 = vpop.f32.mrb[98].mxu0 }
 0x1f5   :  { %v1769_v58 = vpop.f32.mrb[98].mxu1  ;;  %v1482_v59 = vpop.f32.mrb[99].mxu0 }
 0x1f6   :  { %v1877_v60 = vadd.f32 %v1767_v54, %v211_v51  ;;  %v1770_v61 = vadd.f32 %v1769_v58, %v1480_v56  ;;  %v1771_v62 = vpop.f32.mrb[99].mxu1 }
 0x1f8   :  { %1942 = vst.msk [vmem:[#allocation2 + $0x180] sm:$0xff] %vm94_vm0, %v1877_v60  ;;  %v1878_v63 = vadd.f32 %v1770_v61, %v212_v57  ;;  %v221_v57 = vld [vmem:[#allocation2 + $0x1d0] sm:$0xff] }
 0x1fa   :  { %1943 = vst.msk [vmem:[#allocation2 + $0x188] sm:$0xff] %vm94_vm0, %v1878_v63  ;;  %v1485_v0 = vpop.f32.mrb[100].mxu0  ;;  %v222_v63 = vld [vmem:[#allocation2 + $0x1d8] sm:$0xff] }
 0x1fb   :  { %v1774_v2 = vpop.f32.mrb[100].mxu1  ;;  %v1487_v3 = vpop.f32.mrb[101].mxu0 }
 0x1fc   :  { %v1775_v4 = vadd.f32 %v1774_v2, %v1485_v0  ;;  %v1776_v5 = vpop.f32.mrb[101].mxu1  ;;  %v1488_v6 = vpop.f32.mrb[102].mxu0 }
 0x1fd   :  { %v1777_v8 = vpop.f32.mrb[102].mxu1  ;;  %v1490_v9 = vpop.f32.mrb[103].mxu0 }
 0x1fe   :  { %v1879_v10 = vadd.f32 %v1775_v4, %v213_v1  ;;  %v1778_v11 = vadd.f32 %v1777_v8, %v1488_v6  ;;  %v1779_v12 = vpop.f32.mrb[103].mxu1 }
 0x200   :  { %1944 = vst.msk [vmem:[#allocation2 + $0x190] sm:$0xff] %vm94_vm0, %v1879_v10  ;;  %v1880_v13 = vadd.f32 %v1778_v11, %v214_v7  ;;  %v223_v7 = vld [vmem:[#allocation2 + $0x1e0] sm:$0xff] }
 0x202   :  { %1945 = vst.msk [vmem:[#allocation2 + $0x198] sm:$0xff] %vm94_vm0, %v1880_v13  ;;  %v1493_v14 = vpop.f32.mrb[104].mxu0  ;;  %v224_v13 = vld [vmem:[#allocation2 + $0x1e8] sm:$0xff] }
 0x203   :  { %v1782_v16 = vpop.f32.mrb[104].mxu1  ;;  %v1495_v17 = vpop.f32.mrb[105].mxu0 }
 0x204   :  { %v1783_v18 = vadd.f32 %v1782_v16, %v1493_v14  ;;  %v1784_v19 = vpop.f32.mrb[105].mxu1  ;;  %v1496_v20 = vpop.f32.mrb[106].mxu0 }
 0x205   :  { %v1785_v22 = vpop.f32.mrb[106].mxu1  ;;  %v1498_v23 = vpop.f32.mrb[107].mxu0 }
 0x206   :  { %v1881_v24 = vadd.f32 %v1783_v18, %v215_v15  ;;  %v1786_v25 = vadd.f32 %v1785_v22, %v1496_v20  ;;  %v1787_v26 = vpop.f32.mrb[107].mxu1 }
 0x208   :  { %1946 = vst.msk [vmem:[#allocation2 + $0x1a0] sm:$0xff] %vm94_vm0, %v1881_v24  ;;  %v1882_v27 = vadd.f32 %v1786_v25, %v216_v21  ;;  %v225_v21 = vld [vmem:[#allocation2 + $0x1f0] sm:$0xff] }
 0x20a   :  { %1947 = vst.msk [vmem:[#allocation2 + $0x1a8] sm:$0xff] %vm94_vm0, %v1882_v27  ;;  %v1501_v28 = vpop.f32.mrb[108].mxu0  ;;  %v226_v27 = vld [vmem:[#allocation2 + $0x1f8] sm:$0xff] }
 0x20b   :  { %v1790_v30 = vpop.f32.mrb[108].mxu1  ;;  %v1503_v31 = vpop.f32.mrb[109].mxu0 }
 0x20c   :  { %v1791_v32 = vadd.f32 %v1790_v30, %v1501_v28  ;;  %v1792_v33 = vpop.f32.mrb[109].mxu1  ;;  %v1504_v34 = vpop.f32.mrb[110].mxu0 }
 0x20d   :  { %v1793_v36 = vpop.f32.mrb[110].mxu1  ;;  %v1506_v37 = vpop.f32.mrb[111].mxu0 }
 0x20e   :  { %v1883_v38 = vadd.f32 %v1791_v32, %v217_v29  ;;  %v1794_v39 = vadd.f32 %v1793_v36, %v1504_v34  ;;  %v1795_v40 = vpop.f32.mrb[111].mxu1 }
 0x210   :  { %1948 = vst.msk [vmem:[#allocation2 + $0x1b0] sm:$0xff] %vm94_vm0, %v1883_v38  ;;  %v1884_v41 = vadd.f32 %v1794_v39, %v218_v35 }
 0x212   :  { %1949 = vst.msk [vmem:[#allocation2 + $0x1b8] sm:$0xff] %vm94_vm0, %v1884_v41  ;;  %v1509_v42 = vpop.f32.mrb[112].mxu0 }
 0x213   :  { %v1798_v44 = vpop.f32.mrb[112].mxu1  ;;  %v1511_v45 = vpop.f32.mrb[113].mxu0 }
 0x214   :  { %v1799_v46 = vadd.f32 %v1798_v44, %v1509_v42  ;;  %v1800_v47 = vpop.f32.mrb[113].mxu1  ;;  %v1512_v48 = vpop.f32.mrb[114].mxu0 }
 0x215   :  { %v1801_v50 = vpop.f32.mrb[114].mxu1  ;;  %v1514_v51 = vpop.f32.mrb[115].mxu0 }
 0x216   :  { %v1885_v52 = vadd.f32 %v1799_v46, %v219_v43  ;;  %v1802_v53 = vadd.f32 %v1801_v50, %v1512_v48  ;;  %v1803_v54 = vpop.f32.mrb[115].mxu1 }
 0x218   :  { %1950 = vst.msk [vmem:[#allocation2 + $0x1c0] sm:$0xff] %vm94_vm0, %v1885_v52  ;;  %v1886_v55 = vadd.f32 %v1802_v53, %v220_v49 }
 0x21a   :  { %1951 = vst.msk [vmem:[#allocation2 + $0x1c8] sm:$0xff] %vm94_vm0, %v1886_v55  ;;  %v1517_v56 = vpop.f32.mrb[116].mxu0 }
 0x21b   :  { %v1806_v58 = vpop.f32.mrb[116].mxu1  ;;  %v1519_v59 = vpop.f32.mrb[117].mxu0 }
 0x21c   :  { %v1807_v60 = vadd.f32 %v1806_v58, %v1517_v56  ;;  %v1808_v61 = vpop.f32.mrb[117].mxu1  ;;  %v1520_v62 = vpop.f32.mrb[118].mxu0 }
 0x21d   :  { %v1809_v0 = vpop.f32.mrb[118].mxu1  ;;  %v1522_v1 = vpop.f32.mrb[119].mxu0 }
 0x21e   :  { %v1887_v2 = vadd.f32 %v1807_v60, %v221_v57  ;;  %v1810_v3 = vadd.f32 %v1809_v0, %v1520_v62  ;;  %v1811_v4 = vpop.f32.mrb[119].mxu1 }
 0x220   :  { %1952 = vst.msk [vmem:[#allocation2 + $0x1d0] sm:$0xff] %vm94_vm0, %v1887_v2  ;;  %v1888_v5 = vadd.f32 %v1810_v3, %v222_v63 }
 0x222   :  { %1953 = vst.msk [vmem:[#allocation2 + $0x1d8] sm:$0xff] %vm94_vm0, %v1888_v5  ;;  %v1525_v6 = vpop.f32.mrb[120].mxu0 }
 0x223   :  { %v1814_v8 = vpop.f32.mrb[120].mxu1  ;;  %v1527_v9 = vpop.f32.mrb[121].mxu0 }
 0x224   :  { %v1815_v10 = vadd.f32 %v1814_v8, %v1525_v6  ;;  %v1816_v11 = vpop.f32.mrb[121].mxu1  ;;  %v1528_v12 = vpop.f32.mrb[122].mxu0 }
 0x225   :  { %v1817_v14 = vpop.f32.mrb[122].mxu1  ;;  %v1530_v15 = vpop.f32.mrb[123].mxu0 }
 0x226   :  { %v1889_v16 = vadd.f32 %v1815_v10, %v223_v7  ;;  %v1818_v17 = vadd.f32 %v1817_v14, %v1528_v12  ;;  %v1819_v18 = vpop.f32.mrb[123].mxu1 }
 0x228   :  { %1954 = vst.msk [vmem:[#allocation2 + $0x1e0] sm:$0xff] %vm94_vm0, %v1889_v16  ;;  %v1890_v19 = vadd.f32 %v1818_v17, %v224_v13 }
 0x22a   :  { %1955 = vst.msk [vmem:[#allocation2 + $0x1e8] sm:$0xff] %vm94_vm0, %v1890_v19  ;;  %v1533_v20 = vpop.f32.mrb[124].mxu0 }
 0x22b   :  { %v1822_v22 = vpop.f32.mrb[124].mxu1  ;;  %v1535_v23 = vpop.f32.mrb[125].mxu0 }
 0x22c   :  { %v1823_v24 = vadd.f32 %v1822_v22, %v1533_v20  ;;  %v1824_v25 = vpop.f32.mrb[125].mxu1  ;;  %v1536_v26 = vpop.f32.mrb[126].mxu0 }
 0x22d   :  { %v1825_v28 = vpop.f32.mrb[126].mxu1  ;;  %v1538_v29 = vpop.f32.mrb[127].mxu0 }
 0x22e   :  { %v1891_v30 = vadd.f32 %v1823_v24, %v225_v21  ;;  %v1826_v31 = vadd.f32 %v1825_v28, %v1536_v26  ;;  %v1827_v32 = vpop.f32.mrb[127].mxu1 }
 0x230   :  { %1956 = vst.msk [vmem:[#allocation2 + $0x1f0] sm:$0xff] %vm94_vm0, %v1891_v30  ;;  %v1892_v33 = vadd.f32 %v1826_v31, %v226_v27 }
 0x232   :  { %1957 = vst.msk [vmem:[#allocation2 + $0x1f8] sm:$0xff] %vm94_vm0, %v1892_v33 }
 0x233 PF:  { %s3654_s8 = sadd.s32 4294967295, %s5019_s1 }
 0x234   :  { %p3656_p0 = scmp.ne.s32.totalorder %s3654_s8, 0 }
 0x235   :  { %v2059_v34 = vld [vmem:[%s5022_s4] sm:$0xff] (!%p3656_p0)  ;;  %vm2174_vm1 = vcmask (!%p3656_p0), 1043456   ;;  %v1964_v36 = vld [vmem:[#allocation2 + $0x8] sm:$0xff] (!%p3656_p0)  ;;  %v4366_v39 = vmov (!%p3656_p0), 0   ;;  %v1965_v42 = vld [vmem:[#allocation2 + $0x10] sm:$0xff] (!%p3656_p0) }
 0x236   :  { %1962 = sbr.rel (%p3656_p0) target bundleno = 1259 (0x4eb), region = 37  ;;  %v1963_v35 = vld [vmem:[#allocation2] sm:$0xff] (!%p3656_p0)  ;;  %v3658_v37 = vcombine.high (!%p3656_p0), %v2059_v34, %v2059_v34  ;;  %v3657_v38 = vcombine.low (!%p3656_p0), %v2059_v34, %v2059_v34  ;;  %2213 = vmatprep.mubr.bf16.mxu0 (!%p3656_p0), %v4366_v39  ;;  %4028 = vmatprep.subr.bf16.mxu1 (!%p3656_p0), %v4366_v39  ;;  %v1966_v43 = vld [vmem:[#allocation2 + $0x18] sm:$0xff] (!%p3656_p0)  ;;  %v1968_v46 = vld [vmem:[#allocation2 + $0x28] sm:$0xff] (!%p3656_p0) }
 0x237   :  { %v2027_v41 = vpack.c.bf16 (!%p3656_p0), %v1964_v36, %v1963_v35  ;;  %v2028_v44 = vpack.c.bf16 (!%p3656_p0), %v1966_v43, %v1965_v42  ;;  %v1967_v45 = vld [vmem:[#allocation2 + $0x20] sm:$0xff] (!%p3656_p0)  ;;  %v1969_v48 = vld [vmem:[#allocation2 + $0x30] sm:$0xff] (!%p3656_p0)  ;;  %v1970_v49 = vld [vmem:[#allocation2 + $0x38] sm:$0xff] (!%p3656_p0) }
 0x238   :  { %3659 = vmatprep.subr.msk.bf16.mxu0 (!%p3656_p0), %vm2174_vm1, %v3658_v37  ;;  %v2176_v40 = vsel (!%p3656_p0), %vm2174_vm1, %v3657_v38, 0  ;;  %v2029_v47 = vpack.c.bf16 (!%p3656_p0), %v1968_v46, %v1967_v45  ;;  %v2030_v50 = vpack.c.bf16 (!%p3656_p0), %v1970_v49, %v1969_v48  ;;  %v1971_v51 = vld [vmem:[#allocation2 + $0x40] sm:$0xff] (!%p3656_p0)  ;;  %v1972_v52 = vld [vmem:[#allocation2 + $0x48] sm:$0xff] (!%p3656_p0)  ;;  %v1973_v54 = vld [vmem:[#allocation2 + $0x50] sm:$0xff] (!%p3656_p0) }
 0x239   :  { %2182 = vmatpush1.bf16.msra.mxu0 (!%p3656_p0), %v2176_v40  ;;  %v2031_v53 = vpack.c.bf16 (!%p3656_p0), %v1972_v52, %v1971_v51  ;;  %v1974_v55 = vld [vmem:[#allocation2 + $0x58] sm:$0xff] (!%p3656_p0)  ;;  %v1975_v57 = vld [vmem:[#allocation2 + $0x60] sm:$0xff] (!%p3656_p0)  ;;  %v1976_v58 = vld [vmem:[#allocation2 + $0x68] sm:$0xff] (!%p3656_p0) }
 0x23a   :  { %2854 = vmatprep.subr.bf16.mxu0 (!%p3656_p0), %v4366_v39  ;;  %v2032_v56 = vpack.c.bf16 (!%p3656_p0), %v1974_v55, %v1973_v54  ;;  %v2033_v59 = vpack.c.bf16 (!%p3656_p0), %v1976_v58, %v1975_v57  ;;  %v1977_v60 = vld [vmem:[#allocation2 + $0x70] sm:$0xff] (!%p3656_p0)  ;;  %v1978_v61 = vld [vmem:[#allocation2 + $0x78] sm:$0xff] (!%p3656_p0)  ;;  %v4295_v62 = vld [vmem:[%s5024_s6] sm:$0xff] (!%p3656_p0)  }
 0x23b   :  { %4044 = vmatpush1.bf16.msra.mxu1 (!%p3656_p0), %v4295_v62  ;;  %v2034_v63 = vpack.c.bf16 (!%p3656_p0), %v1978_v61, %v1977_v60  ;;  %v4296_v0 = vld [vmem:[%s5024_s6 + $0x8] sm:$0xff] (!%p3656_p0)   ;;  %v1979_v1 = vld [vmem:[#allocation2 + $0x80] sm:$0xff] (!%p3656_p0)  ;;  %v4297_v3 = vld [vmem:[%s5024_s6 + $0x10] sm:$0xff] (!%p3656_p0)  }
 0x23c   :  { %3660 = vmatmul.mubr.msk.bf16.vlgmr.msra.gmra.mrb[0].mxu0 (!%p3656_p0), %vm94_vm0, %v2027_v41  ;;  %4029 = vmatprep.subr.bf16.mxu1 (!%p3656_p0), %v4366_v39  ;;  %v1980_v2 = vld [vmem:[#allocation2 + $0x88] sm:$0xff] (!%p3656_p0)  ;;  %v4298_v5 = vld [vmem:[%s5024_s6 + $0x18] sm:$0xff] (!%p3656_p0)   ;;  %v1981_v6 = vld [vmem:[#allocation2 + $0x90] sm:$0xff] (!%p3656_p0) }
 0x23d   :  { %2223 = vmatprep.mubr.bf16.mxu0 %v4366_v39  ;;  %2855 = vmatpush1.bf16.msra.mxu0 %v4295_v62  ;;  %v2035_v4 = vpack.c.bf16 %v1980_v2, %v1979_v1  ;;  %v1982_v7 = vld [vmem:[#allocation2 + $0x98] sm:$0xff]  ;;  %v4299_v8 = vld [vmem:[%s5024_s6 + $0x20] sm:$0xff]   ;;  %v4300_v10 = vld [vmem:[%s5024_s6 + $0x28] sm:$0xff]  }
 0x23e   :  { %2856 = vmatprep.subr.bf16.mxu0 %v4366_v39  ;;  %v2036_v9 = vpack.c.bf16 %v1982_v7, %v1981_v6  ;;  %v1983_v11 = vld [vmem:[#allocation2 + $0xa0] sm:$0xff]  ;;  %v1984_v12 = vld [vmem:[#allocation2 + $0xa8] sm:$0xff]  ;;  %v4301_v13 = vld [vmem:[%s5024_s6 + $0x30] sm:$0xff]   ;;  %v2062_v6 = vlaneseq }
 0x23f   :  { %4045 = vmatpush1.bf16.msra.mxu1 %v4296_v0  ;;  %v2037_v14 = vpack.c.bf16 %v1984_v12, %v1983_v11  ;;  %v1985_v15 = vld [vmem:[#allocation2 + $0xb0] sm:$0xff]  ;;  %v1986_v16 = vld [vmem:[#allocation2 + $0xb8] sm:$0xff]  ;;  %v4303_v19 = vld [vmem:[%s5024_s6 + $0x40] sm:$0xff]  }
 0x240   :  { %4030 = vmatprep.subr.bf16.mxu1 %v4366_v39  ;;  %v4302_v17 = vld [vmem:[%s5024_s6 + $0x38] sm:$0xff]   ;;  %v2038_v18 = vpack.c.bf16 %v1986_v16, %v1985_v15  ;;  %v1987_v20 = vld [vmem:[#allocation2 + $0xc0] sm:$0xff]  ;;  %v1988_v21 = vld [vmem:[#allocation2 + $0xc8] sm:$0xff]  ;;  %v2063_v7 = vshrl.u32 %v2062_v6, 7 }
 0x241   :  { %2857 = vmatpush1.bf16.msra.mxu0 %v4296_v0  ;;  %v4304_v22 = vld [vmem:[%s5024_s6 + $0x48] sm:$0xff]   ;;  %v2039_v23 = vpack.c.bf16 %v1988_v21, %v1987_v20  ;;  %v4305_v24 = vld [vmem:[%s5024_s6 + $0x50] sm:$0xff]   ;;  %v1990_v26 = vld [vmem:[#allocation2 + $0xd8] sm:$0xff] }
 0x242   :  { %2858 = vmatprep.subr.bf16.mxu0 %v4366_v39  ;;  %v1989_v25 = vld [vmem:[#allocation2 + $0xd0] sm:$0xff]  ;;  %v4306_v27 = vld [vmem:[%s5024_s6 + $0x58] sm:$0xff]   ;;  %v4307_v29 = vld [vmem:[%s5024_s6 + $0x60] sm:$0xff]   ;;  %v2064_v11 = vsub.s32 0, %v2063_v7 }
 0x243   :  { %4046 = vmatpush1.bf16.msra.mxu1 %v4297_v3  ;;  %v2040_v28 = vpack.c.bf16 %v1990_v26, %v1989_v25  ;;  %v1991_v30 = vld [vmem:[#allocation2 + $0xe0] sm:$0xff]  ;;  %v1992_v31 = vld [vmem:[#allocation2 + $0xe8] sm:$0xff]  ;;  %v4309_v34 = vld [vmem:[%s5024_s6 + $0x70] sm:$0xff]  }
 0x244   :  { %3661 = vmatmul.mubr.msk.bf16.gmra.mrb[4].mxu0 %vm94_vm0, %v2028_v44  ;;  %4031 = vmatprep.subr.bf16.mxu1 %v4366_v39  ;;  %v4308_v32 = vld [vmem:[%s5024_s6 + $0x68] sm:$0xff]   ;;  %v2041_v33 = vpack.c.bf16 %v1992_v31, %v1991_v30  ;;  %v1993_v35 = vld [vmem:[#allocation2 + $0xf0] sm:$0xff]  ;;  %v1994_v36 = vld [vmem:[#allocation2 + $0xf8] sm:$0xff] }
 0x245   :  { %2233 = vmatprep.mubr.bf16.mxu0 %v4366_v39  ;;  %2859 = vmatpush1.bf16.msra.mxu0 %v4297_v3  ;;  %v4310_v37 = vld [vmem:[%s5024_s6 + $0x78] sm:$0xff]   ;;  %v2042_v38 = vpack.c.bf16 %v1994_v36, %v1993_v35  ;;  %v1995_v40 = vld [vmem:[#allocation2 + $0x100] sm:$0xff]  ;;  %v1996_v41 = vld [vmem:[#allocation2 + $0x108] sm:$0xff] }
 0x246   :  { %2860 = vmatprep.subr.bf16.mxu0 %v4366_v39  ;;  %v2043_v42 = vpack.c.bf16 %v1996_v41, %v1995_v40  ;;  %v1997_v43 = vld [vmem:[#allocation2 + $0x110] sm:$0xff]  ;;  %v1998_v44 = vld [vmem:[#allocation2 + $0x118] sm:$0xff]  ;;  %v1999_v46 = vld [vmem:[#allocation2 + $0x120] sm:$0xff] }
 0x247   :  { %4047 = vmatpush1.bf16.msra.mxu1 %v4298_v5  ;;  %v2044_v45 = vpack.c.bf16 %v1998_v44, %v1997_v43  ;;  %v2001_v49 = vld [vmem:[#allocation2 + $0x130] sm:$0xff]  ;;  %v2003_v52 = vld [vmem:[#allocation2 + $0x140] sm:$0xff]  ;;  %v2010_v62 = vld [vmem:[#allocation2 + $0x178] sm:$0xff] }
 0x248   :  { %4032 = vmatprep.subr.bf16.mxu1 %v4366_v39  ;;  %v2005_v55 = vld [vmem:[#allocation2 + $0x150] sm:$0xff]  ;;  %v2007_v58 = vld [vmem:[#allocation2 + $0x160] sm:$0xff]  ;;  %v2012_v1 = vld [vmem:[#allocation2 + $0x188] sm:$0xff] }
 0x249   :  { %2861 = vmatpush1.bf16.msra.mxu0 %v4298_v5  ;;  %v2009_v61 = vld [vmem:[#allocation2 + $0x170] sm:$0xff]  ;;  %v2011_v0 = vld [vmem:[#allocation2 + $0x180] sm:$0xff] }
 0x24a   :  { %2862 = vmatprep.subr.bf16.mxu0 %v4366_v39  ;;  %v2051_v2 = vpack.c.bf16 %v2012_v1, %v2011_v0  ;;  %v2013_v3 = vld [vmem:[#allocation2 + $0x190] sm:$0xff]  ;;  %v2060_v12 = vld [vmem:[%s5023_s5] sm:$0x3] }
 0x24b   :  { %4048 = vmatpush1.bf16.msra.mxu1 %v4299_v8  ;;  %v2017_v16 = vld [vmem:[#allocation2 + $0x1b0] sm:$0xff]  ;;  %v2019_v31 = vld [vmem:[#allocation2 + $0x1c0] sm:$0xff] }
 0x24c   :  { %3662 = vmatmul.mubr.msk.bf16.gmra.mrb[8].mxu0 %vm94_vm0, %v2029_v47  ;;  %4033 = vmatprep.subr.bf16.mxu1 %v4366_v39  ;;  %v2000_v47 = vld [vmem:[#allocation2 + $0x128] sm:$0xff] }
 0x24d   :  { %2243 = vmatprep.mubr.bf16.mxu0 %v4366_v39  ;;  %2863 = vmatpush1.bf16.msra.mxu0 %v4299_v8  ;;  %v2045_v48 = vpack.c.bf16 %v2000_v47, %v1999_v46  ;;  %v2015_v8 = vld [vmem:[#allocation2 + $0x1a0] sm:$0xff] }
 0x24e   :  { %2864 = vmatprep.subr.bf16.mxu0 %v4366_v39 }
 0x24f   :  { %4049 = vmatpush1.bf16.msra.mxu1 %v4300_v10 }
 0x250   :  { %4034 = vmatprep.subr.bf16.mxu1 %v4366_v39 }
 0x251   :  { %2865 = vmatpush1.bf16.msra.mxu0 %v4300_v10 }
 0x252   :  { %2866 = vmatprep.subr.bf16.mxu0 %v4366_v39 }
 0x253   :  { %4050 = vmatpush1.bf16.msra.mxu1 %v4301_v13 }
 0x254   :  { %3663 = vmatmul.mubr.msk.bf16.gmra.mrb[12].mxu0 %vm94_vm0, %v2030_v50  ;;  %4035 = vmatprep.subr.bf16.mxu1 %v4366_v39  ;;  %v2002_v50 = vld [vmem:[#allocation2 + $0x138] sm:$0xff] }
 0x255   :  { %2253 = vmatprep.mubr.bf16.mxu0 %v4366_v39  ;;  %2867 = vmatpush1.bf16.msra.mxu0 %v4301_v13  ;;  %v2046_v51 = vpack.c.bf16 %v2002_v50, %v2001_v49  ;;  %v2068_v13 = vsub.s32 1, %v2063_v7  ;;  %v2021_v49 = vld [vmem:[#allocation2 + $0x1d0] sm:$0xff]  ;;  %v2022_v50 = vld [vmem:[#allocation2 + $0x1d8] sm:$0xff] }
 0x256   :  { %2868 = vmatprep.subr.bf16.mxu0 %v4366_v39 }
 0x257   :  { %4051 = vmatpush1.bf16.msra.mxu1 %v4302_v17  ;;  %v4848_v15 = vrot.slane %v2060_v12, %v2068_v13 }
 0x258   :  { %4036 = vmatprep.subr.bf16.mxu1 %v4366_v39 }
 0x259   :  { %2869 = vmatpush1.bf16.msra.mxu0 %v4302_v17  ;;  %v2018_v17 = vld [vmem:[#allocation2 + $0x1b8] sm:$0xff] }
 0x25a   :  { %2870 = vmatprep.subr.bf16.mxu0 %v4366_v39  ;;  %v2054_v21 = vpack.c.bf16 %v2018_v17, %v2017_v16 }
 0x25b   :  { %4052 = vmatpush1.bf16.msra.mxu1 %v4303_v19 }
 0x25c   :  { %3664 = vmatmul.mubr.msk.bf16.gmra.mrb[16].mxu0 %vm94_vm0, %v2031_v53  ;;  %4037 = vmatprep.subr.bf16.mxu1 %v4366_v39  ;;  %v2004_v53 = vld [vmem:[#allocation2 + $0x148] sm:$0xff] }
 0x25d   :  { %2263 = vmatprep.mubr.bf16.mxu0 %v4366_v39  ;;  %2871 = vmatpush1.bf16.msra.mxu0 %v4303_v19  ;;  %v2047_v54 = vpack.c.bf16 %v2004_v53, %v2003_v52 }
 0x25e   :  { %2872 = vmatprep.subr.bf16.mxu0 %v4366_v39 }
 0x25f   :  { %4053 = vmatpush1.bf16.msra.mxu1 %v4304_v22 }
 0x260   :  { %4038 = vmatprep.subr.bf16.mxu1 %v4366_v39 }
 0x261   :  { %2873 = vmatpush1.bf16.msra.mxu0 %v4304_v22 }
 0x262   :  { %2874 = vmatprep.subr.bf16.mxu0 %v4366_v39 }
 0x263   :  { %4054 = vmatpush1.bf16.msra.mxu1 %v4305_v24 }
 0x264   :  { %3665 = vmatmul.mubr.msk.bf16.gmra.mrb[20].mxu0 %vm94_vm0, %v2032_v56  ;;  %4039 = vmatprep.subr.bf16.mxu1 %v4366_v39  ;;  %v2006_v56 = vld [vmem:[#allocation2 + $0x158] sm:$0xff] }
 0x265   :  { %2273 = vmatprep.mubr.bf16.mxu0 %v4366_v39  ;;  %2875 = vmatpush1.bf16.msra.mxu0 %v4305_v24  ;;  %v2048_v57 = vpack.c.bf16 %v2006_v56, %v2005_v55  ;;  %v2056_v56 = vpack.c.bf16 %v2022_v50, %v2021_v49 }
 0x266   :  { %2876 = vmatprep.subr.bf16.mxu0 %v4366_v39 }
 0x267   :  { %4055 = vmatpush1.bf16.msra.mxu1 %v4306_v27 }
 0x268   :  { %4040 = vmatprep.subr.bf16.mxu1 %v4366_v39 }
 0x269   :  { %2877 = vmatpush1.bf16.msra.mxu0 %v4306_v27 }
 0x26a   :  { %2878 = vmatprep.subr.bf16.mxu0 %v4366_v39 }
 0x26b   :  { %4056 = vmatpush1.bf16.msra.mxu1 %v4307_v29 }
 0x26c   :  { %3666 = vmatmul.mubr.msk.bf16.gmra.mrb[24].mxu0 %vm94_vm0, %v2033_v59  ;;  %4041 = vmatprep.subr.bf16.mxu1 %v4366_v39  ;;  %v2008_v59 = vld [vmem:[#allocation2 + $0x168] sm:$0xff] }
 0x26d   :  { %2283 = vmatprep.mubr.bf16.mxu0 %v4366_v39  ;;  %2879 = vmatpush1.bf16.msra.mxu0 %v4307_v29  ;;  %v2049_v60 = vpack.c.bf16 %v2008_v59, %v2007_v58 }
 0x26e   :  { %2880 = vmatprep.subr.bf16.mxu0 %v4366_v39 }
 0x26f   :  { %4057 = vmatpush1.bf16.msra.mxu1 %v4308_v32 }
 0x270   :  { %4042 = vmatprep.subr.bf16.mxu1 %v4366_v39 }
 0x271   :  { %2881 = vmatpush1.bf16.msra.mxu0 %v4308_v32  ;;  %v2020_v32 = vld [vmem:[#allocation2 + $0x1c8] sm:$0xff] }
 0x272   :  { %2882 = vmatprep.subr.bf16.mxu0 %v4366_v39 }
 0x273   :  { %4058 = vmatpush1.bf16.msra.mxu1 %v4309_v34 }
 0x274   :  { %3667 = vmatmul.mubr.msk.bf16.gmra.mrb[28].mxu0 %vm94_vm0, %v2034_v63  ;;  %4043 = vmatprep.subr.bf16.mxu1 %v4366_v39  ;;  %v2050_v63 = vpack.c.bf16 %v2010_v62, %v2009_v61 }
 0x275   :  { %2293 = vmatprep.mubr.bf16.mxu0 %v4366_v39  ;;  %2883 = vmatpush1.bf16.msra.mxu0 %v4309_v34 }
 0x276   :  { %2884 = vmatprep.subr.bf16.mxu0 %v4366_v39 }
 0x277   :  { %4059 = vmatpush1.bf16.msra.mxu1 %v4310_v37 }
 0x279   :  { %2885 = vmatpush1.bf16.msra.mxu0 %v4310_v37 }
 0x27c   :  { %3668 = vmatmul.mubr.msk.bf16.gmra.mrb[32].mxu0 %vm94_vm0, %v2035_v4  ;;  %v2014_v4 = vld [vmem:[#allocation2 + $0x198] sm:$0xff] }
 0x27d   :  { %2303 = vmatprep.mubr.bf16.mxu0 %v4366_v39  ;;  %v2052_v5 = vpack.c.bf16 %v2014_v4, %v2013_v3  ;;  %v2024_v3 = vld [vmem:[#allocation2 + $0x1e8] sm:$0xff] }
 0x284   :  { %3669 = vmatmul.mubr.msk.bf16.gmra.mrb[36].mxu0 %vm94_vm0, %v2036_v9  ;;  %v2016_v9 = vld [vmem:[#allocation2 + $0x1a8] sm:$0xff] }
 0x285   :  { %2313 = vmatprep.mubr.bf16.mxu0 %v4366_v39  ;;  %v2053_v10 = vpack.c.bf16 %v2016_v9, %v2015_v8 }
 0x28c   :  { %3670 = vmatmul.mubr.msk.bf16.gmra.mrb[40].mxu0 %vm94_vm0, %v2037_v14  ;;  %v4846_v14 = vrot.slane %v2060_v12, %v2064_v11 }
 0x28d   :  { %2323 = vmatprep.mubr.bf16.mxu0 %v4366_v39 }
 0x294   :  { %3671 = vmatmul.mubr.msk.bf16.gmra.mrb[44].mxu0 %vm94_vm0, %v2038_v18 }
 0x295   :  { %2333 = vmatprep.mubr.bf16.mxu0 %v4366_v39 }
 0x29c   :  { %3672 = vmatmul.mubr.msk.bf16.gmra.mrb[48].mxu0 %vm94_vm0, %v2039_v23 }
 0x29d   :  { %2343 = vmatprep.mubr.bf16.mxu0 %v4366_v39 }
 0x2a4   :  { %3673 = vmatmul.mubr.msk.bf16.gmra.mrb[52].mxu0 %vm94_vm0, %v2040_v28 }
 0x2a5   :  { %2353 = vmatprep.mubr.bf16.mxu0 %v4366_v39 }
 0x2ac   :  { %3674 = vmatmul.mubr.msk.bf16.gmra.mrb[56].mxu0 %vm94_vm0, %v2041_v33 }
 0x2ad   :  { %2363 = vmatprep.mubr.bf16.mxu0 %v4366_v39 }
 0x2b4   :  { %3675 = vmatmul.mubr.msk.bf16.gmra.mrb[60].mxu0 %vm94_vm0, %v2042_v38  ;;  %v2055_v38 = vpack.c.bf16 %v2020_v32, %v2019_v31 }
 0x2b5   :  { %2373 = vmatprep.mubr.bf16.mxu0 %v4366_v39 }
 0x2bc   :  { %3676 = vmatmul.mubr.msk.bf16.gmra.mrb[64].mxu0 %vm94_vm0, %v2043_v42 }
 0x2bd   :  { %2383 = vmatprep.mubr.bf16.mxu0 %v4366_v39 }
 0x2c4   :  { %3677 = vmatmul.mubr.msk.bf16.gmra.mrb[68].mxu0 %vm94_vm0, %v2044_v45 }
 0x2c5   :  { %2393 = vmatprep.mubr.bf16.mxu0 %v4366_v39 }
 0x2cc   :  { %3678 = vmatmul.mubr.msk.bf16.gmra.mrb[72].mxu0 %vm94_vm0, %v2045_v48 }
 0x2cd   :  { %2403 = vmatprep.mubr.bf16.mxu0 %v4366_v39 }
 0x2d4   :  { %3679 = vmatmul.mubr.msk.bf16.gmra.mrb[76].mxu0 %vm94_vm0, %v2046_v51 }
 0x2d5   :  { %2413 = vmatprep.mubr.bf16.mxu0 %v4366_v39 }
 0x2dc   :  { %3680 = vmatmul.mubr.msk.bf16.gmra.mrb[80].mxu0 %vm94_vm0, %v2047_v54 }
 0x2dd   :  { %2423 = vmatprep.mubr.bf16.mxu0 %v4366_v39 }
 0x2e4   :  { %3681 = vmatmul.mubr.msk.bf16.gmra.mrb[84].mxu0 %vm94_vm0, %v2048_v57 }
 0x2e5   :  { %2433 = vmatprep.mubr.bf16.mxu0 %v4366_v39 }
 0x2ec   :  { %3682 = vmatmul.mubr.msk.bf16.gmra.mrb[88].mxu0 %vm94_vm0, %v2049_v60 }
 0x2ed   :  { %2443 = vmatprep.mubr.bf16.mxu0 %v4366_v39 }
 0x2f4   :  { %3683 = vmatmul.mubr.msk.bf16.gmra.mrb[92].mxu0 %vm94_vm0, %v2050_v63 }
 0x2f5   :  { %2453 = vmatprep.mubr.bf16.mxu0 %v4366_v39 }
 0x2fc   :  { %3684 = vmatmul.mubr.msk.bf16.gmra.mrb[96].mxu0 %vm94_vm0, %v2051_v2  ;;  %v2023_v2 = vld [vmem:[#allocation2 + $0x1e0] sm:$0xff] }
 0x2fd   :  { %2463 = vmatprep.mubr.bf16.mxu0 %v4366_v39  ;;  %v2057_v9 = vpack.c.bf16 %v2024_v3, %v2023_v2 }
 0x304   :  { %3685 = vmatmul.mubr.msk.bf16.gmra.mrb[100].mxu0 %vm94_vm0, %v2052_v5 }
 0x305   :  { %2473 = vmatprep.mubr.bf16.mxu0 %v4366_v39 }
 0x30c   :  { %3686 = vmatmul.mubr.msk.bf16.gmra.mrb[104].mxu0 %vm94_vm0, %v2053_v10 }
 0x30d   :  { %2483 = vmatprep.mubr.bf16.mxu0 %v4366_v39 }
 0x30f   :  { %v2215_v18 = vpop.f32.mrb[0].mxu0 }
 0x310   :  { %v2216_v19 = vadd.f32 %v2215_v18, %v4846_v14  ;;  %v2217_v20 = vpop.f32.mrb[1].mxu0 }
 0x311   :  { %v2218_v22 = vadd.f32 %v2217_v20, %v4848_v15  ;;  %v2219_v23 = vpop.f32.mrb[2].mxu0 }
 0x312   :  { %v2220_v24 = vadd.f32 %v2219_v23, %v4846_v14  ;;  %v2221_v25 = vpop.f32.mrb[3].mxu0  ;;  %v2534_v27 = vmax.f32 %v2216_v19, 0.0 }
 0x313   :  { %v2222_v26 = vadd.f32 %v2221_v25, %v4848_v15  ;;  %v2535_v29 = vmax.f32 %v2218_v22, 0.0  ;;  %v2026_v22 = vld [vmem:[#allocation2 + $0x1f8] sm:$0xff] }
 0x314   :  { %v2536_v28 = vmax.f32 %v2220_v24, 0.0  ;;  %3687 = vmatmul.mubr.msk.bf16.gmra.mrb[108].mxu0 %vm94_vm0, %v2054_v21  ;;  %v2025_v21 = vld [vmem:[#allocation2 + $0x1f0] sm:$0xff] }
 0x315   :  { %v2537_v30 = vmax.f32 %v2222_v26, 0.0  ;;  %2493 = vmatprep.mubr.bf16.mxu0 %v4366_v39 }
 0x316   :  { %v4857_v33 = vpack.c.bf16 %v2536_v28, %v2534_v27  ;;  %v2058_v28 = vpack.c.bf16 %v2026_v22, %v2025_v21 }
 0x317   :  { %v4859_v34 = vpack.c.bf16 %v2537_v30, %v2535_v29  ;;  %v2225_v35 = vpop.f32.mrb[4].mxu0 }
 0x318   :  { %v2226_v36 = vadd.f32 %v2225_v35, %v4846_v14  ;;  %v2227_v37 = vpop.f32.mrb[5].mxu0 }
 0x319   :  { %v2228_v40 = vadd.f32 %v2227_v37, %v4848_v15  ;;  %v2229_v41 = vpop.f32.mrb[6].mxu0 }
 0x31a   :  { %v2230_v42 = vadd.f32 %v2229_v41, %v4846_v14  ;;  %v2231_v43 = vpop.f32.mrb[7].mxu0  ;;  %v2538_v45 = vmax.f32 %v2226_v36, 0.0 }
 0x31b   :  { %v2232_v44 = vadd.f32 %v2231_v43, %v4848_v15  ;;  %v2539_v47 = vmax.f32 %v2228_v40, 0.0 }
 0x31c   :  { %v2540_v46 = vmax.f32 %v2230_v42, 0.0  ;;  %3688 = vmatmul.mubr.msk.bf16.gmra.mrb[112].mxu0 %vm94_vm0, %v2055_v38 }
 0x31d   :  { %v2541_v48 = vmax.f32 %v2232_v44, 0.0  ;;  %2503 = vmatprep.mubr.bf16.mxu0 %v4366_v39 }
 0x31e   :  { %v4867_v51 = vpack.c.bf16 %v2540_v46, %v2538_v45 }
 0x31f   :  { %v4869_v52 = vpack.c.bf16 %v2541_v48, %v2539_v47  ;;  %v2235_v53 = vpop.f32.mrb[8].mxu0 }
 0x320   :  { %v2236_v54 = vadd.f32 %v2235_v53, %v4846_v14  ;;  %v2237_v55 = vpop.f32.mrb[9].mxu0 }
 0x321   :  { %v2238_v57 = vadd.f32 %v2237_v55, %v4848_v15  ;;  %v2239_v58 = vpop.f32.mrb[10].mxu0 }
 0x322   :  { %v2240_v59 = vadd.f32 %v2239_v58, %v4846_v14  ;;  %v2241_v60 = vpop.f32.mrb[11].mxu0  ;;  %v2542_v62 = vmax.f32 %v2236_v54, 0.0 }
 0x323   :  { %v2242_v61 = vadd.f32 %v2241_v60, %v4848_v15  ;;  %v2543_v0 = vmax.f32 %v2238_v57, 0.0 }
 0x324   :  { %v2544_v63 = vmax.f32 %v2240_v59, 0.0  ;;  %3689 = vmatmul.mubr.msk.bf16.gmra.mrb[116].mxu0 %vm94_vm0, %v2056_v56 }
 0x325   :  { %v2545_v1 = vmax.f32 %v2242_v61, 0.0  ;;  %2513 = vmatprep.mubr.bf16.mxu0 %v4366_v39 }
 0x326   :  { %v4877_v4 = vpack.c.bf16 %v2544_v63, %v2542_v62 }
 0x327   :  { %v4879_v5 = vpack.c.bf16 %v2545_v1, %v2543_v0  ;;  %v2245_v6 = vpop.f32.mrb[12].mxu0 }
 0x328   :  { %v2246_v7 = vadd.f32 %v2245_v6, %v4846_v14  ;;  %v2247_v8 = vpop.f32.mrb[13].mxu0 }
 0x329   :  { %v2248_v10 = vadd.f32 %v2247_v8, %v4848_v15  ;;  %v2249_v11 = vpop.f32.mrb[14].mxu0 }
 0x32a   :  { %v2250_v12 = vadd.f32 %v2249_v11, %v4846_v14  ;;  %v2251_v13 = vpop.f32.mrb[15].mxu0  ;;  %v2546_v17 = vmax.f32 %v2246_v7, 0.0 }
 0x32b   :  { %v2252_v16 = vadd.f32 %v2251_v13, %v4848_v15  ;;  %v2547_v19 = vmax.f32 %v2248_v10, 0.0 }
 0x32c   :  { %v2548_v18 = vmax.f32 %v2250_v12, 0.0  ;;  %3690 = vmatmul.mubr.msk.bf16.gmra.mrb[120].mxu0 %vm94_vm0, %v2057_v9 }
 0x32d   :  { %v2549_v20 = vmax.f32 %v2252_v16, 0.0  ;;  %2523 = vmatprep.mubr.bf16.mxu0 %v4366_v39 }
 0x32e   :  { %v2668_v23 = vpack.c.bf16 %v2548_v18, %v2546_v17 }
 0x32f   :  { %v2255_v24 = vpop.f32.mrb[16].mxu0  ;;  %v2669_v25 = vpack.c.bf16 %v2549_v20, %v2547_v19 }
 0x330   :  { %v2256_v26 = vadd.f32 %v2255_v24, %v4846_v14  ;;  %v2257_v27 = vpop.f32.mrb[17].mxu0 }
 0x331   :  { %v2258_v29 = vadd.f32 %v2257_v27, %v4848_v15  ;;  %v2259_v30 = vpop.f32.mrb[18].mxu0  ;;  %2910 = vmatprep.mubr.bf16.mxu1 %v2669_v25 }
 0x332   :  { %v2260_v31 = vadd.f32 %v2259_v30, %v4846_v14  ;;  %v2261_v32 = vpop.f32.mrb[19].mxu0  ;;  %2911 = vmatmul.mubr.bf16.vlgmr.msra.gmra.mrb[0].mxu1 %v2668_v23  ;;  %v2550_v39 = vmax.f32 %v2256_v26, 0.0 }
 0x333   :  { %v2262_v35 = vadd.f32 %v2261_v32, %v4848_v15  ;;  %v2551_v37 = vmax.f32 %v2258_v29, 0.0 }
 0x334   :  { %v2552_v36 = vmax.f32 %v2260_v31, 0.0  ;;  %3691 = vmatmul.mubr.msk.bf16.gmra.mrb[124].mxu0 %vm94_vm0, %v2058_v28 }
 0x335   :  { %v2553_v38 = vmax.f32 %v2262_v35, 0.0  ;;  %2886 = vmatprep.mubr.bf16.mxu0 %v4859_v34 }
 0x336   :  { %v2670_v40 = vpack.c.bf16 %v2552_v36, %v2550_v39 }
 0x337   :  { %v2671_v41 = vpack.c.bf16 %v2553_v38, %v2551_v37  ;;  %v2265_v42 = vpop.f32.mrb[20].mxu0 }
 0x338   :  { %v2266_v43 = vadd.f32 %v2265_v42, %v4846_v14  ;;  %v2267_v44 = vpop.f32.mrb[21].mxu0 }
 0x339   :  { %v2268_v45 = vadd.f32 %v2267_v44, %v4848_v15  ;;  %v2269_v46 = vpop.f32.mrb[22].mxu0  ;;  %2918 = vmatprep.mubr.bf16.mxu1 %v2671_v41 }
 0x33a   :  { %v2270_v47 = vadd.f32 %v2269_v46, %v4846_v14  ;;  %v2271_v48 = vpop.f32.mrb[23].mxu0  ;;  %2919 = vmatmul.mubr.bf16.gmra.mrb[4].mxu1 %v2670_v40  ;;  %v2554_v50 = vmax.f32 %v2266_v43, 0.0 }
 0x33b   :  { %v2272_v49 = vadd.f32 %v2271_v48, %v4848_v15  ;;  %v2555_v34 = vmax.f32 %v2268_v45, 0.0 }
 0x33c   :  { %v2556_v53 = vmax.f32 %v2270_v47, 0.0  ;;  %2887 = vmatmul.mubr.bf16.vlgmr.msra.gmra.mrb[128].mxu0 %v4857_v33 }
 0x33d   :  { %v2557_v54 = vmax.f32 %v2272_v49, 0.0  ;;  %2894 = vmatprep.mubr.bf16.mxu0 %v4869_v52 }
 0x33e   :  { %v2672_v55 = vpack.c.bf16 %v2556_v53, %v2554_v50 }
 0x33f   :  { %v2673_v56 = vpack.c.bf16 %v2557_v54, %v2555_v34  ;;  %v2275_v57 = vpop.f32.mrb[24].mxu0 }
 0x340   :  { %v2276_v58 = vadd.f32 %v2275_v57, %v4846_v14  ;;  %v2277_v59 = vpop.f32.mrb[25].mxu0 }
 0x341   :  { %v2278_v60 = vadd.f32 %v2277_v59, %v4848_v15  ;;  %v2279_v61 = vpop.f32.mrb[26].mxu0  ;;  %2926 = vmatprep.mubr.bf16.mxu1 %v2673_v56 }
 0x342   :  { %v2280_v62 = vadd.f32 %v2279_v61, %v4846_v14  ;;  %v2281_v63 = vpop.f32.mrb[27].mxu0  ;;  %2927 = vmatmul.mubr.bf16.gmra.mrb[8].mxu1 %v2672_v55  ;;  %v2558_v0 = vmax.f32 %v2276_v58, 0.0 }
 0x343   :  { %v2282_v33 = vadd.f32 %v2281_v63, %v4848_v15  ;;  %v2559_v52 = vmax.f32 %v2278_v60, 0.0 }
 0x344   :  { %v2560_v1 = vmax.f32 %v2280_v62, 0.0  ;;  %2895 = vmatmul.mubr.bf16.gmra.mrb[132].mxu0 %v4867_v51 }
 0x345   :  { %v2561_v2 = vmax.f32 %v2282_v33, 0.0  ;;  %2902 = vmatprep.mubr.bf16.mxu0 %v4879_v5 }
 0x346   :  { %v2674_v3 = vpack.c.bf16 %v2560_v1, %v2558_v0 }
 0x347   :  { %v2675_v6 = vpack.c.bf16 %v2561_v2, %v2559_v52  ;;  %v2285_v7 = vpop.f32.mrb[28].mxu0 }
 0x348   :  { %v2286_v8 = vadd.f32 %v2285_v7, %v4846_v14  ;;  %v2287_v9 = vpop.f32.mrb[29].mxu0 }
 0x349   :  { %v2288_v10 = vadd.f32 %v2287_v9, %v4848_v15  ;;  %v2289_v11 = vpop.f32.mrb[30].mxu0  ;;  %2934 = vmatprep.mubr.bf16.mxu1 %v2675_v6 }
 0x34a   :  { %v2290_v12 = vadd.f32 %v2289_v11, %v4846_v14  ;;  %v2291_v13 = vpop.f32.mrb[31].mxu0  ;;  %2935 = vmatmul.mubr.bf16.gmra.mrb[12].mxu1 %v2674_v3  ;;  %v2562_v16 = vmax.f32 %v2286_v8, 0.0 }
 0x34b   :  { %v2292_v51 = vadd.f32 %v2291_v13, %v4848_v15  ;;  %v2563_v5 = vmax.f32 %v2288_v10, 0.0 }
 0x34c   :  { %v2564_v17 = vmax.f32 %v2290_v12, 0.0  ;;  %2903 = vmatmul.mubr.bf16.gmra.mrb[136].mxu0 %v4877_v4 }
 0x34d   :  { %v2565_v18 = vmax.f32 %v2292_v51, 0.0 }
 0x34e   :  { %v2676_v19 = vpack.c.bf16 %v2564_v17, %v2562_v16 }
 0x34f   :  { %v2677_v20 = vpack.c.bf16 %v2565_v18, %v2563_v5  ;;  %v2295_v21 = vpop.f32.mrb[32].mxu0 }
 0x350   :  { %v2296_v22 = vadd.f32 %v2295_v21, %v4846_v14  ;;  %v2297_v23 = vpop.f32.mrb[33].mxu0 }
 0x351   :  { %v2298_v24 = vadd.f32 %v2297_v23, %v4848_v15  ;;  %v2299_v25 = vpop.f32.mrb[34].mxu0  ;;  %2942 = vmatprep.mubr.bf16.mxu1 %v2677_v20 }
 0x352   :  { %v2300_v26 = vadd.f32 %v2299_v25, %v4846_v14  ;;  %v2301_v27 = vpop.f32.mrb[35].mxu0  ;;  %2943 = vmatmul.mubr.bf16.gmra.mrb[16].mxu1 %v2676_v19  ;;  %v2566_v29 = vmax.f32 %v2296_v22, 0.0 }
 0x353   :  { %v2302_v28 = vadd.f32 %v2301_v27, %v4848_v15  ;;  %v2567_v30 = vmax.f32 %v2298_v24, 0.0 }
 0x354   :  { %v2568_v4 = vmax.f32 %v2300_v26, 0.0 }
 0x355   :  { %v2569_v31 = vmax.f32 %v2302_v28, 0.0 }
 0x356   :  { %v2678_v32 = vpack.c.bf16 %v2568_v4, %v2566_v29 }
 0x357   :  { %v2679_v35 = vpack.c.bf16 %v2569_v31, %v2567_v30  ;;  %v2305_v39 = vpop.f32.mrb[36].mxu0 }
 0x358   :  { %v2306_v36 = vadd.f32 %v2305_v39, %v4846_v14  ;;  %v2307_v37 = vpop.f32.mrb[37].mxu0 }
 0x359   :  { %v2308_v38 = vadd.f32 %v2307_v37, %v4848_v15  ;;  %v2309_v40 = vpop.f32.mrb[38].mxu0  ;;  %2950 = vmatprep.mubr.bf16.mxu1 %v2679_v35 }
 0x35a   :  { %v2310_v41 = vadd.f32 %v2309_v40, %v4846_v14  ;;  %v2311_v42 = vpop.f32.mrb[39].mxu0  ;;  %2951 = vmatmul.mubr.bf16.gmra.mrb[20].mxu1 %v2678_v32  ;;  %v2570_v44 = vmax.f32 %v2306_v36, 0.0 }
 0x35b   :  { %v2312_v43 = vadd.f32 %v2311_v42, %v4848_v15  ;;  %v2571_v46 = vmax.f32 %v2308_v38, 0.0 }
 0x35c   :  { %v2572_v45 = vmax.f32 %v2310_v41, 0.0 }
 0x35d   :  { %v2573_v47 = vmax.f32 %v2312_v43, 0.0 }
 0x35e   :  { %v2680_v48 = vpack.c.bf16 %v2572_v45, %v2570_v44 }
 0x35f   :  { %v2681_v49 = vpack.c.bf16 %v2573_v47, %v2571_v46  ;;  %v2315_v50 = vpop.f32.mrb[40].mxu0 }
 0x360   :  { %v2316_v53 = vadd.f32 %v2315_v50, %v4846_v14  ;;  %v2317_v34 = vpop.f32.mrb[41].mxu0 }
 0x361   :  { %v2318_v54 = vadd.f32 %v2317_v34, %v4848_v15  ;;  %v2319_v55 = vpop.f32.mrb[42].mxu0  ;;  %2958 = vmatprep.mubr.bf16.mxu1 %v2681_v49 }
 0x362   :  { %v2320_v56 = vadd.f32 %v2319_v55, %v4846_v14  ;;  %v2321_v57 = vpop.f32.mrb[43].mxu0  ;;  %2959 = vmatmul.mubr.bf16.gmra.mrb[24].mxu1 %v2680_v48  ;;  %v2574_v59 = vmax.f32 %v2316_v53, 0.0 }
 0x363   :  { %v2322_v58 = vadd.f32 %v2321_v57, %v4848_v15  ;;  %v2575_v61 = vmax.f32 %v2318_v54, 0.0 }
 0x364   :  { %v2576_v60 = vmax.f32 %v2320_v56, 0.0 }
 0x365   :  { %v2577_v62 = vmax.f32 %v2322_v58, 0.0 }
 0x366   :  { %v2682_v63 = vpack.c.bf16 %v2576_v60, %v2574_v59 }
 0x367   :  { %v2683_v33 = vpack.c.bf16 %v2577_v62, %v2575_v61  ;;  %v2325_v0 = vpop.f32.mrb[44].mxu0 }
 0x368   :  { %v2326_v1 = vadd.f32 %v2325_v0, %v4846_v14  ;;  %v2327_v52 = vpop.f32.mrb[45].mxu0 }
 0x369   :  { %v2328_v2 = vadd.f32 %v2327_v52, %v4848_v15  ;;  %v2329_v3 = vpop.f32.mrb[46].mxu0  ;;  %2966 = vmatprep.mubr.bf16.mxu1 %v2683_v33 }
 0x36a   :  { %v2330_v6 = vadd.f32 %v2329_v3, %v4846_v14  ;;  %v2331_v7 = vpop.f32.mrb[47].mxu0  ;;  %2967 = vmatmul.mubr.bf16.gmra.mrb[28].mxu1 %v2682_v63  ;;  %v2578_v9 = vmax.f32 %v2326_v1, 0.0 }
 0x36b   :  { %v2332_v8 = vadd.f32 %v2331_v7, %v4848_v15  ;;  %v2579_v11 = vmax.f32 %v2328_v2, 0.0 }
 0x36c   :  { %v2580_v10 = vmax.f32 %v2330_v6, 0.0 }
 0x36d   :  { %v2581_v12 = vmax.f32 %v2332_v8, 0.0 }
 0x36e   :  { %v2684_v13 = vpack.c.bf16 %v2580_v10, %v2578_v9 }
 0x36f   :  { %v2685_v51 = vpack.c.bf16 %v2581_v12, %v2579_v11  ;;  %v2335_v16 = vpop.f32.mrb[48].mxu0 }
 0x370   :  { %v2336_v17 = vadd.f32 %v2335_v16, %v4846_v14  ;;  %v2337_v5 = vpop.f32.mrb[49].mxu0 }
 0x371   :  { %v2338_v18 = vadd.f32 %v2337_v5, %v4848_v15  ;;  %v2339_v19 = vpop.f32.mrb[50].mxu0  ;;  %2974 = vmatprep.mubr.bf16.mxu1 %v2685_v51 }
 0x372   :  { %v2340_v20 = vadd.f32 %v2339_v19, %v4846_v14  ;;  %v2341_v21 = vpop.f32.mrb[51].mxu0  ;;  %2975 = vmatmul.mubr.bf16.gmra.mrb[32].mxu1 %v2684_v13  ;;  %v2582_v23 = vmax.f32 %v2336_v17, 0.0 }
 0x373   :  { %v2342_v22 = vadd.f32 %v2341_v21, %v4848_v15  ;;  %v2583_v25 = vmax.f32 %v2338_v18, 0.0 }
 0x374   :  { %v2584_v24 = vmax.f32 %v2340_v20, 0.0 }
 0x375   :  { %v2585_v26 = vmax.f32 %v2342_v22, 0.0 }
 0x376   :  { %v2686_v27 = vpack.c.bf16 %v2584_v24, %v2582_v23 }
 0x377   :  { %v2687_v28 = vpack.c.bf16 %v2585_v26, %v2583_v25  ;;  %v2345_v29 = vpop.f32.mrb[52].mxu0 }
 0x378   :  { %v2346_v4 = vadd.f32 %v2345_v29, %v4846_v14  ;;  %v2347_v30 = vpop.f32.mrb[53].mxu0 }
 0x379   :  { %v2348_v31 = vadd.f32 %v2347_v30, %v4848_v15  ;;  %v2349_v32 = vpop.f32.mrb[54].mxu0  ;;  %2982 = vmatprep.mubr.bf16.mxu1 %v2687_v28 }
 0x37a   :  { %v2350_v35 = vadd.f32 %v2349_v32, %v4846_v14  ;;  %v2351_v39 = vpop.f32.mrb[55].mxu0  ;;  %2983 = vmatmul.mubr.bf16.gmra.mrb[36].mxu1 %v2686_v27  ;;  %v2586_v37 = vmax.f32 %v2346_v4, 0.0 }
 0x37b   :  { %v2352_v36 = vadd.f32 %v2351_v39, %v4848_v15  ;;  %v2587_v40 = vmax.f32 %v2348_v31, 0.0 }
 0x37c   :  { %v2588_v38 = vmax.f32 %v2350_v35, 0.0 }
 0x37d   :  { %v2589_v41 = vmax.f32 %v2352_v36, 0.0 }
 0x37e   :  { %v2688_v42 = vpack.c.bf16 %v2588_v38, %v2586_v37 }
 0x37f   :  { %v2689_v43 = vpack.c.bf16 %v2589_v41, %v2587_v40  ;;  %v2355_v44 = vpop.f32.mrb[56].mxu0 }
 0x380   :  { %v2356_v45 = vadd.f32 %v2355_v44, %v4846_v14  ;;  %v2357_v46 = vpop.f32.mrb[57].mxu0 }
 0x381   :  { %v2358_v47 = vadd.f32 %v2357_v46, %v4848_v15  ;;  %v2359_v48 = vpop.f32.mrb[58].mxu0  ;;  %2990 = vmatprep.mubr.bf16.mxu1 %v2689_v43 }
 0x382   :  { %v2360_v49 = vadd.f32 %v2359_v48, %v4846_v14  ;;  %v2361_v50 = vpop.f32.mrb[59].mxu0  ;;  %2991 = vmatmul.mubr.bf16.gmra.mrb[40].mxu1 %v2688_v42  ;;  %v2590_v34 = vmax.f32 %v2356_v45, 0.0 }
 0x383   :  { %v2362_v53 = vadd.f32 %v2361_v50, %v4848_v15  ;;  %v2591_v55 = vmax.f32 %v2358_v47, 0.0 }
 0x384   :  { %v2592_v54 = vmax.f32 %v2360_v49, 0.0 }
 0x385   :  { %v2593_v56 = vmax.f32 %v2362_v53, 0.0 }
 0x386   :  { %v2690_v57 = vpack.c.bf16 %v2592_v54, %v2590_v34 }
 0x387   :  { %v2691_v58 = vpack.c.bf16 %v2593_v56, %v2591_v55  ;;  %v2365_v59 = vpop.f32.mrb[60].mxu0 }
 0x388   :  { %v2366_v60 = vadd.f32 %v2365_v59, %v4846_v14  ;;  %v2367_v61 = vpop.f32.mrb[61].mxu0 }
 0x389   :  { %v2368_v62 = vadd.f32 %v2367_v61, %v4848_v15  ;;  %v2369_v63 = vpop.f32.mrb[62].mxu0  ;;  %2998 = vmatprep.mubr.bf16.mxu1 %v2691_v58 }
 0x38a   :  { %v2370_v33 = vadd.f32 %v2369_v63, %v4846_v14  ;;  %v2371_v0 = vpop.f32.mrb[63].mxu0  ;;  %2999 = vmatmul.mubr.bf16.gmra.mrb[44].mxu1 %v2690_v57  ;;  %v2594_v52 = vmax.f32 %v2366_v60, 0.0 }
 0x38b   :  { %v2372_v1 = vadd.f32 %v2371_v0, %v4848_v15  ;;  %v2595_v3 = vmax.f32 %v2368_v62, 0.0 }
 0x38c   :  { %v2596_v2 = vmax.f32 %v2370_v33, 0.0 }
 0x38d   :  { %v2597_v6 = vmax.f32 %v2372_v1, 0.0 }
 0x38e   :  { %v2692_v7 = vpack.c.bf16 %v2596_v2, %v2594_v52 }
 0x38f   :  { %v2693_v8 = vpack.c.bf16 %v2597_v6, %v2595_v3  ;;  %v2375_v9 = vpop.f32.mrb[64].mxu0 }
 0x390   :  { %v2376_v10 = vadd.f32 %v2375_v9, %v4846_v14  ;;  %v2377_v11 = vpop.f32.mrb[65].mxu0 }
 0x391   :  { %v2378_v12 = vadd.f32 %v2377_v11, %v4848_v15  ;;  %v2379_v13 = vpop.f32.mrb[66].mxu0  ;;  %3006 = vmatprep.mubr.bf16.mxu1 %v2693_v8 }
 0x392   :  { %v2380_v51 = vadd.f32 %v2379_v13, %v4846_v14  ;;  %v2381_v16 = vpop.f32.mrb[67].mxu0  ;;  %3007 = vmatmul.mubr.bf16.gmra.mrb[48].mxu1 %v2692_v7  ;;  %v2598_v5 = vmax.f32 %v2376_v10, 0.0 }
 0x393   :  { %v2382_v17 = vadd.f32 %v2381_v16, %v4848_v15  ;;  %v2599_v19 = vmax.f32 %v2378_v12, 0.0 }
 0x394   :  { %v2600_v18 = vmax.f32 %v2380_v51, 0.0 }
 0x395   :  { %v2601_v20 = vmax.f32 %v2382_v17, 0.0 }
 0x396   :  { %v2694_v21 = vpack.c.bf16 %v2600_v18, %v2598_v5 }
 0x397   :  { %v2695_v22 = vpack.c.bf16 %v2601_v20, %v2599_v19  ;;  %v2385_v23 = vpop.f32.mrb[68].mxu0 }
 0x398   :  { %v2386_v24 = vadd.f32 %v2385_v23, %v4846_v14  ;;  %v2387_v25 = vpop.f32.mrb[69].mxu0 }
 0x399   :  { %v2388_v26 = vadd.f32 %v2387_v25, %v4848_v15  ;;  %v2389_v27 = vpop.f32.mrb[70].mxu0  ;;  %3014 = vmatprep.mubr.bf16.mxu1 %v2695_v22 }
 0x39a   :  { %v2390_v28 = vadd.f32 %v2389_v27, %v4846_v14  ;;  %v2391_v29 = vpop.f32.mrb[71].mxu0  ;;  %3015 = vmatmul.mubr.bf16.gmra.mrb[52].mxu1 %v2694_v21  ;;  %v2602_v30 = vmax.f32 %v2386_v24, 0.0 }
 0x39b   :  { %v2392_v4 = vadd.f32 %v2391_v29, %v4848_v15  ;;  %v2603_v32 = vmax.f32 %v2388_v26, 0.0 }
 0x39c   :  { %v2604_v31 = vmax.f32 %v2390_v28, 0.0 }
 0x39d   :  { %v2605_v35 = vmax.f32 %v2392_v4, 0.0 }
 0x39e   :  { %v2696_v39 = vpack.c.bf16 %v2604_v31, %v2602_v30 }
 0x39f   :  { %v2697_v36 = vpack.c.bf16 %v2605_v35, %v2603_v32  ;;  %v2395_v37 = vpop.f32.mrb[72].mxu0 }
 0x3a0   :  { %v2396_v38 = vadd.f32 %v2395_v37, %v4846_v14  ;;  %v2397_v40 = vpop.f32.mrb[73].mxu0 }
 0x3a1   :  { %v2398_v41 = vadd.f32 %v2397_v40, %v4848_v15  ;;  %v2399_v42 = vpop.f32.mrb[74].mxu0  ;;  %3022 = vmatprep.mubr.bf16.mxu1 %v2697_v36 }
 0x3a2   :  { %v2400_v43 = vadd.f32 %v2399_v42, %v4846_v14  ;;  %v2401_v44 = vpop.f32.mrb[75].mxu0  ;;  %3023 = vmatmul.mubr.bf16.gmra.mrb[56].mxu1 %v2696_v39  ;;  %v2606_v46 = vmax.f32 %v2396_v38, 0.0 }
 0x3a3   :  { %v2402_v45 = vadd.f32 %v2401_v44, %v4848_v15  ;;  %v2607_v48 = vmax.f32 %v2398_v41, 0.0 }
 0x3a4   :  { %v2608_v47 = vmax.f32 %v2400_v43, 0.0 }
 0x3a5   :  { %v2609_v49 = vmax.f32 %v2402_v45, 0.0 }
 0x3a6   :  { %v2698_v50 = vpack.c.bf16 %v2608_v47, %v2606_v46 }
 0x3a7   :  { %v2699_v53 = vpack.c.bf16 %v2609_v49, %v2607_v48  ;;  %v2405_v34 = vpop.f32.mrb[76].mxu0 }
 0x3a8   :  { %v2406_v54 = vadd.f32 %v2405_v34, %v4846_v14  ;;  %v2407_v55 = vpop.f32.mrb[77].mxu0 }
 0x3a9   :  { %v2408_v56 = vadd.f32 %v2407_v55, %v4848_v15  ;;  %v2409_v57 = vpop.f32.mrb[78].mxu0  ;;  %3030 = vmatprep.mubr.bf16.mxu1 %v2699_v53 }
 0x3aa   :  { %v2410_v58 = vadd.f32 %v2409_v57, %v4846_v14  ;;  %v2411_v59 = vpop.f32.mrb[79].mxu0  ;;  %3031 = vmatmul.mubr.bf16.gmra.mrb[60].mxu1 %v2698_v50  ;;  %v2610_v61 = vmax.f32 %v2406_v54, 0.0 }
 0x3ab   :  { %v2412_v60 = vadd.f32 %v2411_v59, %v4848_v15  ;;  %v2611_v63 = vmax.f32 %v2408_v56, 0.0 }
 0x3ac   :  { %v2612_v62 = vmax.f32 %v2410_v58, 0.0 }
 0x3ad   :  { %v2613_v33 = vmax.f32 %v2412_v60, 0.0 }
 0x3ae   :  { %v2700_v0 = vpack.c.bf16 %v2612_v62, %v2610_v61 }
 0x3af   :  { %v2701_v1 = vpack.c.bf16 %v2613_v33, %v2611_v63  ;;  %v2415_v52 = vpop.f32.mrb[80].mxu0 }
 0x3b0   :  { %v2416_v2 = vadd.f32 %v2415_v52, %v4846_v14  ;;  %v2417_v3 = vpop.f32.mrb[81].mxu0 }
 0x3b1   :  { %v2418_v6 = vadd.f32 %v2417_v3, %v4848_v15  ;;  %v2419_v7 = vpop.f32.mrb[82].mxu0  ;;  %3038 = vmatprep.mubr.bf16.mxu1 %v2701_v1 }
 0x3b2   :  { %v2420_v8 = vadd.f32 %v2419_v7, %v4846_v14  ;;  %v2421_v9 = vpop.f32.mrb[83].mxu0  ;;  %3039 = vmatmul.mubr.bf16.gmra.mrb[64].mxu1 %v2700_v0  ;;  %v2614_v11 = vmax.f32 %v2416_v2, 0.0 }
 0x3b3   :  { %v2422_v10 = vadd.f32 %v2421_v9, %v4848_v15  ;;  %v2615_v13 = vmax.f32 %v2418_v6, 0.0 }
 0x3b4   :  { %v2616_v12 = vmax.f32 %v2420_v8, 0.0 }
 0x3b5   :  { %v2617_v51 = vmax.f32 %v2422_v10, 0.0 }
 0x3b6   :  { %v2702_v16 = vpack.c.bf16 %v2616_v12, %v2614_v11 }
 0x3b7   :  { %v2703_v17 = vpack.c.bf16 %v2617_v51, %v2615_v13  ;;  %v2425_v5 = vpop.f32.mrb[84].mxu0 }
 0x3b8   :  { %v2426_v18 = vadd.f32 %v2425_v5, %v4846_v14  ;;  %v2427_v19 = vpop.f32.mrb[85].mxu0 }
 0x3b9   :  { %v2428_v20 = vadd.f32 %v2427_v19, %v4848_v15  ;;  %v2429_v21 = vpop.f32.mrb[86].mxu0  ;;  %3046 = vmatprep.mubr.bf16.mxu1 %v2703_v17 }
 0x3ba   :  { %v2430_v22 = vadd.f32 %v2429_v21, %v4846_v14  ;;  %v2431_v23 = vpop.f32.mrb[87].mxu0  ;;  %3047 = vmatmul.mubr.bf16.gmra.mrb[68].mxu1 %v2702_v16  ;;  %v2618_v25 = vmax.f32 %v2426_v18, 0.0 }
 0x3bb   :  { %v2432_v24 = vadd.f32 %v2431_v23, %v4848_v15  ;;  %v2619_v27 = vmax.f32 %v2428_v20, 0.0 }
 0x3bc   :  { %v2620_v26 = vmax.f32 %v2430_v22, 0.0 }
 0x3bd   :  { %v2621_v28 = vmax.f32 %v2432_v24, 0.0 }
 0x3be   :  { %v2704_v29 = vpack.c.bf16 %v2620_v26, %v2618_v25 }
 0x3bf   :  { %v2705_v4 = vpack.c.bf16 %v2621_v28, %v2619_v27  ;;  %v2435_v30 = vpop.f32.mrb[88].mxu0 }
 0x3c0   :  { %v2436_v31 = vadd.f32 %v2435_v30, %v4846_v14  ;;  %v2437_v32 = vpop.f32.mrb[89].mxu0 }
 0x3c1   :  { %v2438_v35 = vadd.f32 %v2437_v32, %v4848_v15  ;;  %v2439_v39 = vpop.f32.mrb[90].mxu0  ;;  %3054 = vmatprep.mubr.bf16.mxu1 %v2705_v4 }
 0x3c2   :  { %v2440_v36 = vadd.f32 %v2439_v39, %v4846_v14  ;;  %v2441_v37 = vpop.f32.mrb[91].mxu0  ;;  %3055 = vmatmul.mubr.bf16.gmra.mrb[72].mxu1 %v2704_v29  ;;  %v2622_v40 = vmax.f32 %v2436_v31, 0.0 }
 0x3c3   :  { %v2442_v38 = vadd.f32 %v2441_v37, %v4848_v15  ;;  %v2623_v42 = vmax.f32 %v2438_v35, 0.0 }
 0x3c4   :  { %v2624_v41 = vmax.f32 %v2440_v36, 0.0 }
 0x3c5   :  { %v2625_v43 = vmax.f32 %v2442_v38, 0.0 }
 0x3c6   :  { %v2706_v44 = vpack.c.bf16 %v2624_v41, %v2622_v40 }
 0x3c7   :  { %v2707_v45 = vpack.c.bf16 %v2625_v43, %v2623_v42  ;;  %v2445_v46 = vpop.f32.mrb[92].mxu0 }
 0x3c8   :  { %v2446_v47 = vadd.f32 %v2445_v46, %v4846_v14  ;;  %v2447_v48 = vpop.f32.mrb[93].mxu0 }
 0x3c9   :  { %v2448_v49 = vadd.f32 %v2447_v48, %v4848_v15  ;;  %v2449_v50 = vpop.f32.mrb[94].mxu0  ;;  %3062 = vmatprep.mubr.bf16.mxu1 %v2707_v45 }
 0x3ca   :  { %v2450_v53 = vadd.f32 %v2449_v50, %v4846_v14  ;;  %v2451_v34 = vpop.f32.mrb[95].mxu0  ;;  %3063 = vmatmul.mubr.bf16.gmra.mrb[76].mxu1 %v2706_v44  ;;  %v2626_v55 = vmax.f32 %v2446_v47, 0.0 }
 0x3cb   :  { %v2452_v54 = vadd.f32 %v2451_v34, %v4848_v15  ;;  %v2627_v57 = vmax.f32 %v2448_v49, 0.0 }
 0x3cc   :  { %v2628_v56 = vmax.f32 %v2450_v53, 0.0 }
 0x3cd   :  { %v2629_v58 = vmax.f32 %v2452_v54, 0.0 }
 0x3ce   :  { %v2708_v59 = vpack.c.bf16 %v2628_v56, %v2626_v55 }
 0x3cf   :  { %v2709_v60 = vpack.c.bf16 %v2629_v58, %v2627_v57  ;;  %v2455_v61 = vpop.f32.mrb[96].mxu0 }
 0x3d0   :  { %v2456_v62 = vadd.f32 %v2455_v61, %v4846_v14  ;;  %v2457_v63 = vpop.f32.mrb[97].mxu0 }
 0x3d1   :  { %v2458_v33 = vadd.f32 %v2457_v63, %v4848_v15  ;;  %v2459_v0 = vpop.f32.mrb[98].mxu0  ;;  %3070 = vmatprep.mubr.bf16.mxu1 %v2709_v60 }
 0x3d2   :  { %v2460_v1 = vadd.f32 %v2459_v0, %v4846_v14  ;;  %v2461_v52 = vpop.f32.mrb[99].mxu0  ;;  %3071 = vmatmul.mubr.bf16.gmra.mrb[80].mxu1 %v2708_v59  ;;  %v2630_v3 = vmax.f32 %v2456_v62, 0.0 }
 0x3d3   :  { %v2462_v2 = vadd.f32 %v2461_v52, %v4848_v15  ;;  %v2631_v7 = vmax.f32 %v2458_v33, 0.0 }
 0x3d4   :  { %v2632_v6 = vmax.f32 %v2460_v1, 0.0 }
 0x3d5   :  { %v2633_v8 = vmax.f32 %v2462_v2, 0.0 }
 0x3d6   :  { %v2710_v9 = vpack.c.bf16 %v2632_v6, %v2630_v3 }
 0x3d7   :  { %v2711_v10 = vpack.c.bf16 %v2633_v8, %v2631_v7  ;;  %v2465_v11 = vpop.f32.mrb[100].mxu0 }
 0x3d8   :  { %v2466_v12 = vadd.f32 %v2465_v11, %v4846_v14  ;;  %v2467_v13 = vpop.f32.mrb[101].mxu0 }
 0x3d9   :  { %v2468_v51 = vadd.f32 %v2467_v13, %v4848_v15  ;;  %v2469_v16 = vpop.f32.mrb[102].mxu0  ;;  %3078 = vmatprep.mubr.bf16.mxu1 %v2711_v10 }
 0x3da   :  { %v2470_v17 = vadd.f32 %v2469_v16, %v4846_v14  ;;  %v2471_v5 = vpop.f32.mrb[103].mxu0  ;;  %3079 = vmatmul.mubr.bf16.gmra.mrb[84].mxu1 %v2710_v9  ;;  %v2634_v19 = vmax.f32 %v2466_v12, 0.0 }
 0x3db   :  { %v2472_v18 = vadd.f32 %v2471_v5, %v4848_v15  ;;  %v2635_v21 = vmax.f32 %v2468_v51, 0.0 }
 0x3dc   :  { %v2636_v20 = vmax.f32 %v2470_v17, 0.0 }
 0x3dd   :  { %v2637_v22 = vmax.f32 %v2472_v18, 0.0 }
 0x3de   :  { %v2712_v23 = vpack.c.bf16 %v2636_v20, %v2634_v19 }
 0x3df   :  { %v2713_v24 = vpack.c.bf16 %v2637_v22, %v2635_v21  ;;  %v2475_v25 = vpop.f32.mrb[104].mxu0 }
 0x3e0   :  { %v2476_v26 = vadd.f32 %v2475_v25, %v4846_v14  ;;  %v2477_v27 = vpop.f32.mrb[105].mxu0 }
 0x3e1   :  { %v2478_v28 = vadd.f32 %v2477_v27, %v4848_v15  ;;  %v2479_v29 = vpop.f32.mrb[106].mxu0  ;;  %3086 = vmatprep.mubr.bf16.mxu1 %v2713_v24 }
 0x3e2   :  { %v2480_v4 = vadd.f32 %v2479_v29, %v4846_v14  ;;  %v2481_v30 = vpop.f32.mrb[107].mxu0  ;;  %3087 = vmatmul.mubr.bf16.gmra.mrb[88].mxu1 %v2712_v23  ;;  %v2638_v32 = vmax.f32 %v2476_v26, 0.0 }
 0x3e3   :  { %v2482_v31 = vadd.f32 %v2481_v30, %v4848_v15  ;;  %v2639_v39 = vmax.f32 %v2478_v28, 0.0 }
 0x3e4   :  { %v2640_v35 = vmax.f32 %v2480_v4, 0.0 }
 0x3e5   :  { %v2641_v36 = vmax.f32 %v2482_v31, 0.0 }
 0x3e6   :  { %v2714_v37 = vpack.c.bf16 %v2640_v35, %v2638_v32 }
 0x3e7   :  { %v2715_v38 = vpack.c.bf16 %v2641_v36, %v2639_v39  ;;  %v2485_v40 = vpop.f32.mrb[108].mxu0 }
 0x3e8   :  { %v2486_v41 = vadd.f32 %v2485_v40, %v4846_v14  ;;  %v2487_v42 = vpop.f32.mrb[109].mxu0 }
 0x3e9   :  { %v2488_v43 = vadd.f32 %v2487_v42, %v4848_v15  ;;  %v2489_v44 = vpop.f32.mrb[110].mxu0  ;;  %3094 = vmatprep.mubr.bf16.mxu1 %v2715_v38 }
 0x3ea   :  { %v2490_v45 = vadd.f32 %v2489_v44, %v4846_v14  ;;  %v2491_v46 = vpop.f32.mrb[111].mxu0  ;;  %3095 = vmatmul.mubr.bf16.gmra.mrb[92].mxu1 %v2714_v37  ;;  %v2642_v48 = vmax.f32 %v2486_v41, 0.0 }
 0x3eb   :  { %v2492_v47 = vadd.f32 %v2491_v46, %v4848_v15  ;;  %v2643_v50 = vmax.f32 %v2488_v43, 0.0 }
 0x3ec   :  { %v2644_v49 = vmax.f32 %v2490_v45, 0.0 }
 0x3ed   :  { %v2645_v53 = vmax.f32 %v2492_v47, 0.0 }
 0x3ee   :  { %v2716_v34 = vpack.c.bf16 %v2644_v49, %v2642_v48 }
 0x3ef   :  { %v2717_v54 = vpack.c.bf16 %v2645_v53, %v2643_v50  ;;  %v2495_v55 = vpop.f32.mrb[112].mxu0 }
 0x3f0   :  { %v2496_v56 = vadd.f32 %v2495_v55, %v4846_v14  ;;  %v2497_v57 = vpop.f32.mrb[113].mxu0 }
 0x3f1   :  { %v2498_v58 = vadd.f32 %v2497_v57, %v4848_v15  ;;  %v2499_v59 = vpop.f32.mrb[114].mxu0  ;;  %3102 = vmatprep.mubr.bf16.mxu1 %v2717_v54 }
 0x3f2   :  { %v2500_v60 = vadd.f32 %v2499_v59, %v4846_v14  ;;  %v2501_v61 = vpop.f32.mrb[115].mxu0  ;;  %3103 = vmatmul.mubr.bf16.gmra.mrb[96].mxu1 %v2716_v34  ;;  %v2646_v63 = vmax.f32 %v2496_v56, 0.0 }
 0x3f3   :  { %v2502_v62 = vadd.f32 %v2501_v61, %v4848_v15  ;;  %v2647_v0 = vmax.f32 %v2498_v58, 0.0 }
 0x3f4   :  { %v2648_v33 = vmax.f32 %v2500_v60, 0.0 }
 0x3f5   :  { %v2649_v1 = vmax.f32 %v2502_v62, 0.0 }
 0x3f6   :  { %v2718_v52 = vpack.c.bf16 %v2648_v33, %v2646_v63 }
 0x3f7   :  { %v2719_v2 = vpack.c.bf16 %v2649_v1, %v2647_v0  ;;  %v2505_v3 = vpop.f32.mrb[116].mxu0 }
 0x3f8   :  { %v2506_v6 = vadd.f32 %v2505_v3, %v4846_v14  ;;  %v2507_v7 = vpop.f32.mrb[117].mxu0 }
 0x3f9   :  { %v2508_v8 = vadd.f32 %v2507_v7, %v4848_v15  ;;  %v2509_v9 = vpop.f32.mrb[118].mxu0  ;;  %3110 = vmatprep.mubr.bf16.mxu1 %v2719_v2 }
 0x3fa   :  { %v2510_v10 = vadd.f32 %v2509_v9, %v4846_v14  ;;  %v2511_v11 = vpop.f32.mrb[119].mxu0  ;;  %3111 = vmatmul.mubr.bf16.gmra.mrb[100].mxu1 %v2718_v52  ;;  %v2650_v13 = vmax.f32 %v2506_v6, 0.0 }
 0x3fb   :  { %v2512_v12 = vadd.f32 %v2511_v11, %v4848_v15  ;;  %v2651_v16 = vmax.f32 %v2508_v8, 0.0 }
 0x3fc   :  { %v2652_v51 = vmax.f32 %v2510_v10, 0.0 }
 0x3fd   :  { %v2653_v17 = vmax.f32 %v2512_v12, 0.0 }
 0x3fe   :  { %v2720_v5 = vpack.c.bf16 %v2652_v51, %v2650_v13 }
 0x3ff   :  { %v2721_v18 = vpack.c.bf16 %v2653_v17, %v2651_v16  ;;  %v2515_v19 = vpop.f32.mrb[120].mxu0 }
 0x400   :  { %v2516_v20 = vadd.f32 %v2515_v19, %v4846_v14  ;;  %v2517_v21 = vpop.f32.mrb[121].mxu0 }
 0x401   :  { %v2518_v22 = vadd.f32 %v2517_v21, %v4848_v15  ;;  %v2519_v23 = vpop.f32.mrb[122].mxu0  ;;  %3118 = vmatprep.mubr.bf16.mxu1 %v2721_v18 }
 0x402   :  { %v2520_v24 = vadd.f32 %v2519_v23, %v4846_v14  ;;  %v2521_v25 = vpop.f32.mrb[123].mxu0  ;;  %3119 = vmatmul.mubr.bf16.gmra.mrb[104].mxu1 %v2720_v5  ;;  %v2654_v27 = vmax.f32 %v2516_v20, 0.0 }
 0x403   :  { %v2522_v26 = vadd.f32 %v2521_v25, %v4848_v15  ;;  %v2655_v29 = vmax.f32 %v2518_v22, 0.0 }
 0x404   :  { %v2656_v28 = vmax.f32 %v2520_v24, 0.0 }
 0x405   :  { %v2657_v4 = vmax.f32 %v2522_v26, 0.0  ;;  %v2912_v30 = vpop.f32.mrb[0].mxu1 }
 0x406   :  { %v2722_v31 = vpack.c.bf16 %v2656_v28, %v2654_v27  ;;  %v2914_v32 = vpop.f32.mrb[1].mxu1 }
 0x407   :  { %v2723_v35 = vpack.c.bf16 %v2657_v4, %v2655_v29  ;;  %v2525_v39 = vpop.f32.mrb[124].mxu0  ;;  %v2915_v36 = vpop.f32.mrb[2].mxu1 }
 0x408   :  { %v2526_v37 = vadd.f32 %v2525_v39, %v4846_v14  ;;  %v3855_v38 = vpack.c.bf16 %v2915_v36, %v2912_v30  ;;  %v2527_v40 = vpop.f32.mrb[125].mxu0  ;;  %v2917_v41 = vpop.f32.mrb[3].mxu1 }
 0x409   :  { %v2528_v42 = vadd.f32 %v2527_v40, %v4848_v15  ;;  %v2529_v43 = vpop.f32.mrb[126].mxu0  ;;  %3126 = vmatprep.mubr.bf16.mxu1 %v2723_v35 }
 0x40a   :  { %3999 = vst [vmem:[#allocation9 + $0x18] sm:$0xff] %v3855_v38   ;;  %v2530_v44 = vadd.f32 %v2529_v43, %v4846_v14  ;;  %v2531_v45 = vpop.f32.mrb[127].mxu0  ;;  %3127 = vmatmul.mubr.bf16.gmra.mrb[108].mxu1 %v2722_v31  ;;  %v2658_v47 = vmax.f32 %v2526_v37, 0.0 }
 0x40b   :  { %v2532_v46 = vadd.f32 %v2531_v45, %v4848_v15  ;;  %v2659_v49 = vmax.f32 %v2528_v42, 0.0 }
 0x40c   :  { %v2660_v48 = vmax.f32 %v2530_v44, 0.0 }
 0x40d   :  { %v2661_v50 = vmax.f32 %v2532_v46, 0.0  ;;  %v2920_v53 = vpop.f32.mrb[4].mxu1 }
 0x40e   :  { %v2724_v34 = vpack.c.bf16 %v2660_v48, %v2658_v47  ;;  %v2922_v54 = vpop.f32.mrb[5].mxu1 }
 0x40f   :  { %v2725_v55 = vpack.c.bf16 %v2661_v50, %v2659_v49  ;;  %v2888_v56 = vpop.f32.mrb[128].mxu0  ;;  %v2923_v57 = vpop.f32.mrb[6].mxu1 }
 0x410   :  { %v3860_v58 = vpack.c.bf16 %v2923_v57, %v2920_v53  ;;  %v2890_v59 = vpop.f32.mrb[129].mxu0  ;;  %v2925_v60 = vpop.f32.mrb[7].mxu1 }
 0x411   :  { %v2891_v61 = vpop.f32.mrb[130].mxu0  ;;  %3134 = vmatprep.mubr.bf16.mxu1 %v2725_v55 }
 0x412   :  { %4000 = vst [vmem:[#allocation9 + $0x20] sm:$0xff] %v3860_v58   ;;  %v3840_v14 = vpack.c.bf16 %v2891_v61, %v2888_v56  ;;  %v2893_v62 = vpop.f32.mrb[131].mxu0  ;;  %3135 = vmatmul.mubr.bf16.gmra.mrb[112].mxu1 %v2724_v34 }
 0x414   :  { %3841 = vst [vmem:[#allocation9] sm:$0xff] %v3840_v14  }
 0x415   :  { %v2928_v15 = vpop.f32.mrb[8].mxu1 }
 0x416   :  { %v2930_v63 = vpop.f32.mrb[9].mxu1 }
 0x417   :  { %v2896_v33 = vpop.f32.mrb[132].mxu0  ;;  %v2931_v0 = vpop.f32.mrb[10].mxu1 }
 0x418   :  { %v3865_v1 = vpack.c.bf16 %v2931_v0, %v2928_v15  ;;  %v2898_v52 = vpop.f32.mrb[133].mxu0  ;;  %v2933_v2 = vpop.f32.mrb[11].mxu1 }
 0x419   :  { %v2899_v3 = vpop.f32.mrb[134].mxu0 }
 0x41a   :  { %4001 = vst [vmem:[#allocation9 + $0x28] sm:$0xff] %v3865_v1   ;;  %v3845_v6 = vpack.c.bf16 %v2899_v3, %v2896_v33  ;;  %v2901_v7 = vpop.f32.mrb[135].mxu0 }
 0x41c   :  { %3997 = vst [vmem:[#allocation9 + $0x8] sm:$0xff] %v3845_v6  }
 0x41d   :  { %v2936_v8 = vpop.f32.mrb[12].mxu1 }
 0x41e   :  { %v2938_v9 = vpop.f32.mrb[13].mxu1 }
 0x41f   :  { %v2904_v10 = vpop.f32.mrb[136].mxu0  ;;  %v2939_v11 = vpop.f32.mrb[14].mxu1 }
 0x420   :  { %v3870_v12 = vpack.c.bf16 %v2939_v11, %v2936_v8  ;;  %v2906_v13 = vpop.f32.mrb[137].mxu0  ;;  %v2941_v51 = vpop.f32.mrb[15].mxu1 }
 0x421   :  { %v2907_v16 = vpop.f32.mrb[138].mxu0 }
 0x422   :  { %4002 = vst [vmem:[#allocation9 + $0x30] sm:$0xff] %v3870_v12   ;;  %v3850_v17 = vpack.c.bf16 %v2907_v16, %v2904_v10  ;;  %v2909_v5 = vpop.f32.mrb[139].mxu0 }
 0x424   :  { %3998 = vst [vmem:[#allocation9 + $0x10] sm:$0xff] %v3850_v17  }
 0x425   :  { %v2944_v18 = vpop.f32.mrb[16].mxu1 }
 0x426   :  { %v2946_v19 = vpop.f32.mrb[17].mxu1 }
 0x427   :  { %v2947_v20 = vpop.f32.mrb[18].mxu1 }
 0x428   :  { %v3875_v21 = vpack.c.bf16 %v2947_v20, %v2944_v18  ;;  %v2949_v22 = vpop.f32.mrb[19].mxu1 }
 0x42a   :  { %4003 = vst [vmem:[#allocation9 + $0x38] sm:$0xff] %v3875_v21  }
 0x42d   :  { %v2952_v23 = vpop.f32.mrb[20].mxu1 }
 0x42e   :  { %v2954_v24 = vpop.f32.mrb[21].mxu1 }
 0x42f   :  { %v2955_v25 = vpop.f32.mrb[22].mxu1 }
 0x430   :  { %v3880_v26 = vpack.c.bf16 %v2955_v25, %v2952_v23  ;;  %v2957_v27 = vpop.f32.mrb[23].mxu1 }
 0x432   :  { %4004 = vst [vmem:[#allocation9 + $0x40] sm:$0xff] %v3880_v26  }
 0x435   :  { %v2960_v28 = vpop.f32.mrb[24].mxu1 }
 0x436   :  { %v2962_v29 = vpop.f32.mrb[25].mxu1 }
 0x437   :  { %v2963_v4 = vpop.f32.mrb[26].mxu1 }
 0x438   :  { %v3885_v30 = vpack.c.bf16 %v2963_v4, %v2960_v28  ;;  %v2965_v31 = vpop.f32.mrb[27].mxu1 }
 0x43a   :  { %4005 = vst [vmem:[#allocation9 + $0x48] sm:$0xff] %v3885_v30  }
 0x43d   :  { %v2968_v32 = vpop.f32.mrb[28].mxu1 }
 0x43e   :  { %v2970_v35 = vpop.f32.mrb[29].mxu1 }
 0x43f   :  { %v2971_v39 = vpop.f32.mrb[30].mxu1 }
 0x440   :  { %v3890_v36 = vpack.c.bf16 %v2971_v39, %v2968_v32  ;;  %v2973_v37 = vpop.f32.mrb[31].mxu1 }
 0x442   :  { %4006 = vst [vmem:[#allocation9 + $0x50] sm:$0xff] %v3890_v36  }
 0x445   :  { %v2976_v38 = vpop.f32.mrb[32].mxu1 }
 0x446   :  { %v2978_v40 = vpop.f32.mrb[33].mxu1 }
 0x447   :  { %v2979_v41 = vpop.f32.mrb[34].mxu1 }
 0x448   :  { %v3895_v42 = vpack.c.bf16 %v2979_v41, %v2976_v38  ;;  %v2981_v43 = vpop.f32.mrb[35].mxu1 }
 0x44a   :  { %4007 = vst [vmem:[#allocation9 + $0x58] sm:$0xff] %v3895_v42  }
 0x44d   :  { %v2984_v44 = vpop.f32.mrb[36].mxu1 }
 0x44e   :  { %v2986_v45 = vpop.f32.mrb[37].mxu1 }
 0x44f   :  { %v2987_v46 = vpop.f32.mrb[38].mxu1 }
 0x450   :  { %v3900_v47 = vpack.c.bf16 %v2987_v46, %v2984_v44  ;;  %v2989_v48 = vpop.f32.mrb[39].mxu1 }
 0x452   :  { %4008 = vst [vmem:[#allocation9 + $0x60] sm:$0xff] %v3900_v47  }
 0x455   :  { %v2992_v49 = vpop.f32.mrb[40].mxu1 }
 0x456   :  { %v2994_v50 = vpop.f32.mrb[41].mxu1 }
 0x457   :  { %v2995_v53 = vpop.f32.mrb[42].mxu1 }
 0x458   :  { %v3905_v34 = vpack.c.bf16 %v2995_v53, %v2992_v49  ;;  %v2997_v54 = vpop.f32.mrb[43].mxu1 }
 0x45a   :  { %4009 = vst [vmem:[#allocation9 + $0x68] sm:$0xff] %v3905_v34  }
 0x45d   :  { %v3000_v55 = vpop.f32.mrb[44].mxu1 }
 0x45e   :  { %v3002_v56 = vpop.f32.mrb[45].mxu1 }
 0x45f   :  { %v3003_v57 = vpop.f32.mrb[46].mxu1 }
 0x460   :  { %v3910_v58 = vpack.c.bf16 %v3003_v57, %v3000_v55  ;;  %v3005_v59 = vpop.f32.mrb[47].mxu1 }
 0x462   :  { %4010 = vst [vmem:[#allocation9 + $0x70] sm:$0xff] %v3910_v58  }
 0x465   :  { %v3008_v60 = vpop.f32.mrb[48].mxu1 }
 0x466   :  { %v3010_v61 = vpop.f32.mrb[49].mxu1 }
 0x467   :  { %v3011_v14 = vpop.f32.mrb[50].mxu1 }
 0x468   :  { %v3915_v62 = vpack.c.bf16 %v3011_v14, %v3008_v60  ;;  %v3013_v15 = vpop.f32.mrb[51].mxu1 }
 0x46a   :  { %4011 = vst [vmem:[#allocation9 + $0x78] sm:$0xff] %v3915_v62  }
 0x46d   :  { %v3016_v63 = vpop.f32.mrb[52].mxu1 }
 0x46e   :  { %v3018_v33 = vpop.f32.mrb[53].mxu1 }
 0x46f   :  { %v3019_v0 = vpop.f32.mrb[54].mxu1 }
 0x470   :  { %v3920_v1 = vpack.c.bf16 %v3019_v0, %v3016_v63  ;;  %v3021_v52 = vpop.f32.mrb[55].mxu1 }
 0x472   :  { %4012 = vst [vmem:[#allocation9 + $0x80] sm:$0xff] %v3920_v1  }
 0x475   :  { %v3024_v2 = vpop.f32.mrb[56].mxu1 }
 0x476   :  { %v3026_v3 = vpop.f32.mrb[57].mxu1 }
 0x477   :  { %v3027_v6 = vpop.f32.mrb[58].mxu1 }
 0x478   :  { %v3925_v7 = vpack.c.bf16 %v3027_v6, %v3024_v2  ;;  %v3029_v8 = vpop.f32.mrb[59].mxu1 }
 0x47a   :  { %4013 = vst [vmem:[#allocation9 + $0x88] sm:$0xff] %v3925_v7  }
 0x47d   :  { %v3032_v9 = vpop.f32.mrb[60].mxu1 }
 0x47e   :  { %v3034_v10 = vpop.f32.mrb[61].mxu1 }
 0x47f   :  { %v3035_v11 = vpop.f32.mrb[62].mxu1 }
 0x480   :  { %v3930_v12 = vpack.c.bf16 %v3035_v11, %v3032_v9  ;;  %v3037_v13 = vpop.f32.mrb[63].mxu1 }
 0x482   :  { %4014 = vst [vmem:[#allocation9 + $0x90] sm:$0xff] %v3930_v12  }
 0x485   :  { %v3040_v51 = vpop.f32.mrb[64].mxu1 }
 0x486   :  { %v3042_v16 = vpop.f32.mrb[65].mxu1 }
 0x487   :  { %v3043_v17 = vpop.f32.mrb[66].mxu1 }
 0x488   :  { %v3935_v5 = vpack.c.bf16 %v3043_v17, %v3040_v51  ;;  %v3045_v18 = vpop.f32.mrb[67].mxu1 }
 0x48a   :  { %4015 = vst [vmem:[#allocation9 + $0x98] sm:$0xff] %v3935_v5  }
 0x48d   :  { %v3048_v19 = vpop.f32.mrb[68].mxu1 }
 0x48e   :  { %v3050_v20 = vpop.f32.mrb[69].mxu1 }
 0x48f   :  { %v3051_v21 = vpop.f32.mrb[70].mxu1 }
 0x490   :  { %v3940_v22 = vpack.c.bf16 %v3051_v21, %v3048_v19  ;;  %v3053_v23 = vpop.f32.mrb[71].mxu1 }
 0x492   :  { %4016 = vst [vmem:[#allocation9 + $0xa0] sm:$0xff] %v3940_v22  }
 0x495   :  { %v3056_v24 = vpop.f32.mrb[72].mxu1 }
 0x496   :  { %v3058_v25 = vpop.f32.mrb[73].mxu1 }
 0x497   :  { %v3059_v26 = vpop.f32.mrb[74].mxu1 }
 0x498   :  { %v3945_v27 = vpack.c.bf16 %v3059_v26, %v3056_v24  ;;  %v3061_v28 = vpop.f32.mrb[75].mxu1 }
 0x49a   :  { %4017 = vst [vmem:[#allocation9 + $0xa8] sm:$0xff] %v3945_v27  }
 0x49d   :  { %v3064_v29 = vpop.f32.mrb[76].mxu1 }
 0x49e   :  { %v3066_v4 = vpop.f32.mrb[77].mxu1 }
 0x49f   :  { %v3067_v30 = vpop.f32.mrb[78].mxu1 }
 0x4a0   :  { %v3950_v31 = vpack.c.bf16 %v3067_v30, %v3064_v29  ;;  %v3069_v32 = vpop.f32.mrb[79].mxu1 }
 0x4a2   :  { %4018 = vst [vmem:[#allocation9 + $0xb0] sm:$0xff] %v3950_v31  }
 0x4a5   :  { %v3072_v35 = vpop.f32.mrb[80].mxu1 }
 0x4a6   :  { %v3074_v39 = vpop.f32.mrb[81].mxu1 }
 0x4a7   :  { %v3075_v36 = vpop.f32.mrb[82].mxu1 }
 0x4a8   :  { %v3955_v37 = vpack.c.bf16 %v3075_v36, %v3072_v35  ;;  %v3077_v38 = vpop.f32.mrb[83].mxu1 }
 0x4aa   :  { %4019 = vst [vmem:[#allocation9 + $0xb8] sm:$0xff] %v3955_v37  }
 0x4ad   :  { %v3080_v40 = vpop.f32.mrb[84].mxu1 }
 0x4ae   :  { %v3082_v41 = vpop.f32.mrb[85].mxu1 }
 0x4af   :  { %v3083_v42 = vpop.f32.mrb[86].mxu1 }
 0x4b0   :  { %v3960_v43 = vpack.c.bf16 %v3083_v42, %v3080_v40  ;;  %v3085_v44 = vpop.f32.mrb[87].mxu1 }
 0x4b2   :  { %4020 = vst [vmem:[#allocation9 + $0xc0] sm:$0xff] %v3960_v43  }
 0x4b5   :  { %v3088_v45 = vpop.f32.mrb[88].mxu1 }
 0x4b6   :  { %v3090_v46 = vpop.f32.mrb[89].mxu1 }
 0x4b7   :  { %v3091_v47 = vpop.f32.mrb[90].mxu1 }
 0x4b8   :  { %v3965_v48 = vpack.c.bf16 %v3091_v47, %v3088_v45  ;;  %v3093_v49 = vpop.f32.mrb[91].mxu1 }
 0x4ba   :  { %4021 = vst [vmem:[#allocation9 + $0xc8] sm:$0xff] %v3965_v48  }
 0x4bd   :  { %v3096_v50 = vpop.f32.mrb[92].mxu1 }
 0x4be   :  { %v3098_v53 = vpop.f32.mrb[93].mxu1 }
 0x4bf   :  { %v3099_v34 = vpop.f32.mrb[94].mxu1 }
 0x4c0   :  { %v3970_v54 = vpack.c.bf16 %v3099_v34, %v3096_v50  ;;  %v3101_v55 = vpop.f32.mrb[95].mxu1 }
 0x4c2   :  { %4022 = vst [vmem:[#allocation9 + $0xd0] sm:$0xff] %v3970_v54  }
 0x4c5   :  { %v3104_v56 = vpop.f32.mrb[96].mxu1 }
 0x4c6   :  { %v3106_v57 = vpop.f32.mrb[97].mxu1 }
 0x4c7   :  { %v3107_v58 = vpop.f32.mrb[98].mxu1 }
 0x4c8   :  { %v3975_v59 = vpack.c.bf16 %v3107_v58, %v3104_v56  ;;  %v3109_v60 = vpop.f32.mrb[99].mxu1 }
 0x4ca   :  { %4023 = vst [vmem:[#allocation9 + $0xd8] sm:$0xff] %v3975_v59  }
 0x4cd   :  { %v3112_v61 = vpop.f32.mrb[100].mxu1 }
 0x4ce   :  { %v3114_v14 = vpop.f32.mrb[101].mxu1 }
 0x4cf   :  { %v3115_v62 = vpop.f32.mrb[102].mxu1 }
 0x4d0   :  { %v3980_v15 = vpack.c.bf16 %v3115_v62, %v3112_v61  ;;  %v3117_v63 = vpop.f32.mrb[103].mxu1 }
 0x4d2   :  { %4024 = vst [vmem:[#allocation9 + $0xe0] sm:$0xff] %v3980_v15  }
 0x4d5   :  { %v3120_v33 = vpop.f32.mrb[104].mxu1 }
 0x4d6   :  { %v3122_v0 = vpop.f32.mrb[105].mxu1 }
 0x4d7   :  { %v3123_v1 = vpop.f32.mrb[106].mxu1 }
 0x4d8   :  { %v3985_v52 = vpack.c.bf16 %v3123_v1, %v3120_v33  ;;  %v3125_v2 = vpop.f32.mrb[107].mxu1 }
 0x4da   :  { %4025 = vst [vmem:[#allocation9 + $0xe8] sm:$0xff] %v3985_v52  }
 0x4dd   :  { %v3128_v3 = vpop.f32.mrb[108].mxu1 }
 0x4de   :  { %v3130_v6 = vpop.f32.mrb[109].mxu1 }
 0x4df   :  { %v3131_v7 = vpop.f32.mrb[110].mxu1 }
 0x4e0   :  { %v3990_v8 = vpack.c.bf16 %v3131_v7, %v3128_v3  ;;  %v3133_v9 = vpop.f32.mrb[111].mxu1 }
 0x4e2   :  { %4026 = vst [vmem:[#allocation9 + $0xf0] sm:$0xff] %v3990_v8  }
 0x4e5   :  { %v3136_v10 = vpop.f32.mrb[112].mxu1 }
 0x4e6   :  { %v3138_v11 = vpop.f32.mrb[113].mxu1 }
 0x4e7   :  { %v3139_v12 = vpop.f32.mrb[114].mxu1 }
 0x4e8   :  { %v3995_v13 = vpack.c.bf16 %v3139_v12, %v3136_v10  ;;  %v3141_v51 = vpop.f32.mrb[115].mxu1 }
 0x4ea   :  { %4027 = vst [vmem:[#allocation9 + $0xf8] sm:$0xff] %v3995_v13  }
 0x4eb PF:  { %s4367_s5 = smov [#allocation9]  }
 0x4ec   :  { %s3468_s14 = sshll.u32 %s4367_s5, 4  ;;  %s3469_s14 = int_to_ptr.vmem [resolvable:$true] %s3468_s14 }
 0x4ed   :  { %s4335_s15 = scalar_lea.vmem %s3469_s14, 4096  ;;  %p4340_p2 = scmp.lt.s32.totalorder %s3469_s14, %s3469_s14 }
 0x4ee   :  { %p4336_p1 = scmp.ne.s32.totalorder %s3469_s14, %s4335_s15  ;;  %p4341_p3 = scmp.lt.s32.totalorder %s4335_s15, %s4335_s15 }
 0x4f0   :  { %p4342_p4 = por %p4341_p3, %p4340_p2 }
 0x4f2   :  { %p4343_p5 = pnand %p4342_p4, %p4336_p1 }
 0x4f4   :  { %4346 = shalt.err (!%p4343_p5)
}
 0x4f5   :  { %s4347_s18 = scalar_lea.hbm %s5025_s7, 4096 }
 0x4f6   :  { %p4348_p6 = scmp.ne.s32.totalorder %s5025_s7, %s4347_s18  ;;  %p4351_p7 = scmp.lt.u32.totalorder %s4347_s18, %s5025_s7 }
 0x4f8   :  { %p4353_p8 = pnand %p4351_p7, %p4348_p6 }
 0x4fa   :  { %4356 = shalt.err (!%p4353_p8)
}
 0x4fb   :  { %s4368_s22 = smov 64   ;;  %s4369_s23 = smov 4  }
 0x4fc   :  { %3474 = dma.vmem_to_hbm [thread:$0]  %s3469_s14, 4096, %s5025_s7, [#allocation8], %s4368_s22, %s4368_s22, %s4369_s23  }
 0x4fd   :  { %4359 = dma.done.wait [#allocation8], 4096  }
 0x4fe   :  { %4360 = vsyncadd [#allocation8], 4294963200 }
 0x4ff   :  { %3478 = vsyncpa [#allocation7], 1 }
 0x500   :  { %3479 = vsyncpa [#allocation8], 1 }

</bundles_post_ra>
